<compile_context>
chip_gen: v7x
topology: tpu7x:2x2x1
jax: 0.10.0
libtpu: 0.0.40
codegen_flags: <defaults>
</compile_context>

<pallas_src>
import numpy as np

import jax
import jax.numpy as jnp
from jax import lax
from jax.experimental import pallas as pl
from jax.experimental.pallas import tpu as pltpu  # noqa: F401  (TPU backend)


# ---------------------------------------------------------------------------
# Static network / layout configuration
# ---------------------------------------------------------------------------
H_IMG, W_IMG, C_IN = 32, 32, 3
KH = KW = 5
C1_OUT, C2_OUT = 6, 10
Y_DIM = 6
OUT_SIZE = 4
FC1_OUT, FC2_OUT = 200, 100

H1, W1 = H_IMG - KH + 1, W_IMG - KW + 1          # 28, 28   (conv1 output)
HP1, WP1 = H1 // 2, W1 // 2                      # 14, 14   (pool1 output)
H2, W2 = HP1 - KH + 1, WP1 - KW + 1              # 10, 10   (conv2 output)
HP2, WP2 = H2 // 2, W2 // 2                      # 5, 5     (pool2 output)

# Channel padding so every conv matmul has an 8-aligned contraction dim.
C_IN_PAD = 8
C1_PAD = 8

# Flat-spatial layout strides: position of pixel (h, w) on the lane axis is
# ROW*h + COL*w; each 2x2 pool doubles both strides (valid data gets sparser
# instead of being compacted).
ROW0, COL0 = W_IMG, 1        # input / conv1 coordinates
ROW1, COL1 = 2 * ROW0, 2     # pool1 / conv2 coordinates
ROW2, COL2 = 2 * ROW1, 4     # pool2 coordinates

L0 = H_IMG * W_IMG + 128                              # 1152 padded input len
L1 = H1 * ROW0                                        # 896  conv1 flat len
L1P = L1 - 1 - ROW0                                   # 863  after pool1
CONV2_MAX_OFF = (KH - 1) * ROW1 + (KW - 1) * COL1     # 264
L2 = L1P - CONV2_MAX_OFF                              # 599  conv2 flat len
L2P = L2 - COL1 - ROW1                                # 533  after pool2
N_CONV_FEAT = C2_OUT * HP2 * WP2                      # 250
FC1_IN = N_CONV_FEAT + Y_DIM                          # 256

# Layout sanity: every slice stays in bounds, every valid sample is covered.
assert (KH - 1) * ROW0 + (KW - 1) + L1 <= L0
assert L1 >= (H1 - 1) * ROW0 + (W1 - 1) + 1
assert CONV2_MAX_OFF + L2 <= L1P
assert L2 >= (H2 - 1) * ROW1 + (W2 - 1) * COL1 + 1
assert L2P >= (HP2 - 1) * ROW2 + (WP2 - 1) * COL2 + 1


# ---------------------------------------------------------------------------
# Fused kernel
# ---------------------------------------------------------------------------
def _cnn_fused_kernel(xf_ref, w1_ref, b1_ref, w2_ref, b2_ref, sel_ref, y_ref,
                      fc1wx_ref, fc1wy_ref, fc1b_ref, fc2w_ref, fc2b_ref,
                      fc3w_ref, fc3b_ref, o_ref):
    f32 = jnp.float32
    xf = xf_ref[...]                                       # (8, L0)

    # conv1 (+bias, ReLU): 25 shifted (8,8)@(8,L1) matmuls, spatial on lanes.
    c1 = jnp.zeros((C1_PAD, L1), f32)
    for i in range(KH):
        for j in range(KW):
            off = i * ROW0 + j * COL0
            c1 = c1 + jnp.dot(w1_ref[i * KW + j], xf[:, off:off + L1],
                              preferred_element_type=f32)
    c1 = jnp.maximum(c1 + b1_ref[...], 0.0)

    # maxpool1 2x2/2: two shifted-slice maxes; valid data at p = 64*hp + 2*wp.
    t = jnp.maximum(c1[:, :-COL0], c1[:, COL0:])
    p1 = jnp.maximum(t[:, :-ROW0], t[:, ROW0:])            # (8, L1P)

    # conv2 (+bias, ReLU) directly on the strided pooled layout.
    c2 = jnp.zeros((C2_OUT, L2), f32)
    for i in range(KH):
        for j in range(KW):
            off = i * ROW1 + j * COL1
            c2 = c2 + jnp.dot(w2_ref[i * KW + j], p1[:, off:off + L2],
                              preferred_element_type=f32)
    c2 = jnp.maximum(c2 + b2_ref[...], 0.0)

    # maxpool2 2x2/2: valid data at p = 128*hp + 4*wp.
    t = jnp.maximum(c2[:, :-COL1], c2[:, COL1:])
    z2 = jnp.maximum(t[:, :-ROW1], t[:, ROW1:])            # (10, L2P)

    # Compact the 5x5 valid positions per channel with a constant 0/1 matrix.
    zc = jnp.dot(z2, sel_ref[...], preferred_element_type=f32)   # (10, 25)

    # fc1 over [flatten(zc, CHW order), y] (concat folded into a weight split),
    # then fc2, fc3 -- all fused, activations never leave vregs.
    h = jnp.dot(y_ref[...], fc1wy_ref[...], preferred_element_type=f32)
    h = h + fc1b_ref[...]
    for c in range(C2_OUT):
        h = h + jnp.dot(zc[c:c + 1, :], fc1wx_ref[c],
                        preferred_element_type=f32)
    h = jnp.maximum(h, 0.0)
    h = jnp.maximum(jnp.dot(h, fc2w_ref[...], preferred_element_type=f32)
                    + fc2b_ref[...], 0.0)
    o_ref[...] = (jnp.dot(h, fc3w_ref[...], preferred_element_type=f32)
                  + fc3b_ref[...])


def _fs(*shape):
    zeros = (0,) * len(shape)
    return pl.BlockSpec(tuple(shape), lambda i, z=zeros: z)


def cnn_forward_pallas(prep, x_hwc, y):
    # Tiny layout-only glue on the 12 KiB image (HWC -> CHW -> padded flat);
    # everything else was repacked once in prepare_params.
    x = jnp.transpose(x_hwc, (2, 0, 1)).astype(jnp.float32)       # (3, 32, 32)
    xf = jnp.pad(x.reshape(C_IN, H_IMG * W_IMG),
                 ((0, C_IN_PAD - C_IN), (0, L0 - H_IMG * W_IMG)))

    in_specs = [
        _fs(C_IN_PAD, L0),                    # xf
        _fs(KH * KW, C1_PAD, C_IN_PAD),       # w1r
        _fs(C1_PAD, 1),                       # b1
        _fs(KH * KW, C2_OUT, C1_PAD),         # w2r
        _fs(C2_OUT, 1),                       # b2
        _fs(L2P, HP2 * WP2),                  # sel
        _fs(1, Y_DIM),                        # y
        _fs(C2_OUT, HP2 * WP2, FC1_OUT),      # fc1 weights (conv-feature part)
        _fs(Y_DIM, FC1_OUT),                  # fc1 weights (y part)
        _fs(1, FC1_OUT),                      # fc1 bias
        _fs(FC1_OUT, FC2_OUT),                # fc2 weights
        _fs(1, FC2_OUT),                      # fc2 bias
        _fs(FC2_OUT, OUT_SIZE),               # fc3 weights
        _fs(1, OUT_SIZE),                     # fc3 bias
    ]
    return pl.pallas_call(
        _cnn_fused_kernel,
        out_shape=jax.ShapeDtypeStruct((1, OUT_SIZE), jnp.float32),
        grid=(1,),
        in_specs=in_specs,
        out_specs=_fs(1, OUT_SIZE),
    )(xf, prep["w1r"], prep["b1"], prep["w2r"], prep["b2"], prep["sel"], y,
      prep["fc1wx"], prep["fc1wy"], prep["fc1b"], prep["fc2w"], prep["fc2b"],
      prep["fc3w"], prep["fc3b"])


# ---------------------------------------------------------------------------
# One-time parameter repacking (outside the jitted forward)
# ---------------------------------------------------------------------------
def prepare_params(params):
    sel = np.zeros((L2P, HP2 * WP2), np.float32)
    for hp in range(HP2):
        for wp in range(WP2):
            sel[ROW2 * hp + COL2 * wp, hp * WP2 + wp] = 1.0

    w1 = jnp.transpose(params["conv1_w"], (2, 3, 0, 1))           # (5,5,6,3)
    w1 = jnp.pad(w1, ((0, 0), (0, 0),
                      (0, C1_PAD - C1_OUT), (0, C_IN_PAD - C_IN)))
    w2 = jnp.transpose(params["conv2_w"], (2, 3, 0, 1))           # (5,5,10,6)
    w2 = jnp.pad(w2, ((0, 0), (0, 0), (0, 0), (0, C1_PAD - C1_OUT)))
    fc1_wt = params["fc1_w"].T                                    # (256, 200)

    return {
        "w1r": w1.reshape(KH * KW, C1_PAD, C_IN_PAD),
        "b1": jnp.pad(params["conv1_b"], (0, C1_PAD - C1_OUT)).reshape(-1, 1),
        "w2r": w2.reshape(KH * KW, C2_OUT, C1_PAD),
        "b2": params["conv2_b"].reshape(-1, 1),
        "sel": jnp.asarray(sel),
        "fc1wx": fc1_wt[:N_CONV_FEAT].reshape(C2_OUT, HP2 * WP2, FC1_OUT),
        "fc1wy": fc1_wt[N_CONV_FEAT:],
        "fc1b": params["fc1_b"].reshape(1, -1),
        "fc2w": params["fc2_w"].T,
        "fc2b": params["fc2_b"].reshape(1, -1),
        "fc3w": params["fc3_w"].T,
        "fc3b": params["fc3_b"].reshape(1, -1),
    }


# ---------------------------------------------------------------------------
# Pure-XLA reference (mirrors the PyTorch module) for a correctness check
# ---------------------------------------------------------------------------
def cnn_forward_ref(params, x_hwc, y):
    hi = lax.Precision.HIGHEST
    x = jnp.transpose(x_hwc, (2, 0, 1)).astype(jnp.float32)[None]

    def conv_relu(v, w, b):
        v = lax.conv_general_dilated(
            v, w, (1, 1), "VALID",
            dimension_numbers=("NCHW", "OIHW", "NCHW"), precision=hi)
        return jax.nn.relu(v + b[None, :, None, None])

    def pool(v):
        return lax.reduce_window(v, -jnp.inf, lax.max,
                                 (1, 1, 2, 2), (1, 1, 2, 2), "VALID")

    v = pool(conv_relu(x, params["conv1_w"], params["conv1_b"]))
    v = pool(conv_relu(v, params["conv2_w"], params["conv2_b"]))
    v = v.reshape(1, -1)
    v = jnp.concatenate([v, y], axis=1)
    v = jax.nn.relu(jnp.dot(v, params["fc1_w"].T, precision=hi)
                    + params["fc1_b"])
    v = jax.nn.relu(jnp.dot(v, params["fc2_w"].T, precision=hi)
                    + params["fc2_b"])
    return jnp.dot(v, params["fc3_w"].T, precision=hi) + params["fc3_b"]


# ---------------------------------------------------------------------------
if __name__ == "__main__":
    key = jax.random.PRNGKey(0)
    ks = jax.random.split(key, 12)

    def init(k, shape, fan_in):
        bound = 1.0 / float(fan_in) ** 0.5
        return jax.random.uniform(k, shape, jnp.float32, -bound, bound)

    params = {
        "conv1_w": init(ks[0], (C1_OUT, C_IN, KH, KW), C_IN * KH * KW),
        "conv1_b": init(ks[1], (C1_OUT,), C_IN * KH * KW),
        "conv2_w": init(ks[2], (C2_OUT, C1_OUT, KH, KW), C1_OUT * KH * KW),
        "conv2_b": init(ks[3], (C2_OUT,), C1_OUT * KH * KW),
        "fc1_w": init(ks[4], (FC1_OUT, FC1_IN), FC1_IN),
        "fc1_b": init(ks[5], (FC1_OUT,), FC1_IN),
        "fc2_w": init(ks[6], (FC2_OUT, FC1_OUT), FC1_OUT),
        "fc2_b": init(ks[7], (FC2_OUT,), FC1_OUT),
        "fc3_w": init(ks[8], (OUT_SIZE, FC2_OUT), FC2_OUT),
        "fc3_b": init(ks[9], (OUT_SIZE,), FC2_OUT),
    }

    x_hwc = jax.random.normal(ks[10], (H_IMG, W_IMG, C_IN), jnp.float32)
    y_vec = jax.random.normal(ks[11], (1, Y_DIM), jnp.float32)

    prep = prepare_params(params)                 # one-time repack (not jitted)
    fwd = jax.jit(cnn_forward_pallas)
    out = jax.block_until_ready(fwd(prep, x_hwc, y_vec))
    assert out.shape == (1, OUT_SIZE)

    ref = jax.block_until_ready(jax.jit(cnn_forward_ref)(params, x_hwc, y_vec))
    assert np.allclose(np.asarray(out), np.asarray(ref), rtol=5e-3, atol=5e-3), (
        np.asarray(out), np.asarray(ref))

    print("KERNEL_OK")
</pallas_src>

<mosaic_0001>
module attributes {stable_mosaic.version = 11 : i64} {
  func.func @_cnn_fused_kernel(%arg0: i32, %arg1: memref<8x1152xf32, #tpu.memory_space<vmem>>, %arg2: memref<25x8x8xf32, #tpu.memory_space<vmem>>, %arg3: memref<8x1xf32, #tpu.memory_space<vmem>>, %arg4: memref<25x10x8xf32, #tpu.memory_space<vmem>>, %arg5: memref<10x1xf32, #tpu.memory_space<vmem>>, %arg6: memref<533x25xf32, #tpu.memory_space<vmem>>, %arg7: memref<1x6xf32, #tpu.memory_space<vmem>>, %arg8: memref<10x25x200xf32, #tpu.memory_space<vmem>>, %arg9: memref<6x200xf32, #tpu.memory_space<vmem>>, %arg10: memref<1x200xf32, #tpu.memory_space<vmem>>, %arg11: memref<200x100xf32, #tpu.memory_space<vmem>>, %arg12: memref<1x100xf32, #tpu.memory_space<vmem>>, %arg13: memref<100x4xf32, #tpu.memory_space<vmem>>, %arg14: memref<1x4xf32, #tpu.memory_space<vmem>>, %arg15: memref<1x4xf32, #tpu.memory_space<vmem>>) attributes {dimension_semantics = [#tpu.dimension_semantics<arbitrary>], iteration_bounds = array<i64: 1>, scalar_prefetch = 0 : i64, scratch_operands = 0 : i64, tpu.core_type = #tpu.core_type<tc>, window_params = [{pipeline_mode = #tpu.pipeline_mode<synchronous>, transform_indices = @transform_0, window_bounds = array<i64: 8, 1152>}, {pipeline_mode = #tpu.pipeline_mode<synchronous>, transform_indices = @transform_1, window_bounds = array<i64: 25, 8, 8>}, {pipeline_mode = #tpu.pipeline_mode<synchronous>, transform_indices = @transform_2, window_bounds = array<i64: 8, 1>}, {pipeline_mode = #tpu.pipeline_mode<synchronous>, transform_indices = @transform_3, window_bounds = array<i64: 25, 10, 8>}, {pipeline_mode = #tpu.pipeline_mode<synchronous>, transform_indices = @transform_4, window_bounds = array<i64: 10, 1>}, {pipeline_mode = #tpu.pipeline_mode<synchronous>, transform_indices = @transform_5, window_bounds = array<i64: 533, 25>}, {pipeline_mode = #tpu.pipeline_mode<synchronous>, transform_indices = @transform_6, window_bounds = array<i64: 1, 6>}, {pipeline_mode = #tpu.pipeline_mode<synchronous>, transform_indices = @transform_7, window_bounds = array<i64: 10, 25, 200>}, {pipeline_mode = #tpu.pipeline_mode<synchronous>, transform_indices = @transform_8, window_bounds = array<i64: 6, 200>}, {pipeline_mode = #tpu.pipeline_mode<synchronous>, transform_indices = @transform_9, window_bounds = array<i64: 1, 200>}, {pipeline_mode = #tpu.pipeline_mode<synchronous>, transform_indices = @transform_10, window_bounds = array<i64: 200, 100>}, {pipeline_mode = #tpu.pipeline_mode<synchronous>, transform_indices = @transform_11, window_bounds = array<i64: 1, 100>}, {pipeline_mode = #tpu.pipeline_mode<synchronous>, transform_indices = @transform_12, window_bounds = array<i64: 100, 4>}, {pipeline_mode = #tpu.pipeline_mode<synchronous>, transform_indices = @transform_13, window_bounds = array<i64: 1, 4>}, {pipeline_mode = #tpu.pipeline_mode<synchronous>, transform_indices = @transform_14, window_bounds = array<i64: 1, 4>}]} {
    %c0 = arith.constant 0 : index
    %c0_0 = arith.constant 0 : index
    %0 = vector.load %arg1[%c0, %c0_0] : memref<8x1152xf32, #tpu.memory_space<vmem>>, vector<8x1152xf32>
    %cst = arith.constant 0.000000e+00 : f32
    %1 = vector.broadcast %cst : f32 to vector<8x896xf32>
    %c0_1 = arith.constant 0 : index
    %c0_2 = arith.constant 0 : index
    %c0_3 = arith.constant 0 : index
    %2 = vector.load %arg2[%c0_1, %c0_2, %c0_3] : memref<25x8x8xf32, #tpu.memory_space<vmem>>, vector<1x8x8xf32>
    %3 = vector.shape_cast %2 : vector<1x8x8xf32> to vector<8x8xf32>
    %4 = vector.extract_strided_slice %0 {offsets = [0, 0], sizes = [8, 896], strides = [1, 1]} : vector<8x1152xf32> to vector<8x896xf32>
    %cst_4 = arith.constant dense<0.000000e+00> : vector<8x896xf32>
    %5 = tpu.matmul %3, %4, %cst_4 {dimension_numbers = #tpu.dot_dimension_numbers<[1], [0], [0], [1], [0, 0, 1, 1], [], []>} : vector<8x8xf32>, vector<8x896xf32>, vector<8x896xf32> -> vector<8x896xf32>
    %6 = arith.addf %1, %5 : vector<8x896xf32>
    %c1 = arith.constant 1 : index
    %c0_5 = arith.constant 0 : index
    %c0_6 = arith.constant 0 : index
    %7 = vector.load %arg2[%c1, %c0_5, %c0_6] : memref<25x8x8xf32, #tpu.memory_space<vmem>>, vector<1x8x8xf32>
    %8 = vector.shape_cast %7 : vector<1x8x8xf32> to vector<8x8xf32>
    %9 = vector.extract_strided_slice %0 {offsets = [0, 1], sizes = [8, 896], strides = [1, 1]} : vector<8x1152xf32> to vector<8x896xf32>
    %cst_7 = arith.constant dense<0.000000e+00> : vector<8x896xf32>
    %10 = tpu.matmul %8, %9, %cst_7 {dimension_numbers = #tpu.dot_dimension_numbers<[1], [0], [0], [1], [0, 0, 1, 1], [], []>} : vector<8x8xf32>, vector<8x896xf32>, vector<8x896xf32> -> vector<8x896xf32>
    %11 = arith.addf %6, %10 : vector<8x896xf32>
    %c2 = arith.constant 2 : index
    %c0_8 = arith.constant 0 : index
    %c0_9 = arith.constant 0 : index
    %12 = vector.load %arg2[%c2, %c0_8, %c0_9] : memref<25x8x8xf32, #tpu.memory_space<vmem>>, vector<1x8x8xf32>
    %13 = vector.shape_cast %12 : vector<1x8x8xf32> to vector<8x8xf32>
    %14 = vector.extract_strided_slice %0 {offsets = [0, 2], sizes = [8, 896], strides = [1, 1]} : vector<8x1152xf32> to vector<8x896xf32>
    %cst_10 = arith.constant dense<0.000000e+00> : vector<8x896xf32>
    %15 = tpu.matmul %13, %14, %cst_10 {dimension_numbers = #tpu.dot_dimension_numbers<[1], [0], [0], [1], [0, 0, 1, 1], [], []>} : vector<8x8xf32>, vector<8x896xf32>, vector<8x896xf32> -> vector<8x896xf32>
    %16 = arith.addf %11, %15 : vector<8x896xf32>
    %c3 = arith.constant 3 : index
    %c0_11 = arith.constant 0 : index
    %c0_12 = arith.constant 0 : index
    %17 = vector.load %arg2[%c3, %c0_11, %c0_12] : memref<25x8x8xf32, #tpu.memory_space<vmem>>, vector<1x8x8xf32>
    %18 = vector.shape_cast %17 : vector<1x8x8xf32> to vector<8x8xf32>
    %19 = vector.extract_strided_slice %0 {offsets = [0, 3], sizes = [8, 896], strides = [1, 1]} : vector<8x1152xf32> to vector<8x896xf32>
    %cst_13 = arith.constant dense<0.000000e+00> : vector<8x896xf32>
    %20 = tpu.matmul %18, %19, %cst_13 {dimension_numbers = #tpu.dot_dimension_numbers<[1], [0], [0], [1], [0, 0, 1, 1], [], []>} : vector<8x8xf32>, vector<8x896xf32>, vector<8x896xf32> -> vector<8x896xf32>
    %21 = arith.addf %16, %20 : vector<8x896xf32>
    %c4 = arith.constant 4 : index
    %c0_14 = arith.constant 0 : index
    %c0_15 = arith.constant 0 : index
    %22 = vector.load %arg2[%c4, %c0_14, %c0_15] : memref<25x8x8xf32, #tpu.memory_space<vmem>>, vector<1x8x8xf32>
    %23 = vector.shape_cast %22 : vector<1x8x8xf32> to vector<8x8xf32>
    %24 = vector.extract_strided_slice %0 {offsets = [0, 4], sizes = [8, 896], strides = [1, 1]} : vector<8x1152xf32> to vector<8x896xf32>
    %cst_16 = arith.constant dense<0.000000e+00> : vector<8x896xf32>
    %25 = tpu.matmul %23, %24, %cst_16 {dimension_numbers = #tpu.dot_dimension_numbers<[1], [0], [0], [1], [0, 0, 1, 1], [], []>} : vector<8x8xf32>, vector<8x896xf32>, vector<8x896xf32> -> vector<8x896xf32>
    %26 = arith.addf %21, %25 : vector<8x896xf32>
    %c5 = arith.constant 5 : index
    %c0_17 = arith.constant 0 : index
    %c0_18 = arith.constant 0 : index
    %27 = vector.load %arg2[%c5, %c0_17, %c0_18] : memref<25x8x8xf32, #tpu.memory_space<vmem>>, vector<1x8x8xf32>
    %28 = vector.shape_cast %27 : vector<1x8x8xf32> to vector<8x8xf32>
    %29 = vector.extract_strided_slice %0 {offsets = [0, 32], sizes = [8, 896], strides = [1, 1]} : vector<8x1152xf32> to vector<8x896xf32>
    %cst_19 = arith.constant dense<0.000000e+00> : vector<8x896xf32>
    %30 = tpu.matmul %28, %29, %cst_19 {dimension_numbers = #tpu.dot_dimension_numbers<[1], [0], [0], [1], [0, 0, 1, 1], [], []>} : vector<8x8xf32>, vector<8x896xf32>, vector<8x896xf32> -> vector<8x896xf32>
    %31 = arith.addf %26, %30 : vector<8x896xf32>
    %c6 = arith.constant 6 : index
    %c0_20 = arith.constant 0 : index
    %c0_21 = arith.constant 0 : index
    %32 = vector.load %arg2[%c6, %c0_20, %c0_21] : memref<25x8x8xf32, #tpu.memory_space<vmem>>, vector<1x8x8xf32>
    %33 = vector.shape_cast %32 : vector<1x8x8xf32> to vector<8x8xf32>
    %34 = vector.extract_strided_slice %0 {offsets = [0, 33], sizes = [8, 896], strides = [1, 1]} : vector<8x1152xf32> to vector<8x896xf32>
    %cst_22 = arith.constant dense<0.000000e+00> : vector<8x896xf32>
    %35 = tpu.matmul %33, %34, %cst_22 {dimension_numbers = #tpu.dot_dimension_numbers<[1], [0], [0], [1], [0, 0, 1, 1], [], []>} : vector<8x8xf32>, vector<8x896xf32>, vector<8x896xf32> -> vector<8x896xf32>
    %36 = arith.addf %31, %35 : vector<8x896xf32>
    %c7 = arith.constant 7 : index
    %c0_23 = arith.constant 0 : index
    %c0_24 = arith.constant 0 : index
    %37 = vector.load %arg2[%c7, %c0_23, %c0_24] : memref<25x8x8xf32, #tpu.memory_space<vmem>>, vector<1x8x8xf32>
    %38 = vector.shape_cast %37 : vector<1x8x8xf32> to vector<8x8xf32>
    %39 = vector.extract_strided_slice %0 {offsets = [0, 34], sizes = [8, 896], strides = [1, 1]} : vector<8x1152xf32> to vector<8x896xf32>
    %cst_25 = arith.constant dense<0.000000e+00> : vector<8x896xf32>
    %40 = tpu.matmul %38, %39, %cst_25 {dimension_numbers = #tpu.dot_dimension_numbers<[1], [0], [0], [1], [0, 0, 1, 1], [], []>} : vector<8x8xf32>, vector<8x896xf32>, vector<8x896xf32> -> vector<8x896xf32>
    %41 = arith.addf %36, %40 : vector<8x896xf32>
    %c8 = arith.constant 8 : index
    %c0_26 = arith.constant 0 : index
    %c0_27 = arith.constant 0 : index
    %42 = vector.load %arg2[%c8, %c0_26, %c0_27] : memref<25x8x8xf32, #tpu.memory_space<vmem>>, vector<1x8x8xf32>
    %43 = vector.shape_cast %42 : vector<1x8x8xf32> to vector<8x8xf32>
    %44 = vector.extract_strided_slice %0 {offsets = [0, 35], sizes = [8, 896], strides = [1, 1]} : vector<8x1152xf32> to vector<8x896xf32>
    %cst_28 = arith.constant dense<0.000000e+00> : vector<8x896xf32>
    %45 = tpu.matmul %43, %44, %cst_28 {dimension_numbers = #tpu.dot_dimension_numbers<[1], [0], [0], [1], [0, 0, 1, 1], [], []>} : vector<8x8xf32>, vector<8x896xf32>, vector<8x896xf32> -> vector<8x896xf32>
    %46 = arith.addf %41, %45 : vector<8x896xf32>
    %c9 = arith.constant 9 : index
    %c0_29 = arith.constant 0 : index
    %c0_30 = arith.constant 0 : index
    %47 = vector.load %arg2[%c9, %c0_29, %c0_30] : memref<25x8x8xf32, #tpu.memory_space<vmem>>, vector<1x8x8xf32>
    %48 = vector.shape_cast %47 : vector<1x8x8xf32> to vector<8x8xf32>
    %49 = vector.extract_strided_slice %0 {offsets = [0, 36], sizes = [8, 896], strides = [1, 1]} : vector<8x1152xf32> to vector<8x896xf32>
    %cst_31 = arith.constant dense<0.000000e+00> : vector<8x896xf32>
    %50 = tpu.matmul %48, %49, %cst_31 {dimension_numbers = #tpu.dot_dimension_numbers<[1], [0], [0], [1], [0, 0, 1, 1], [], []>} : vector<8x8xf32>, vector<8x896xf32>, vector<8x896xf32> -> vector<8x896xf32>
    %51 = arith.addf %46, %50 : vector<8x896xf32>
    %c10 = arith.constant 10 : index
    %c0_32 = arith.constant 0 : index
    %c0_33 = arith.constant 0 : index
    %52 = vector.load %arg2[%c10, %c0_32, %c0_33] : memref<25x8x8xf32, #tpu.memory_space<vmem>>, vector<1x8x8xf32>
    %53 = vector.shape_cast %52 : vector<1x8x8xf32> to vector<8x8xf32>
    %54 = vector.extract_strided_slice %0 {offsets = [0, 64], sizes = [8, 896], strides = [1, 1]} : vector<8x1152xf32> to vector<8x896xf32>
    %cst_34 = arith.constant dense<0.000000e+00> : vector<8x896xf32>
    %55 = tpu.matmul %53, %54, %cst_34 {dimension_numbers = #tpu.dot_dimension_numbers<[1], [0], [0], [1], [0, 0, 1, 1], [], []>} : vector<8x8xf32>, vector<8x896xf32>, vector<8x896xf32> -> vector<8x896xf32>
    %56 = arith.addf %51, %55 : vector<8x896xf32>
    %c11 = arith.constant 11 : index
    %c0_35 = arith.constant 0 : index
    %c0_36 = arith.constant 0 : index
    %57 = vector.load %arg2[%c11, %c0_35, %c0_36] : memref<25x8x8xf32, #tpu.memory_space<vmem>>, vector<1x8x8xf32>
    %58 = vector.shape_cast %57 : vector<1x8x8xf32> to vector<8x8xf32>
    %59 = vector.extract_strided_slice %0 {offsets = [0, 65], sizes = [8, 896], strides = [1, 1]} : vector<8x1152xf32> to vector<8x896xf32>
    %cst_37 = arith.constant dense<0.000000e+00> : vector<8x896xf32>
    %60 = tpu.matmul %58, %59, %cst_37 {dimension_numbers = #tpu.dot_dimension_numbers<[1], [0], [0], [1], [0, 0, 1, 1], [], []>} : vector<8x8xf32>, vector<8x896xf32>, vector<8x896xf32> -> vector<8x896xf32>
    %61 = arith.addf %56, %60 : vector<8x896xf32>
    %c12 = arith.constant 12 : index
    %c0_38 = arith.constant 0 : index
    %c0_39 = arith.constant 0 : index
    %62 = vector.load %arg2[%c12, %c0_38, %c0_39] : memref<25x8x8xf32, #tpu.memory_space<vmem>>, vector<1x8x8xf32>
    %63 = vector.shape_cast %62 : vector<1x8x8xf32> to vector<8x8xf32>
    %64 = vector.extract_strided_slice %0 {offsets = [0, 66], sizes = [8, 896], strides = [1, 1]} : vector<8x1152xf32> to vector<8x896xf32>
    %cst_40 = arith.constant dense<0.000000e+00> : vector<8x896xf32>
    %65 = tpu.matmul %63, %64, %cst_40 {dimension_numbers = #tpu.dot_dimension_numbers<[1], [0], [0], [1], [0, 0, 1, 1], [], []>} : vector<8x8xf32>, vector<8x896xf32>, vector<8x896xf32> -> vector<8x896xf32>
    %66 = arith.addf %61, %65 : vector<8x896xf32>
    %c13 = arith.constant 13 : index
    %c0_41 = arith.constant 0 : index
    %c0_42 = arith.constant 0 : index
    %67 = vector.load %arg2[%c13, %c0_41, %c0_42] : memref<25x8x8xf32, #tpu.memory_space<vmem>>, vector<1x8x8xf32>
    %68 = vector.shape_cast %67 : vector<1x8x8xf32> to vector<8x8xf32>
    %69 = vector.extract_strided_slice %0 {offsets = [0, 67], sizes = [8, 896], strides = [1, 1]} : vector<8x1152xf32> to vector<8x896xf32>
    %cst_43 = arith.constant dense<0.000000e+00> : vector<8x896xf32>
    %70 = tpu.matmul %68, %69, %cst_43 {dimension_numbers = #tpu.dot_dimension_numbers<[1], [0], [0], [1], [0, 0, 1, 1], [], []>} : vector<8x8xf32>, vector<8x896xf32>, vector<8x896xf32> -> vector<8x896xf32>
    %71 = arith.addf %66, %70 : vector<8x896xf32>
    %c14 = arith.constant 14 : index
    %c0_44 = arith.constant 0 : index
    %c0_45 = arith.constant 0 : index
    %72 = vector.load %arg2[%c14, %c0_44, %c0_45] : memref<25x8x8xf32, #tpu.memory_space<vmem>>, vector<1x8x8xf32>
    %73 = vector.shape_cast %72 : vector<1x8x8xf32> to vector<8x8xf32>
    %74 = vector.extract_strided_slice %0 {offsets = [0, 68], sizes = [8, 896], strides = [1, 1]} : vector<8x1152xf32> to vector<8x896xf32>
    %cst_46 = arith.constant dense<0.000000e+00> : vector<8x896xf32>
    %75 = tpu.matmul %73, %74, %cst_46 {dimension_numbers = #tpu.dot_dimension_numbers<[1], [0], [0], [1], [0, 0, 1, 1], [], []>} : vector<8x8xf32>, vector<8x896xf32>, vector<8x896xf32> -> vector<8x896xf32>
    %76 = arith.addf %71, %75 : vector<8x896xf32>
    %c15 = arith.constant 15 : index
    %c0_47 = arith.constant 0 : index
    %c0_48 = arith.constant 0 : index
    %77 = vector.load %arg2[%c15, %c0_47, %c0_48] : memref<25x8x8xf32, #tpu.memory_space<vmem>>, vector<1x8x8xf32>
    %78 = vector.shape_cast %77 : vector<1x8x8xf32> to vector<8x8xf32>
    %79 = vector.extract_strided_slice %0 {offsets = [0, 96], sizes = [8, 896], strides = [1, 1]} : vector<8x1152xf32> to vector<8x896xf32>
    %cst_49 = arith.constant dense<0.000000e+00> : vector<8x896xf32>
    %80 = tpu.matmul %78, %79, %cst_49 {dimension_numbers = #tpu.dot_dimension_numbers<[1], [0], [0], [1], [0, 0, 1, 1], [], []>} : vector<8x8xf32>, vector<8x896xf32>, vector<8x896xf32> -> vector<8x896xf32>
    %81 = arith.addf %76, %80 : vector<8x896xf32>
    %c16 = arith.constant 16 : index
    %c0_50 = arith.constant 0 : index
    %c0_51 = arith.constant 0 : index
    %82 = vector.load %arg2[%c16, %c0_50, %c0_51] : memref<25x8x8xf32, #tpu.memory_space<vmem>>, vector<1x8x8xf32>
    %83 = vector.shape_cast %82 : vector<1x8x8xf32> to vector<8x8xf32>
    %84 = vector.extract_strided_slice %0 {offsets = [0, 97], sizes = [8, 896], strides = [1, 1]} : vector<8x1152xf32> to vector<8x896xf32>
    %cst_52 = arith.constant dense<0.000000e+00> : vector<8x896xf32>
    %85 = tpu.matmul %83, %84, %cst_52 {dimension_numbers = #tpu.dot_dimension_numbers<[1], [0], [0], [1], [0, 0, 1, 1], [], []>} : vector<8x8xf32>, vector<8x896xf32>, vector<8x896xf32> -> vector<8x896xf32>
    %86 = arith.addf %81, %85 : vector<8x896xf32>
    %c17 = arith.constant 17 : index
    %c0_53 = arith.constant 0 : index
    %c0_54 = arith.constant 0 : index
    %87 = vector.load %arg2[%c17, %c0_53, %c0_54] : memref<25x8x8xf32, #tpu.memory_space<vmem>>, vector<1x8x8xf32>
    %88 = vector.shape_cast %87 : vector<1x8x8xf32> to vector<8x8xf32>
    %89 = vector.extract_strided_slice %0 {offsets = [0, 98], sizes = [8, 896], strides = [1, 1]} : vector<8x1152xf32> to vector<8x896xf32>
    %cst_55 = arith.constant dense<0.000000e+00> : vector<8x896xf32>
    %90 = tpu.matmul %88, %89, %cst_55 {dimension_numbers = #tpu.dot_dimension_numbers<[1], [0], [0], [1], [0, 0, 1, 1], [], []>} : vector<8x8xf32>, vector<8x896xf32>, vector<8x896xf32> -> vector<8x896xf32>
    %91 = arith.addf %86, %90 : vector<8x896xf32>
    %c18 = arith.constant 18 : index
    %c0_56 = arith.constant 0 : index
    %c0_57 = arith.constant 0 : index
    %92 = vector.load %arg2[%c18, %c0_56, %c0_57] : memref<25x8x8xf32, #tpu.memory_space<vmem>>, vector<1x8x8xf32>
    %93 = vector.shape_cast %92 : vector<1x8x8xf32> to vector<8x8xf32>
    %94 = vector.extract_strided_slice %0 {offsets = [0, 99], sizes = [8, 896], strides = [1, 1]} : vector<8x1152xf32> to vector<8x896xf32>
    %cst_58 = arith.constant dense<0.000000e+00> : vector<8x896xf32>
    %95 = tpu.matmul %93, %94, %cst_58 {dimension_numbers = #tpu.dot_dimension_numbers<[1], [0], [0], [1], [0, 0, 1, 1], [], []>} : vector<8x8xf32>, vector<8x896xf32>, vector<8x896xf32> -> vector<8x896xf32>
    %96 = arith.addf %91, %95 : vector<8x896xf32>
    %c19 = arith.constant 19 : index
    %c0_59 = arith.constant 0 : index
    %c0_60 = arith.constant 0 : index
    %97 = vector.load %arg2[%c19, %c0_59, %c0_60] : memref<25x8x8xf32, #tpu.memory_space<vmem>>, vector<1x8x8xf32>
    %98 = vector.shape_cast %97 : vector<1x8x8xf32> to vector<8x8xf32>
    %99 = vector.extract_strided_slice %0 {offsets = [0, 100], sizes = [8, 896], strides = [1, 1]} : vector<8x1152xf32> to vector<8x896xf32>
    %cst_61 = arith.constant dense<0.000000e+00> : vector<8x896xf32>
    %100 = tpu.matmul %98, %99, %cst_61 {dimension_numbers = #tpu.dot_dimension_numbers<[1], [0], [0], [1], [0, 0, 1, 1], [], []>} : vector<8x8xf32>, vector<8x896xf32>, vector<8x896xf32> -> vector<8x896xf32>
    %101 = arith.addf %96, %100 : vector<8x896xf32>
    %c20 = arith.constant 20 : index
    %c0_62 = arith.constant 0 : index
    %c0_63 = arith.constant 0 : index
    %102 = vector.load %arg2[%c20, %c0_62, %c0_63] : memref<25x8x8xf32, #tpu.memory_space<vmem>>, vector<1x8x8xf32>
    %103 = vector.shape_cast %102 : vector<1x8x8xf32> to vector<8x8xf32>
    %104 = vector.extract_strided_slice %0 {offsets = [0, 128], sizes = [8, 896], strides = [1, 1]} : vector<8x1152xf32> to vector<8x896xf32>
    %cst_64 = arith.constant dense<0.000000e+00> : vector<8x896xf32>
    %105 = tpu.matmul %103, %104, %cst_64 {dimension_numbers = #tpu.dot_dimension_numbers<[1], [0], [0], [1], [0, 0, 1, 1], [], []>} : vector<8x8xf32>, vector<8x896xf32>, vector<8x896xf32> -> vector<8x896xf32>
    %106 = arith.addf %101, %105 : vector<8x896xf32>
    %c21 = arith.constant 21 : index
    %c0_65 = arith.constant 0 : index
    %c0_66 = arith.constant 0 : index
    %107 = vector.load %arg2[%c21, %c0_65, %c0_66] : memref<25x8x8xf32, #tpu.memory_space<vmem>>, vector<1x8x8xf32>
    %108 = vector.shape_cast %107 : vector<1x8x8xf32> to vector<8x8xf32>
    %109 = vector.extract_strided_slice %0 {offsets = [0, 129], sizes = [8, 896], strides = [1, 1]} : vector<8x1152xf32> to vector<8x896xf32>
    %cst_67 = arith.constant dense<0.000000e+00> : vector<8x896xf32>
    %110 = tpu.matmul %108, %109, %cst_67 {dimension_numbers = #tpu.dot_dimension_numbers<[1], [0], [0], [1], [0, 0, 1, 1], [], []>} : vector<8x8xf32>, vector<8x896xf32>, vector<8x896xf32> -> vector<8x896xf32>
    %111 = arith.addf %106, %110 : vector<8x896xf32>
    %c22 = arith.constant 22 : index
    %c0_68 = arith.constant 0 : index
    %c0_69 = arith.constant 0 : index
    %112 = vector.load %arg2[%c22, %c0_68, %c0_69] : memref<25x8x8xf32, #tpu.memory_space<vmem>>, vector<1x8x8xf32>
    %113 = vector.shape_cast %112 : vector<1x8x8xf32> to vector<8x8xf32>
    %114 = vector.extract_strided_slice %0 {offsets = [0, 130], sizes = [8, 896], strides = [1, 1]} : vector<8x1152xf32> to vector<8x896xf32>
    %cst_70 = arith.constant dense<0.000000e+00> : vector<8x896xf32>
    %115 = tpu.matmul %113, %114, %cst_70 {dimension_numbers = #tpu.dot_dimension_numbers<[1], [0], [0], [1], [0, 0, 1, 1], [], []>} : vector<8x8xf32>, vector<8x896xf32>, vector<8x896xf32> -> vector<8x896xf32>
    %116 = arith.addf %111, %115 : vector<8x896xf32>
    %c23 = arith.constant 23 : index
    %c0_71 = arith.constant 0 : index
    %c0_72 = arith.constant 0 : index
    %117 = vector.load %arg2[%c23, %c0_71, %c0_72] : memref<25x8x8xf32, #tpu.memory_space<vmem>>, vector<1x8x8xf32>
    %118 = vector.shape_cast %117 : vector<1x8x8xf32> to vector<8x8xf32>
    %119 = vector.extract_strided_slice %0 {offsets = [0, 131], sizes = [8, 896], strides = [1, 1]} : vector<8x1152xf32> to vector<8x896xf32>
    %cst_73 = arith.constant dense<0.000000e+00> : vector<8x896xf32>
    %120 = tpu.matmul %118, %119, %cst_73 {dimension_numbers = #tpu.dot_dimension_numbers<[1], [0], [0], [1], [0, 0, 1, 1], [], []>} : vector<8x8xf32>, vector<8x896xf32>, vector<8x896xf32> -> vector<8x896xf32>
    %121 = arith.addf %116, %120 : vector<8x896xf32>
    %c24 = arith.constant 24 : index
    %c0_74 = arith.constant 0 : index
    %c0_75 = arith.constant 0 : index
    %122 = vector.load %arg2[%c24, %c0_74, %c0_75] : memref<25x8x8xf32, #tpu.memory_space<vmem>>, vector<1x8x8xf32>
    %123 = vector.shape_cast %122 : vector<1x8x8xf32> to vector<8x8xf32>
    %124 = vector.extract_strided_slice %0 {offsets = [0, 132], sizes = [8, 896], strides = [1, 1]} : vector<8x1152xf32> to vector<8x896xf32>
    %cst_76 = arith.constant dense<0.000000e+00> : vector<8x896xf32>
    %125 = tpu.matmul %123, %124, %cst_76 {dimension_numbers = #tpu.dot_dimension_numbers<[1], [0], [0], [1], [0, 0, 1, 1], [], []>} : vector<8x8xf32>, vector<8x896xf32>, vector<8x896xf32> -> vector<8x896xf32>
    %126 = arith.addf %121, %125 : vector<8x896xf32>
    %c0_77 = arith.constant 0 : index
    %c0_78 = arith.constant 0 : index
    %127 = vector.load %arg3[%c0_77, %c0_78] : memref<8x1xf32, #tpu.memory_space<vmem>>, vector<8x1xf32>
    %128 = vector.broadcast %127 : vector<8x1xf32> to vector<8x896xf32>
    %129 = arith.addf %126, %128 : vector<8x896xf32>
    %cst_79 = arith.constant 0.000000e+00 : f32
    %130 = vector.broadcast %cst_79 : f32 to vector<8x896xf32>
    %131 = arith.maximumf %129, %130 : vector<8x896xf32>
    %132 = vector.extract_strided_slice %131 {offsets = [0, 0], sizes = [8, 895], strides = [1, 1]} : vector<8x896xf32> to vector<8x895xf32>
    %133 = vector.extract_strided_slice %131 {offsets = [0, 1], sizes = [8, 895], strides = [1, 1]} : vector<8x896xf32> to vector<8x895xf32>
    %134 = arith.maximumf %132, %133 : vector<8x895xf32>
    %135 = vector.extract_strided_slice %134 {offsets = [0, 0], sizes = [8, 863], strides = [1, 1]} : vector<8x895xf32> to vector<8x863xf32>
    %136 = vector.extract_strided_slice %134 {offsets = [0, 32], sizes = [8, 863], strides = [1, 1]} : vector<8x895xf32> to vector<8x863xf32>
    %137 = arith.maximumf %135, %136 : vector<8x863xf32>
    %cst_80 = arith.constant 0.000000e+00 : f32
    %138 = vector.broadcast %cst_80 : f32 to vector<10x599xf32>
    %c0_81 = arith.constant 0 : index
    %c0_82 = arith.constant 0 : index
    %c0_83 = arith.constant 0 : index
    %139 = vector.load %arg4[%c0_81, %c0_82, %c0_83] : memref<25x10x8xf32, #tpu.memory_space<vmem>>, vector<1x10x8xf32>
    %140 = vector.shape_cast %139 : vector<1x10x8xf32> to vector<10x8xf32>
    %141 = vector.extract_strided_slice %137 {offsets = [0, 0], sizes = [8, 599], strides = [1, 1]} : vector<8x863xf32> to vector<8x599xf32>
    %cst_84 = arith.constant dense<0.000000e+00> : vector<10x599xf32>
    %142 = tpu.matmul %140, %141, %cst_84 {dimension_numbers = #tpu.dot_dimension_numbers<[1], [0], [0], [1], [0, 0, 1, 1], [], []>} : vector<10x8xf32>, vector<8x599xf32>, vector<10x599xf32> -> vector<10x599xf32>
    %143 = arith.addf %138, %142 : vector<10x599xf32>
    %c1_85 = arith.constant 1 : index
    %c0_86 = arith.constant 0 : index
    %c0_87 = arith.constant 0 : index
    %144 = vector.load %arg4[%c1_85, %c0_86, %c0_87] : memref<25x10x8xf32, #tpu.memory_space<vmem>>, vector<1x10x8xf32>
    %145 = vector.shape_cast %144 : vector<1x10x8xf32> to vector<10x8xf32>
    %146 = vector.extract_strided_slice %137 {offsets = [0, 2], sizes = [8, 599], strides = [1, 1]} : vector<8x863xf32> to vector<8x599xf32>
    %cst_88 = arith.constant dense<0.000000e+00> : vector<10x599xf32>
    %147 = tpu.matmul %145, %146, %cst_88 {dimension_numbers = #tpu.dot_dimension_numbers<[1], [0], [0], [1], [0, 0, 1, 1], [], []>} : vector<10x8xf32>, vector<8x599xf32>, vector<10x599xf32> -> vector<10x599xf32>
    %148 = arith.addf %143, %147 : vector<10x599xf32>
    %c2_89 = arith.constant 2 : index
    %c0_90 = arith.constant 0 : index
    %c0_91 = arith.constant 0 : index
    %149 = vector.load %arg4[%c2_89, %c0_90, %c0_91] : memref<25x10x8xf32, #tpu.memory_space<vmem>>, vector<1x10x8xf32>
    %150 = vector.shape_cast %149 : vector<1x10x8xf32> to vector<10x8xf32>
    %151 = vector.extract_strided_slice %137 {offsets = [0, 4], sizes = [8, 599], strides = [1, 1]} : vector<8x863xf32> to vector<8x599xf32>
    %cst_92 = arith.constant dense<0.000000e+00> : vector<10x599xf32>
    %152 = tpu.matmul %150, %151, %cst_92 {dimension_numbers = #tpu.dot_dimension_numbers<[1], [0], [0], [1], [0, 0, 1, 1], [], []>} : vector<10x8xf32>, vector<8x599xf32>, vector<10x599xf32> -> vector<10x599xf32>
    %153 = arith.addf %148, %152 : vector<10x599xf32>
    %c3_93 = arith.constant 3 : index
    %c0_94 = arith.constant 0 : index
    %c0_95 = arith.constant 0 : index
    %154 = vector.load %arg4[%c3_93, %c0_94, %c0_95] : memref<25x10x8xf32, #tpu.memory_space<vmem>>, vector<1x10x8xf32>
    %155 = vector.shape_cast %154 : vector<1x10x8xf32> to vector<10x8xf32>
    %156 = vector.extract_strided_slice %137 {offsets = [0, 6], sizes = [8, 599], strides = [1, 1]} : vector<8x863xf32> to vector<8x599xf32>
    %cst_96 = arith.constant dense<0.000000e+00> : vector<10x599xf32>
    %157 = tpu.matmul %155, %156, %cst_96 {dimension_numbers = #tpu.dot_dimension_numbers<[1], [0], [0], [1], [0, 0, 1, 1], [], []>} : vector<10x8xf32>, vector<8x599xf32>, vector<10x599xf32> -> vector<10x599xf32>
    %158 = arith.addf %153, %157 : vector<10x599xf32>
    %c4_97 = arith.constant 4 : index
    %c0_98 = arith.constant 0 : index
    %c0_99 = arith.constant 0 : index
    %159 = vector.load %arg4[%c4_97, %c0_98, %c0_99] : memref<25x10x8xf32, #tpu.memory_space<vmem>>, vector<1x10x8xf32>
    %160 = vector.shape_cast %159 : vector<1x10x8xf32> to vector<10x8xf32>
    %161 = vector.extract_strided_slice %137 {offsets = [0, 8], sizes = [8, 599], strides = [1, 1]} : vector<8x863xf32> to vector<8x599xf32>
    %cst_100 = arith.constant dense<0.000000e+00> : vector<10x599xf32>
    %162 = tpu.matmul %160, %161, %cst_100 {dimension_numbers = #tpu.dot_dimension_numbers<[1], [0], [0], [1], [0, 0, 1, 1], [], []>} : vector<10x8xf32>, vector<8x599xf32>, vector<10x599xf32> -> vector<10x599xf32>
    %163 = arith.addf %158, %162 : vector<10x599xf32>
    %c5_101 = arith.constant 5 : index
    %c0_102 = arith.constant 0 : index
    %c0_103 = arith.constant 0 : index
    %164 = vector.load %arg4[%c5_101, %c0_102, %c0_103] : memref<25x10x8xf32, #tpu.memory_space<vmem>>, vector<1x10x8xf32>
    %165 = vector.shape_cast %164 : vector<1x10x8xf32> to vector<10x8xf32>
    %166 = vector.extract_strided_slice %137 {offsets = [0, 64], sizes = [8, 599], strides = [1, 1]} : vector<8x863xf32> to vector<8x599xf32>
    %cst_104 = arith.constant dense<0.000000e+00> : vector<10x599xf32>
    %167 = tpu.matmul %165, %166, %cst_104 {dimension_numbers = #tpu.dot_dimension_numbers<[1], [0], [0], [1], [0, 0, 1, 1], [], []>} : vector<10x8xf32>, vector<8x599xf32>, vector<10x599xf32> -> vector<10x599xf32>
    %168 = arith.addf %163, %167 : vector<10x599xf32>
    %c6_105 = arith.constant 6 : index
    %c0_106 = arith.constant 0 : index
    %c0_107 = arith.constant 0 : index
    %169 = vector.load %arg4[%c6_105, %c0_106, %c0_107] : memref<25x10x8xf32, #tpu.memory_space<vmem>>, vector<1x10x8xf32>
    %170 = vector.shape_cast %169 : vector<1x10x8xf32> to vector<10x8xf32>
    %171 = vector.extract_strided_slice %137 {offsets = [0, 66], sizes = [8, 599], strides = [1, 1]} : vector<8x863xf32> to vector<8x599xf32>
    %cst_108 = arith.constant dense<0.000000e+00> : vector<10x599xf32>
    %172 = tpu.matmul %170, %171, %cst_108 {dimension_numbers = #tpu.dot_dimension_numbers<[1], [0], [0], [1], [0, 0, 1, 1], [], []>} : vector<10x8xf32>, vector<8x599xf32>, vector<10x599xf32> -> vector<10x599xf32>
    %173 = arith.addf %168, %172 : vector<10x599xf32>
    %c7_109 = arith.constant 7 : index
    %c0_110 = arith.constant 0 : index
    %c0_111 = arith.constant 0 : index
    %174 = vector.load %arg4[%c7_109, %c0_110, %c0_111] : memref<25x10x8xf32, #tpu.memory_space<vmem>>, vector<1x10x8xf32>
    %175 = vector.shape_cast %174 : vector<1x10x8xf32> to vector<10x8xf32>
    %176 = vector.extract_strided_slice %137 {offsets = [0, 68], sizes = [8, 599], strides = [1, 1]} : vector<8x863xf32> to vector<8x599xf32>
    %cst_112 = arith.constant dense<0.000000e+00> : vector<10x599xf32>
    %177 = tpu.matmul %175, %176, %cst_112 {dimension_numbers = #tpu.dot_dimension_numbers<[1], [0], [0], [1], [0, 0, 1, 1], [], []>} : vector<10x8xf32>, vector<8x599xf32>, vector<10x599xf32> -> vector<10x599xf32>
    %178 = arith.addf %173, %177 : vector<10x599xf32>
    %c8_113 = arith.constant 8 : index
    %c0_114 = arith.constant 0 : index
    %c0_115 = arith.constant 0 : index
    %179 = vector.load %arg4[%c8_113, %c0_114, %c0_115] : memref<25x10x8xf32, #tpu.memory_space<vmem>>, vector<1x10x8xf32>
    %180 = vector.shape_cast %179 : vector<1x10x8xf32> to vector<10x8xf32>
    %181 = vector.extract_strided_slice %137 {offsets = [0, 70], sizes = [8, 599], strides = [1, 1]} : vector<8x863xf32> to vector<8x599xf32>
    %cst_116 = arith.constant dense<0.000000e+00> : vector<10x599xf32>
    %182 = tpu.matmul %180, %181, %cst_116 {dimension_numbers = #tpu.dot_dimension_numbers<[1], [0], [0], [1], [0, 0, 1, 1], [], []>} : vector<10x8xf32>, vector<8x599xf32>, vector<10x599xf32> -> vector<10x599xf32>
    %183 = arith.addf %178, %182 : vector<10x599xf32>
    %c9_117 = arith.constant 9 : index
    %c0_118 = arith.constant 0 : index
    %c0_119 = arith.constant 0 : index
    %184 = vector.load %arg4[%c9_117, %c0_118, %c0_119] : memref<25x10x8xf32, #tpu.memory_space<vmem>>, vector<1x10x8xf32>
    %185 = vector.shape_cast %184 : vector<1x10x8xf32> to vector<10x8xf32>
    %186 = vector.extract_strided_slice %137 {offsets = [0, 72], sizes = [8, 599], strides = [1, 1]} : vector<8x863xf32> to vector<8x599xf32>
    %cst_120 = arith.constant dense<0.000000e+00> : vector<10x599xf32>
    %187 = tpu.matmul %185, %186, %cst_120 {dimension_numbers = #tpu.dot_dimension_numbers<[1], [0], [0], [1], [0, 0, 1, 1], [], []>} : vector<10x8xf32>, vector<8x599xf32>, vector<10x599xf32> -> vector<10x599xf32>
    %188 = arith.addf %183, %187 : vector<10x599xf32>
    %c10_121 = arith.constant 10 : index
    %c0_122 = arith.constant 0 : index
    %c0_123 = arith.constant 0 : index
    %189 = vector.load %arg4[%c10_121, %c0_122, %c0_123] : memref<25x10x8xf32, #tpu.memory_space<vmem>>, vector<1x10x8xf32>
    %190 = vector.shape_cast %189 : vector<1x10x8xf32> to vector<10x8xf32>
    %191 = vector.extract_strided_slice %137 {offsets = [0, 128], sizes = [8, 599], strides = [1, 1]} : vector<8x863xf32> to vector<8x599xf32>
    %cst_124 = arith.constant dense<0.000000e+00> : vector<10x599xf32>
    %192 = tpu.matmul %190, %191, %cst_124 {dimension_numbers = #tpu.dot_dimension_numbers<[1], [0], [0], [1], [0, 0, 1, 1], [], []>} : vector<10x8xf32>, vector<8x599xf32>, vector<10x599xf32> -> vector<10x599xf32>
    %193 = arith.addf %188, %192 : vector<10x599xf32>
    %c11_125 = arith.constant 11 : index
    %c0_126 = arith.constant 0 : index
    %c0_127 = arith.constant 0 : index
    %194 = vector.load %arg4[%c11_125, %c0_126, %c0_127] : memref<25x10x8xf32, #tpu.memory_space<vmem>>, vector<1x10x8xf32>
    %195 = vector.shape_cast %194 : vector<1x10x8xf32> to vector<10x8xf32>
    %196 = vector.extract_strided_slice %137 {offsets = [0, 130], sizes = [8, 599], strides = [1, 1]} : vector<8x863xf32> to vector<8x599xf32>
    %cst_128 = arith.constant dense<0.000000e+00> : vector<10x599xf32>
    %197 = tpu.matmul %195, %196, %cst_128 {dimension_numbers = #tpu.dot_dimension_numbers<[1], [0], [0], [1], [0, 0, 1, 1], [], []>} : vector<10x8xf32>, vector<8x599xf32>, vector<10x599xf32> -> vector<10x599xf32>
    %198 = arith.addf %193, %197 : vector<10x599xf32>
    %c12_129 = arith.constant 12 : index
    %c0_130 = arith.constant 0 : index
    %c0_131 = arith.constant 0 : index
    %199 = vector.load %arg4[%c12_129, %c0_130, %c0_131] : memref<25x10x8xf32, #tpu.memory_space<vmem>>, vector<1x10x8xf32>
    %200 = vector.shape_cast %199 : vector<1x10x8xf32> to vector<10x8xf32>
    %201 = vector.extract_strided_slice %137 {offsets = [0, 132], sizes = [8, 599], strides = [1, 1]} : vector<8x863xf32> to vector<8x599xf32>
    %cst_132 = arith.constant dense<0.000000e+00> : vector<10x599xf32>
    %202 = tpu.matmul %200, %201, %cst_132 {dimension_numbers = #tpu.dot_dimension_numbers<[1], [0], [0], [1], [0, 0, 1, 1], [], []>} : vector<10x8xf32>, vector<8x599xf32>, vector<10x599xf32> -> vector<10x599xf32>
    %203 = arith.addf %198, %202 : vector<10x599xf32>
    %c13_133 = arith.constant 13 : index
    %c0_134 = arith.constant 0 : index
    %c0_135 = arith.constant 0 : index
    %204 = vector.load %arg4[%c13_133, %c0_134, %c0_135] : memref<25x10x8xf32, #tpu.memory_space<vmem>>, vector<1x10x8xf32>
    %205 = vector.shape_cast %204 : vector<1x10x8xf32> to vector<10x8xf32>
    %206 = vector.extract_strided_slice %137 {offsets = [0, 134], sizes = [8, 599], strides = [1, 1]} : vector<8x863xf32> to vector<8x599xf32>
    %cst_136 = arith.constant dense<0.000000e+00> : vector<10x599xf32>
    %207 = tpu.matmul %205, %206, %cst_136 {dimension_numbers = #tpu.dot_dimension_numbers<[1], [0], [0], [1], [0, 0, 1, 1], [], []>} : vector<10x8xf32>, vector<8x599xf32>, vector<10x599xf32> -> vector<10x599xf32>
    %208 = arith.addf %203, %207 : vector<10x599xf32>
    %c14_137 = arith.constant 14 : index
    %c0_138 = arith.constant 0 : index
    %c0_139 = arith.constant 0 : index
    %209 = vector.load %arg4[%c14_137, %c0_138, %c0_139] : memref<25x10x8xf32, #tpu.memory_space<vmem>>, vector<1x10x8xf32>
    %210 = vector.shape_cast %209 : vector<1x10x8xf32> to vector<10x8xf32>
    %211 = vector.extract_strided_slice %137 {offsets = [0, 136], sizes = [8, 599], strides = [1, 1]} : vector<8x863xf32> to vector<8x599xf32>
    %cst_140 = arith.constant dense<0.000000e+00> : vector<10x599xf32>
    %212 = tpu.matmul %210, %211, %cst_140 {dimension_numbers = #tpu.dot_dimension_numbers<[1], [0], [0], [1], [0, 0, 1, 1], [], []>} : vector<10x8xf32>, vector<8x599xf32>, vector<10x599xf32> -> vector<10x599xf32>
    %213 = arith.addf %208, %212 : vector<10x599xf32>
    %c15_141 = arith.constant 15 : index
    %c0_142 = arith.constant 0 : index
    %c0_143 = arith.constant 0 : index
    %214 = vector.load %arg4[%c15_141, %c0_142, %c0_143] : memref<25x10x8xf32, #tpu.memory_space<vmem>>, vector<1x10x8xf32>
    %215 = vector.shape_cast %214 : vector<1x10x8xf32> to vector<10x8xf32>
    %216 = vector.extract_strided_slice %137 {offsets = [0, 192], sizes = [8, 599], strides = [1, 1]} : vector<8x863xf32> to vector<8x599xf32>
    %cst_144 = arith.constant dense<0.000000e+00> : vector<10x599xf32>
    %217 = tpu.matmul %215, %216, %cst_144 {dimension_numbers = #tpu.dot_dimension_numbers<[1], [0], [0], [1], [0, 0, 1, 1], [], []>} : vector<10x8xf32>, vector<8x599xf32>, vector<10x599xf32> -> vector<10x599xf32>
    %218 = arith.addf %213, %217 : vector<10x599xf32>
    %c16_145 = arith.constant 16 : index
    %c0_146 = arith.constant 0 : index
    %c0_147 = arith.constant 0 : index
    %219 = vector.load %arg4[%c16_145, %c0_146, %c0_147] : memref<25x10x8xf32, #tpu.memory_space<vmem>>, vector<1x10x8xf32>
    %220 = vector.shape_cast %219 : vector<1x10x8xf32> to vector<10x8xf32>
    %221 = vector.extract_strided_slice %137 {offsets = [0, 194], sizes = [8, 599], strides = [1, 1]} : vector<8x863xf32> to vector<8x599xf32>
    %cst_148 = arith.constant dense<0.000000e+00> : vector<10x599xf32>
    %222 = tpu.matmul %220, %221, %cst_148 {dimension_numbers = #tpu.dot_dimension_numbers<[1], [0], [0], [1], [0, 0, 1, 1], [], []>} : vector<10x8xf32>, vector<8x599xf32>, vector<10x599xf32> -> vector<10x599xf32>
    %223 = arith.addf %218, %222 : vector<10x599xf32>
    %c17_149 = arith.constant 17 : index
    %c0_150 = arith.constant 0 : index
    %c0_151 = arith.constant 0 : index
    %224 = vector.load %arg4[%c17_149, %c0_150, %c0_151] : memref<25x10x8xf32, #tpu.memory_space<vmem>>, vector<1x10x8xf32>
    %225 = vector.shape_cast %224 : vector<1x10x8xf32> to vector<10x8xf32>
    %226 = vector.extract_strided_slice %137 {offsets = [0, 196], sizes = [8, 599], strides = [1, 1]} : vector<8x863xf32> to vector<8x599xf32>
    %cst_152 = arith.constant dense<0.000000e+00> : vector<10x599xf32>
    %227 = tpu.matmul %225, %226, %cst_152 {dimension_numbers = #tpu.dot_dimension_numbers<[1], [0], [0], [1], [0, 0, 1, 1], [], []>} : vector<10x8xf32>, vector<8x599xf32>, vector<10x599xf32> -> vector<10x599xf32>
    %228 = arith.addf %223, %227 : vector<10x599xf32>
    %c18_153 = arith.constant 18 : index
    %c0_154 = arith.constant 0 : index
    %c0_155 = arith.constant 0 : index
    %229 = vector.load %arg4[%c18_153, %c0_154, %c0_155] : memref<25x10x8xf32, #tpu.memory_space<vmem>>, vector<1x10x8xf32>
    %230 = vector.shape_cast %229 : vector<1x10x8xf32> to vector<10x8xf32>
    %231 = vector.extract_strided_slice %137 {offsets = [0, 198], sizes = [8, 599], strides = [1, 1]} : vector<8x863xf32> to vector<8x599xf32>
    %cst_156 = arith.constant dense<0.000000e+00> : vector<10x599xf32>
    %232 = tpu.matmul %230, %231, %cst_156 {dimension_numbers = #tpu.dot_dimension_numbers<[1], [0], [0], [1], [0, 0, 1, 1], [], []>} : vector<10x8xf32>, vector<8x599xf32>, vector<10x599xf32> -> vector<10x599xf32>
    %233 = arith.addf %228, %232 : vector<10x599xf32>
    %c19_157 = arith.constant 19 : index
    %c0_158 = arith.constant 0 : index
    %c0_159 = arith.constant 0 : index
    %234 = vector.load %arg4[%c19_157, %c0_158, %c0_159] : memref<25x10x8xf32, #tpu.memory_space<vmem>>, vector<1x10x8xf32>
    %235 = vector.shape_cast %234 : vector<1x10x8xf32> to vector<10x8xf32>
    %236 = vector.extract_strided_slice %137 {offsets = [0, 200], sizes = [8, 599], strides = [1, 1]} : vector<8x863xf32> to vector<8x599xf32>
    %cst_160 = arith.constant dense<0.000000e+00> : vector<10x599xf32>
    %237 = tpu.matmul %235, %236, %cst_160 {dimension_numbers = #tpu.dot_dimension_numbers<[1], [0], [0], [1], [0, 0, 1, 1], [], []>} : vector<10x8xf32>, vector<8x599xf32>, vector<10x599xf32> -> vector<10x599xf32>
    %238 = arith.addf %233, %237 : vector<10x599xf32>
    %c20_161 = arith.constant 20 : index
    %c0_162 = arith.constant 0 : index
    %c0_163 = arith.constant 0 : index
    %239 = vector.load %arg4[%c20_161, %c0_162, %c0_163] : memref<25x10x8xf32, #tpu.memory_space<vmem>>, vector<1x10x8xf32>
    %240 = vector.shape_cast %239 : vector<1x10x8xf32> to vector<10x8xf32>
    %241 = vector.extract_strided_slice %137 {offsets = [0, 256], sizes = [8, 599], strides = [1, 1]} : vector<8x863xf32> to vector<8x599xf32>
    %cst_164 = arith.constant dense<0.000000e+00> : vector<10x599xf32>
    %242 = tpu.matmul %240, %241, %cst_164 {dimension_numbers = #tpu.dot_dimension_numbers<[1], [0], [0], [1], [0, 0, 1, 1], [], []>} : vector<10x8xf32>, vector<8x599xf32>, vector<10x599xf32> -> vector<10x599xf32>
    %243 = arith.addf %238, %242 : vector<10x599xf32>
    %c21_165 = arith.constant 21 : index
    %c0_166 = arith.constant 0 : index
    %c0_167 = arith.constant 0 : index
    %244 = vector.load %arg4[%c21_165, %c0_166, %c0_167] : memref<25x10x8xf32, #tpu.memory_space<vmem>>, vector<1x10x8xf32>
    %245 = vector.shape_cast %244 : vector<1x10x8xf32> to vector<10x8xf32>
    %246 = vector.extract_strided_slice %137 {offsets = [0, 258], sizes = [8, 599], strides = [1, 1]} : vector<8x863xf32> to vector<8x599xf32>
    %cst_168 = arith.constant dense<0.000000e+00> : vector<10x599xf32>
    %247 = tpu.matmul %245, %246, %cst_168 {dimension_numbers = #tpu.dot_dimension_numbers<[1], [0], [0], [1], [0, 0, 1, 1], [], []>} : vector<10x8xf32>, vector<8x599xf32>, vector<10x599xf32> -> vector<10x599xf32>
    %248 = arith.addf %243, %247 : vector<10x599xf32>
    %c22_169 = arith.constant 22 : index
    %c0_170 = arith.constant 0 : index
    %c0_171 = arith.constant 0 : index
    %249 = vector.load %arg4[%c22_169, %c0_170, %c0_171] : memref<25x10x8xf32, #tpu.memory_space<vmem>>, vector<1x10x8xf32>
    %250 = vector.shape_cast %249 : vector<1x10x8xf32> to vector<10x8xf32>
    %251 = vector.extract_strided_slice %137 {offsets = [0, 260], sizes = [8, 599], strides = [1, 1]} : vector<8x863xf32> to vector<8x599xf32>
    %cst_172 = arith.constant dense<0.000000e+00> : vector<10x599xf32>
    %252 = tpu.matmul %250, %251, %cst_172 {dimension_numbers = #tpu.dot_dimension_numbers<[1], [0], [0], [1], [0, 0, 1, 1], [], []>} : vector<10x8xf32>, vector<8x599xf32>, vector<10x599xf32> -> vector<10x599xf32>
    %253 = arith.addf %248, %252 : vector<10x599xf32>
    %c23_173 = arith.constant 23 : index
    %c0_174 = arith.constant 0 : index
    %c0_175 = arith.constant 0 : index
    %254 = vector.load %arg4[%c23_173, %c0_174, %c0_175] : memref<25x10x8xf32, #tpu.memory_space<vmem>>, vector<1x10x8xf32>
    %255 = vector.shape_cast %254 : vector<1x10x8xf32> to vector<10x8xf32>
    %256 = vector.extract_strided_slice %137 {offsets = [0, 262], sizes = [8, 599], strides = [1, 1]} : vector<8x863xf32> to vector<8x599xf32>
    %cst_176 = arith.constant dense<0.000000e+00> : vector<10x599xf32>
    %257 = tpu.matmul %255, %256, %cst_176 {dimension_numbers = #tpu.dot_dimension_numbers<[1], [0], [0], [1], [0, 0, 1, 1], [], []>} : vector<10x8xf32>, vector<8x599xf32>, vector<10x599xf32> -> vector<10x599xf32>
    %258 = arith.addf %253, %257 : vector<10x599xf32>
    %c24_177 = arith.constant 24 : index
    %c0_178 = arith.constant 0 : index
    %c0_179 = arith.constant 0 : index
    %259 = vector.load %arg4[%c24_177, %c0_178, %c0_179] : memref<25x10x8xf32, #tpu.memory_space<vmem>>, vector<1x10x8xf32>
    %260 = vector.shape_cast %259 : vector<1x10x8xf32> to vector<10x8xf32>
    %261 = vector.extract_strided_slice %137 {offsets = [0, 264], sizes = [8, 599], strides = [1, 1]} : vector<8x863xf32> to vector<8x599xf32>
    %cst_180 = arith.constant dense<0.000000e+00> : vector<10x599xf32>
    %262 = tpu.matmul %260, %261, %cst_180 {dimension_numbers = #tpu.dot_dimension_numbers<[1], [0], [0], [1], [0, 0, 1, 1], [], []>} : vector<10x8xf32>, vector<8x599xf32>, vector<10x599xf32> -> vector<10x599xf32>
    %263 = arith.addf %258, %262 : vector<10x599xf32>
    %c0_181 = arith.constant 0 : index
    %c0_182 = arith.constant 0 : index
    %264 = vector.load %arg5[%c0_181, %c0_182] : memref<10x1xf32, #tpu.memory_space<vmem>>, vector<10x1xf32>
    %265 = vector.broadcast %264 : vector<10x1xf32> to vector<10x599xf32>
    %266 = arith.addf %263, %265 : vector<10x599xf32>
    %cst_183 = arith.constant 0.000000e+00 : f32
    %267 = vector.broadcast %cst_183 : f32 to vector<10x599xf32>
    %268 = arith.maximumf %266, %267 : vector<10x599xf32>
    %269 = vector.extract_strided_slice %268 {offsets = [0, 0], sizes = [10, 597], strides = [1, 1]} : vector<10x599xf32> to vector<10x597xf32>
    %270 = vector.extract_strided_slice %268 {offsets = [0, 2], sizes = [10, 597], strides = [1, 1]} : vector<10x599xf32> to vector<10x597xf32>
    %271 = arith.maximumf %269, %270 : vector<10x597xf32>
    %272 = vector.extract_strided_slice %271 {offsets = [0, 0], sizes = [10, 533], strides = [1, 1]} : vector<10x597xf32> to vector<10x533xf32>
    %273 = vector.extract_strided_slice %271 {offsets = [0, 64], sizes = [10, 533], strides = [1, 1]} : vector<10x597xf32> to vector<10x533xf32>
    %274 = arith.maximumf %272, %273 : vector<10x533xf32>
    %c0_184 = arith.constant 0 : index
    %c0_185 = arith.constant 0 : index
    %275 = vector.load %arg6[%c0_184, %c0_185] : memref<533x25xf32, #tpu.memory_space<vmem>>, vector<533x25xf32>
    %cst_186 = arith.constant dense<0.000000e+00> : vector<10x25xf32>
    %276 = tpu.matmul %274, %275, %cst_186 {dimension_numbers = #tpu.dot_dimension_numbers<[1], [0], [0], [1], [0, 0, 1, 1], [], []>} : vector<10x533xf32>, vector<533x25xf32>, vector<10x25xf32> -> vector<10x25xf32>
    %c0_187 = arith.constant 0 : index
    %c0_188 = arith.constant 0 : index
    %277 = vector.load %arg7[%c0_187, %c0_188] : memref<1x6xf32, #tpu.memory_space<vmem>>, vector<1x6xf32>
    %c0_189 = arith.constant 0 : index
    %c0_190 = arith.constant 0 : index
    %278 = vector.load %arg9[%c0_189, %c0_190] : memref<6x200xf32, #tpu.memory_space<vmem>>, vector<6x200xf32>
    %cst_191 = arith.constant dense<0.000000e+00> : vector<1x200xf32>
    %279 = tpu.matmul %277, %278, %cst_191 {dimension_numbers = #tpu.dot_dimension_numbers<[1], [0], [0], [1], [0, 0, 1, 1], [], []>} : vector<1x6xf32>, vector<6x200xf32>, vector<1x200xf32> -> vector<1x200xf32>
    %c0_192 = arith.constant 0 : index
    %c0_193 = arith.constant 0 : index
    %280 = vector.load %arg10[%c0_192, %c0_193] : memref<1x200xf32, #tpu.memory_space<vmem>>, vector<1x200xf32>
    %281 = arith.addf %279, %280 : vector<1x200xf32>
    %282 = vector.extract_strided_slice %276 {offsets = [0, 0], sizes = [1, 25], strides = [1, 1]} : vector<10x25xf32> to vector<1x25xf32>
    %c0_194 = arith.constant 0 : index
    %c0_195 = arith.constant 0 : index
    %c0_196 = arith.constant 0 : index
    %283 = vector.load %arg8[%c0_194, %c0_195, %c0_196] : memref<10x25x200xf32, #tpu.memory_space<vmem>>, vector<1x25x200xf32>
    %284 = vector.shape_cast %283 : vector<1x25x200xf32> to vector<25x200xf32>
    %cst_197 = arith.constant dense<0.000000e+00> : vector<1x200xf32>
    %285 = tpu.matmul %282, %284, %cst_197 {dimension_numbers = #tpu.dot_dimension_numbers<[1], [0], [0], [1], [0, 0, 1, 1], [], []>} : vector<1x25xf32>, vector<25x200xf32>, vector<1x200xf32> -> vector<1x200xf32>
    %286 = arith.addf %281, %285 : vector<1x200xf32>
    %287 = vector.extract_strided_slice %276 {offsets = [1, 0], sizes = [1, 25], strides = [1, 1]} : vector<10x25xf32> to vector<1x25xf32>
    %c1_198 = arith.constant 1 : index
    %c0_199 = arith.constant 0 : index
    %c0_200 = arith.constant 0 : index
    %288 = vector.load %arg8[%c1_198, %c0_199, %c0_200] : memref<10x25x200xf32, #tpu.memory_space<vmem>>, vector<1x25x200xf32>
    %289 = vector.shape_cast %288 : vector<1x25x200xf32> to vector<25x200xf32>
    %cst_201 = arith.constant dense<0.000000e+00> : vector<1x200xf32>
    %290 = tpu.matmul %287, %289, %cst_201 {dimension_numbers = #tpu.dot_dimension_numbers<[1], [0], [0], [1], [0, 0, 1, 1], [], []>} : vector<1x25xf32>, vector<25x200xf32>, vector<1x200xf32> -> vector<1x200xf32>
    %291 = arith.addf %286, %290 : vector<1x200xf32>
    %292 = vector.extract_strided_slice %276 {offsets = [2, 0], sizes = [1, 25], strides = [1, 1]} : vector<10x25xf32> to vector<1x25xf32>
    %c2_202 = arith.constant 2 : index
    %c0_203 = arith.constant 0 : index
    %c0_204 = arith.constant 0 : index
    %293 = vector.load %arg8[%c2_202, %c0_203, %c0_204] : memref<10x25x200xf32, #tpu.memory_space<vmem>>, vector<1x25x200xf32>
    %294 = vector.shape_cast %293 : vector<1x25x200xf32> to vector<25x200xf32>
    %cst_205 = arith.constant dense<0.000000e+00> : vector<1x200xf32>
    %295 = tpu.matmul %292, %294, %cst_205 {dimension_numbers = #tpu.dot_dimension_numbers<[1], [0], [0], [1], [0, 0, 1, 1], [], []>} : vector<1x25xf32>, vector<25x200xf32>, vector<1x200xf32> -> vector<1x200xf32>
    %296 = arith.addf %291, %295 : vector<1x200xf32>
    %297 = vector.extract_strided_slice %276 {offsets = [3, 0], sizes = [1, 25], strides = [1, 1]} : vector<10x25xf32> to vector<1x25xf32>
    %c3_206 = arith.constant 3 : index
    %c0_207 = arith.constant 0 : index
    %c0_208 = arith.constant 0 : index
    %298 = vector.load %arg8[%c3_206, %c0_207, %c0_208] : memref<10x25x200xf32, #tpu.memory_space<vmem>>, vector<1x25x200xf32>
    %299 = vector.shape_cast %298 : vector<1x25x200xf32> to vector<25x200xf32>
    %cst_209 = arith.constant dense<0.000000e+00> : vector<1x200xf32>
    %300 = tpu.matmul %297, %299, %cst_209 {dimension_numbers = #tpu.dot_dimension_numbers<[1], [0], [0], [1], [0, 0, 1, 1], [], []>} : vector<1x25xf32>, vector<25x200xf32>, vector<1x200xf32> -> vector<1x200xf32>
    %301 = arith.addf %296, %300 : vector<1x200xf32>
    %302 = vector.extract_strided_slice %276 {offsets = [4, 0], sizes = [1, 25], strides = [1, 1]} : vector<10x25xf32> to vector<1x25xf32>
    %c4_210 = arith.constant 4 : index
    %c0_211 = arith.constant 0 : index
    %c0_212 = arith.constant 0 : index
    %303 = vector.load %arg8[%c4_210, %c0_211, %c0_212] : memref<10x25x200xf32, #tpu.memory_space<vmem>>, vector<1x25x200xf32>
    %304 = vector.shape_cast %303 : vector<1x25x200xf32> to vector<25x200xf32>
    %cst_213 = arith.constant dense<0.000000e+00> : vector<1x200xf32>
    %305 = tpu.matmul %302, %304, %cst_213 {dimension_numbers = #tpu.dot_dimension_numbers<[1], [0], [0], [1], [0, 0, 1, 1], [], []>} : vector<1x25xf32>, vector<25x200xf32>, vector<1x200xf32> -> vector<1x200xf32>
    %306 = arith.addf %301, %305 : vector<1x200xf32>
    %307 = vector.extract_strided_slice %276 {offsets = [5, 0], sizes = [1, 25], strides = [1, 1]} : vector<10x25xf32> to vector<1x25xf32>
    %c5_214 = arith.constant 5 : index
    %c0_215 = arith.constant 0 : index
    %c0_216 = arith.constant 0 : index
    %308 = vector.load %arg8[%c5_214, %c0_215, %c0_216] : memref<10x25x200xf32, #tpu.memory_space<vmem>>, vector<1x25x200xf32>
    %309 = vector.shape_cast %308 : vector<1x25x200xf32> to vector<25x200xf32>
    %cst_217 = arith.constant dense<0.000000e+00> : vector<1x200xf32>
    %310 = tpu.matmul %307, %309, %cst_217 {dimension_numbers = #tpu.dot_dimension_numbers<[1], [0], [0], [1], [0, 0, 1, 1], [], []>} : vector<1x25xf32>, vector<25x200xf32>, vector<1x200xf32> -> vector<1x200xf32>
    %311 = arith.addf %306, %310 : vector<1x200xf32>
    %312 = vector.extract_strided_slice %276 {offsets = [6, 0], sizes = [1, 25], strides = [1, 1]} : vector<10x25xf32> to vector<1x25xf32>
    %c6_218 = arith.constant 6 : index
    %c0_219 = arith.constant 0 : index
    %c0_220 = arith.constant 0 : index
    %313 = vector.load %arg8[%c6_218, %c0_219, %c0_220] : memref<10x25x200xf32, #tpu.memory_space<vmem>>, vector<1x25x200xf32>
    %314 = vector.shape_cast %313 : vector<1x25x200xf32> to vector<25x200xf32>
    %cst_221 = arith.constant dense<0.000000e+00> : vector<1x200xf32>
    %315 = tpu.matmul %312, %314, %cst_221 {dimension_numbers = #tpu.dot_dimension_numbers<[1], [0], [0], [1], [0, 0, 1, 1], [], []>} : vector<1x25xf32>, vector<25x200xf32>, vector<1x200xf32> -> vector<1x200xf32>
    %316 = arith.addf %311, %315 : vector<1x200xf32>
    %317 = vector.extract_strided_slice %276 {offsets = [7, 0], sizes = [1, 25], strides = [1, 1]} : vector<10x25xf32> to vector<1x25xf32>
    %c7_222 = arith.constant 7 : index
    %c0_223 = arith.constant 0 : index
    %c0_224 = arith.constant 0 : index
    %318 = vector.load %arg8[%c7_222, %c0_223, %c0_224] : memref<10x25x200xf32, #tpu.memory_space<vmem>>, vector<1x25x200xf32>
    %319 = vector.shape_cast %318 : vector<1x25x200xf32> to vector<25x200xf32>
    %cst_225 = arith.constant dense<0.000000e+00> : vector<1x200xf32>
    %320 = tpu.matmul %317, %319, %cst_225 {dimension_numbers = #tpu.dot_dimension_numbers<[1], [0], [0], [1], [0, 0, 1, 1], [], []>} : vector<1x25xf32>, vector<25x200xf32>, vector<1x200xf32> -> vector<1x200xf32>
    %321 = arith.addf %316, %320 : vector<1x200xf32>
    %322 = vector.extract_strided_slice %276 {offsets = [8, 0], sizes = [1, 25], strides = [1, 1]} : vector<10x25xf32> to vector<1x25xf32>
    %c8_226 = arith.constant 8 : index
    %c0_227 = arith.constant 0 : index
    %c0_228 = arith.constant 0 : index
    %323 = vector.load %arg8[%c8_226, %c0_227, %c0_228] : memref<10x25x200xf32, #tpu.memory_space<vmem>>, vector<1x25x200xf32>
    %324 = vector.shape_cast %323 : vector<1x25x200xf32> to vector<25x200xf32>
    %cst_229 = arith.constant dense<0.000000e+00> : vector<1x200xf32>
    %325 = tpu.matmul %322, %324, %cst_229 {dimension_numbers = #tpu.dot_dimension_numbers<[1], [0], [0], [1], [0, 0, 1, 1], [], []>} : vector<1x25xf32>, vector<25x200xf32>, vector<1x200xf32> -> vector<1x200xf32>
    %326 = arith.addf %321, %325 : vector<1x200xf32>
    %327 = vector.extract_strided_slice %276 {offsets = [9, 0], sizes = [1, 25], strides = [1, 1]} : vector<10x25xf32> to vector<1x25xf32>
    %c9_230 = arith.constant 9 : index
    %c0_231 = arith.constant 0 : index
    %c0_232 = arith.constant 0 : index
    %328 = vector.load %arg8[%c9_230, %c0_231, %c0_232] : memref<10x25x200xf32, #tpu.memory_space<vmem>>, vector<1x25x200xf32>
    %329 = vector.shape_cast %328 : vector<1x25x200xf32> to vector<25x200xf32>
    %cst_233 = arith.constant dense<0.000000e+00> : vector<1x200xf32>
    %330 = tpu.matmul %327, %329, %cst_233 {dimension_numbers = #tpu.dot_dimension_numbers<[1], [0], [0], [1], [0, 0, 1, 1], [], []>} : vector<1x25xf32>, vector<25x200xf32>, vector<1x200xf32> -> vector<1x200xf32>
    %331 = arith.addf %326, %330 : vector<1x200xf32>
    %cst_234 = arith.constant 0.000000e+00 : f32
    %332 = vector.broadcast %cst_234 : f32 to vector<1x200xf32>
    %333 = arith.maximumf %331, %332 : vector<1x200xf32>
    %c0_235 = arith.constant 0 : index
    %c0_236 = arith.constant 0 : index
    %334 = vector.load %arg11[%c0_235, %c0_236] : memref<200x100xf32, #tpu.memory_space<vmem>>, vector<200x100xf32>
    %cst_237 = arith.constant dense<0.000000e+00> : vector<1x100xf32>
    %335 = tpu.matmul %333, %334, %cst_237 {dimension_numbers = #tpu.dot_dimension_numbers<[1], [0], [0], [1], [0, 0, 1, 1], [], []>} : vector<1x200xf32>, vector<200x100xf32>, vector<1x100xf32> -> vector<1x100xf32>
    %c0_238 = arith.constant 0 : index
    %c0_239 = arith.constant 0 : index
    %336 = vector.load %arg12[%c0_238, %c0_239] : memref<1x100xf32, #tpu.memory_space<vmem>>, vector<1x100xf32>
    %337 = arith.addf %335, %336 : vector<1x100xf32>
    %cst_240 = arith.constant 0.000000e+00 : f32
    %338 = vector.broadcast %cst_240 : f32 to vector<1x100xf32>
    %339 = arith.maximumf %337, %338 : vector<1x100xf32>
    %c0_241 = arith.constant 0 : index
    %c0_242 = arith.constant 0 : index
    %340 = vector.load %arg13[%c0_241, %c0_242] : memref<100x4xf32, #tpu.memory_space<vmem>>, vector<100x4xf32>
    %cst_243 = arith.constant dense<0.000000e+00> : vector<1x4xf32>
    %341 = tpu.matmul %339, %340, %cst_243 {dimension_numbers = #tpu.dot_dimension_numbers<[1], [0], [0], [1], [0, 0, 1, 1], [], []>} : vector<1x100xf32>, vector<100x4xf32>, vector<1x4xf32> -> vector<1x4xf32>
    %c0_244 = arith.constant 0 : index
    %c0_245 = arith.constant 0 : index
    %342 = vector.load %arg14[%c0_244, %c0_245] : memref<1x4xf32, #tpu.memory_space<vmem>>, vector<1x4xf32>
    %343 = arith.addf %341, %342 : vector<1x4xf32>
    %c0_246 = arith.constant 0 : index
    %c0_247 = arith.constant 0 : index
    %344 = vector.load %arg15[%c0_246, %c0_247] : memref<1x4xf32, #tpu.memory_space<vmem>>, vector<1x4xf32>
    tpu.vector_store %arg15[%c0_246, %c0_247], %343 {strides = array<i32>} : memref<1x4xf32, #tpu.memory_space<vmem>>, vector<1x4xf32>,
    return
  }
  func.func @transform_0(%arg0: i32) -> (i32, i32) {
    %c0_i32 = arith.constant 0 : i32
    %c0_i32_0 = arith.constant 0 : i32
    %c0_i32_1 = arith.constant 0 : i32
    return %c0_i32, %c0_i32_0 : i32, i32
  }
  func.func @transform_1(%arg0: i32) -> (i32, i32, i32) {
    %c0_i32 = arith.constant 0 : i32
    %c0_i32_0 = arith.constant 0 : i32
    %c0_i32_1 = arith.constant 0 : i32
    %c0_i32_2 = arith.constant 0 : i32
    return %c0_i32, %c0_i32_0, %c0_i32_1 : i32, i32, i32
  }
  func.func @transform_2(%arg0: i32) -> (i32, i32) {
    %c0_i32 = arith.constant 0 : i32
    %c0_i32_0 = arith.constant 0 : i32
    %c0_i32_1 = arith.constant 0 : i32
    return %c0_i32, %c0_i32_0 : i32, i32
  }
  func.func @transform_3(%arg0: i32) -> (i32, i32, i32) {
    %c0_i32 = arith.constant 0 : i32
    %c0_i32_0 = arith.constant 0 : i32
    %c0_i32_1 = arith.constant 0 : i32
    %c0_i32_2 = arith.constant 0 : i32
    return %c0_i32, %c0_i32_0, %c0_i32_1 : i32, i32, i32
  }
  func.func @transform_4(%arg0: i32) -> (i32, i32) {
    %c0_i32 = arith.constant 0 : i32
    %c0_i32_0 = arith.constant 0 : i32
    %c0_i32_1 = arith.constant 0 : i32
    return %c0_i32, %c0_i32_0 : i32, i32
  }
  func.func @transform_5(%arg0: i32) -> (i32, i32) {
    %c0_i32 = arith.constant 0 : i32
    %c0_i32_0 = arith.constant 0 : i32
    %c0_i32_1 = arith.constant 0 : i32
    return %c0_i32, %c0_i32_0 : i32, i32
  }
  func.func @transform_6(%arg0: i32) -> (i32, i32) {
    %c0_i32 = arith.constant 0 : i32
    %c0_i32_0 = arith.constant 0 : i32
    %c0_i32_1 = arith.constant 0 : i32
    return %c0_i32, %c0_i32_0 : i32, i32
  }
  func.func @transform_7(%arg0: i32) -> (i32, i32, i32) {
    %c0_i32 = arith.constant 0 : i32
    %c0_i32_0 = arith.constant 0 : i32
    %c0_i32_1 = arith.constant 0 : i32
    %c0_i32_2 = arith.constant 0 : i32
    return %c0_i32, %c0_i32_0, %c0_i32_1 : i32, i32, i32
  }
  func.func @transform_8(%arg0: i32) -> (i32, i32) {
    %c0_i32 = arith.constant 0 : i32
    %c0_i32_0 = arith.constant 0 : i32
    %c0_i32_1 = arith.constant 0 : i32
    return %c0_i32, %c0_i32_0 : i32, i32
  }
  func.func @transform_9(%arg0: i32) -> (i32, i32) {
    %c0_i32 = arith.constant 0 : i32
    %c0_i32_0 = arith.constant 0 : i32
    %c0_i32_1 = arith.constant 0 : i32
    return %c0_i32, %c0_i32_0 : i32, i32
  }
  func.func @transform_10(%arg0: i32) -> (i32, i32) {
    %c0_i32 = arith.constant 0 : i32
    %c0_i32_0 = arith.constant 0 : i32
    %c0_i32_1 = arith.constant 0 : i32
    return %c0_i32, %c0_i32_0 : i32, i32
  }
  func.func @transform_11(%arg0: i32) -> (i32, i32) {
    %c0_i32 = arith.constant 0 : i32
    %c0_i32_0 = arith.constant 0 : i32
    %c0_i32_1 = arith.constant 0 : i32
    return %c0_i32, %c0_i32_0 : i32, i32
  }
  func.func @transform_12(%arg0: i32) -> (i32, i32) {
    %c0_i32 = arith.constant 0 : i32
    %c0_i32_0 = arith.constant 0 : i32
    %c0_i32_1 = arith.constant 0 : i32
    return %c0_i32, %c0_i32_0 : i32, i32
  }
  func.func @transform_13(%arg0: i32) -> (i32, i32) {
    %c0_i32 = arith.constant 0 : i32
    %c0_i32_0 = arith.constant 0 : i32
    %c0_i32_1 = arith.constant 0 : i32
    return %c0_i32, %c0_i32_0 : i32, i32
  }
  func.func @transform_14(%arg0: i32) -> (i32, i32) {
    %c0_i32 = arith.constant 0 : i32
    %c0_i32_0 = arith.constant 0 : i32
    %c0_i32_1 = arith.constant 0 : i32
    return %c0_i32, %c0_i32_0 : i32, i32
  }
}

</mosaic_0001>

<bundles_post_ra>
// kernel: cnn_forward_pallas.1
= control target key start
LH: loop header
LB: loop body
LE: loop exit
PB: predicated region body
PF: predicated region fallthrough
CT: control target
= control target key end

     0   :  { %s17907_s17 = smov 127   ;;  %v20876_v4 = vmov 0.0   ;;  %s20861_s0 = inlined_call_operand.vmem [shape: f32[8,1152], index: 0, kind: input, shape index: {}]   ;;  %s20862_s1 = inlined_call_operand.vmem [shape: f32[25,8,8], index: 1, kind: input, shape index: {}]   ;;  %s20863_s2 = inlined_call_operand.vmem [shape: f32[8,1], index: 2, kind: input, shape index: {}]   ;;  %s20864_s3 = inlined_call_operand.vmem [shape: f32[25,10,8], index: 3, kind: input, shape index: {}]   ;;  %s20865_s4 = inlined_call_operand.vmem [shape: f32[10,1], index: 4, kind: input, shape index: {}]   ;;  %s20866_s5 = inlined_call_operand.vmem [shape: f32[533,25], index: 5, kind: input, shape index: {}]   ;;  %s20867_s6 = inlined_call_operand.vmem [shape: f32[1,6], index: 6, kind: input, shape index: {}]   ;;  %s20868_s7 = inlined_call_operand.vmem [shape: f32[10,25,200], index: 7, kind: input, shape index: {}]   ;;  %s20869_s8 = inlined_call_operand.vmem [shape: f32[6,200], index: 8, kind: input, shape index: {}]   ;;  %s20870_s9 = inlined_call_operand.vmem [shape: f32[1,200], index: 9, kind: input, shape index: {}]   ;;  %s20871_s10 = inlined_call_operand.vmem [shape: f32[200,100], index: 10, kind: input, shape index: {}]   ;;  %s20872_s11 = inlined_call_operand.vmem [shape: f32[1,100], index: 11, kind: input, shape index: {}]   ;;  %s20873_s12 = inlined_call_operand.vmem [shape: f32[100,4], index: 12, kind: input, shape index: {}]   ;;  %s20874_s13 = inlined_call_operand.vmem [shape: f32[1,4], index: 13, kind: input, shape index: {}]   ;;  %s20875_s14 = inlined_call_operand.hbm [shape: f32[1,4], index: 14, kind: output, shape index: {}]  }
   0x1   :  { %v18014_v0 = vld [vmem:[%s20861_s0 + $0x8] sm:$0xff]  ;;  %v18019_v1 = vld [vmem:[%s20861_s0] sm:$0xff]  ;;  %v18028_v2 = vld [vmem:[%s20861_s0 + $0x10] sm:$0xff]  ;;  %167 = vmatprep.mubr.f32.mxu1 %v20876_v4  ;;  %309 = vmatprep.mubr.f32.mxu0 %v20876_v4 }
   0x2   :  { %70 = vrot.lane.b32.xlu0 %v18014_v0, %s17907_s17  ;;  %68 = vrot.lane.b32.xlu1 %v18019_v1, %s17907_s17  ;;  %v18033_v3 = vld [vmem:[%s20861_s0 + $0x18] sm:$0xff] }
   0x3   :  { %19 = vsyncpa [#allocation3], 0  ;;  %v18044_v5 = vld [vmem:[%s20861_s0 + $0x20] sm:$0xff]  ;;  %v18049_v6 = vld [vmem:[%s20861_s0 + $0x28] sm:$0xff]  ;;  %s17909_s30 = smov 126   ;;  %s17910_s15 = smov 125  }
   0x4   :  { %v18058_v7 = vld [vmem:[%s20861_s0 + $0x30] sm:$0xff]  ;;  %v18063_v8 = vld [vmem:[%s20861_s0 + $0x38] sm:$0xff]  ;;  %s17911_s16 = smov 124   ;;  %s17912_s18 = smov 96   ;;  %vm84_vm0 = vcmask 1039360   ;;  %v16240_v14 = vld [vmem:[%s20862_s1 + $0x8] sm:$0xff] }
   0x5   :  { %s17913_s19 = smov 95   ;;  %s17914_s20 = smov 94   ;;  %vm99_vm1 = vcmask 64512   ;;  %vm17916_vm2 = vmmov 0   ;;  %v57_v27 = vld [vmem:[%s20862_s1] sm:$0xff]  ;;  %vm690_vm3 = vcmask 1031168  }
   0x6   :  { %72 = vrot.lane.b32.xlu0 %v18028_v2, %s17907_s17  ;;  %74 = vrot.lane.b32.xlu1 %v18033_v3, %s17907_s17  ;;  %s17915_s21 = smov 93   ;;  %s17917_s24 = smov 92   ;;  %v16249_v38 = vld [vmem:[%s20862_s1 + $0x10] sm:$0xff]  ;;  %vm1016_vm4 = vcmask 1022976   ;;  %v16254_v51 = vld [vmem:[%s20862_s1 + $0x18] sm:$0xff]  ;;  %vm1342_vm5 = vcmask 1014784  }
   0x7   :  { %s17918_s29 = smov 64   ;;  %v16259_v63 = vld [vmem:[%s20862_s1 + $0x20] sm:$0xff]  ;;  %vm1668_vm6 = vcmask 785408   ;;  %vm1994_vm7 = vcmask 777216   ;;  %s17921_s27 = smov 61   ;;  %vm2320_vm8 = vcmask 769024  }
   0x8   :  { %vm2646_vm9 = vcmask 760832   ;;  %s17923_s23 = smov 32   ;;  %vm2972_vm10 = vcmask 752640   ;;  %vm3298_vm11 = vcmask 523264   ;;  %s17926_s25 = smov 29   ;;  %vm3624_vm12 = vcmask 515072  }
   0x9   :  { %s17927_s28 = smov 28   ;;  %vm3950_vm13 = vcmask 506880   ;;  %vm4276_vm14 = vcmask 498688   ;;  %vm4602_vm15 = vcmask 490496  }
   0xa   :  { %76 = vrot.lane.b32.xlu0 %v18044_v5, %s17907_s17  ;;  %78 = vrot.lane.b32.xlu1 %v18049_v6, %s17907_s17 }
   0xe   :  { %80 = vrot.lane.b32.xlu0 %v18058_v7, %s17907_s17  ;;  %82 = vrot.lane.b32.xlu1 %v18063_v8, %s17907_s17 }
  0x12   :  { %680 = vrot.lane.b32.xlu0 %v18033_v3, %s17909_s30  ;;  %682 = vrot.lane.b32.xlu1 %v18044_v5, %s17909_s30 }
  0x16   :  { %676 = vrot.lane.b32.xlu0 %v18014_v0, %s17909_s30  ;;  %678 = vrot.lane.b32.xlu1 %v18028_v2, %s17909_s30 }
  0x1a   :  { %674 = vrot.lane.b32.xlu0 %v18019_v1, %s17909_s30  ;;  %684 = vrot.lane.b32.xlu1 %v18049_v6, %s17909_s30 }
  0x1e   :  { %686 = vrot.lane.b32.xlu0 %v18058_v7, %s17909_s30  ;;  %688 = vrot.lane.b32.xlu1 %v18063_v8, %s17909_s30 }
  0x22   :  { %1006 = vrot.lane.b32.xlu0 %v18033_v3, %s17910_s15  ;;  %1008 = vrot.lane.b32.xlu1 %v18044_v5, %s17910_s15 }
  0x26   :  { %1002 = vrot.lane.b32.xlu0 %v18014_v0, %s17910_s15  ;;  %1004 = vrot.lane.b32.xlu1 %v18028_v2, %s17910_s15 }
  0x2a   :  { %1000 = vrot.lane.b32.xlu0 %v18019_v1, %s17910_s15  ;;  %1010 = vrot.lane.b32.xlu1 %v18049_v6, %s17910_s15 }
  0x2e   :  { %1012 = vrot.lane.b32.xlu0 %v18058_v7, %s17910_s15  ;;  %1014 = vrot.lane.b32.xlu1 %v18063_v8, %s17910_s15 }
  0x32   :  { %1332 = vrot.lane.b32.xlu0 %v18033_v3, %s17911_s16  ;;  %1334 = vrot.lane.b32.xlu1 %v18044_v5, %s17911_s16 }
  0x36   :  { %1328 = vrot.lane.b32.xlu0 %v18014_v0, %s17911_s16  ;;  %1330 = vrot.lane.b32.xlu1 %v18028_v2, %s17911_s16 }
  0x3a   :  { %1326 = vrot.lane.b32.xlu0 %v18019_v1, %s17911_s16  ;;  %1336 = vrot.lane.b32.xlu1 %v18049_v6, %s17911_s16 }
  0x3e   :  { %1338 = vrot.lane.b32.xlu0 %v18058_v7, %s17911_s16  ;;  %1340 = vrot.lane.b32.xlu1 %v18063_v8, %s17911_s16 }
  0x42   :  { %1658 = vrot.lane.b32.xlu0 %v18033_v3, %s17912_s18  ;;  %1660 = vrot.lane.b32.xlu1 %v18044_v5, %s17912_s18 }
  0x46   :  { %1654 = vrot.lane.b32.xlu0 %v18014_v0, %s17912_s18  ;;  %1656 = vrot.lane.b32.xlu1 %v18028_v2, %s17912_s18 }
  0x4a   :  { %1652 = vrot.lane.b32.xlu0 %v18019_v1, %s17912_s18  ;;  %1662 = vrot.lane.b32.xlu1 %v18049_v6, %s17912_s18 }
  0x4e   :  { %1664 = vrot.lane.b32.xlu0 %v18058_v7, %s17912_s18  ;;  %1666 = vrot.lane.b32.xlu1 %v18063_v8, %s17912_s18 }
  0x52   :  { %1984 = vrot.lane.b32.xlu0 %v18033_v3, %s17913_s19  ;;  %1986 = vrot.lane.b32.xlu1 %v18044_v5, %s17913_s19 }
  0x56   :  { %1980 = vrot.lane.b32.xlu0 %v18014_v0, %s17913_s19  ;;  %1982 = vrot.lane.b32.xlu1 %v18028_v2, %s17913_s19 }
  0x5a   :  { %1978 = vrot.lane.b32.xlu0 %v18019_v1, %s17913_s19  ;;  %1988 = vrot.lane.b32.xlu1 %v18049_v6, %s17913_s19 }
  0x5e   :  { %1990 = vrot.lane.b32.xlu0 %v18058_v7, %s17913_s19  ;;  %1992 = vrot.lane.b32.xlu1 %v18063_v8, %s17913_s19  ;;  %s17930_s19 = smov 120  }
  0x62   :  { %2310 = vrot.lane.b32.xlu0 %v18033_v3, %s17914_s20  ;;  %2312 = vrot.lane.b32.xlu1 %v18044_v5, %s17914_s20 }
  0x66   :  { %2306 = vrot.lane.b32.xlu0 %v18014_v0, %s17914_s20  ;;  %2308 = vrot.lane.b32.xlu1 %v18028_v2, %s17914_s20 }
  0x6a   :  { %2304 = vrot.lane.b32.xlu0 %v18019_v1, %s17914_s20  ;;  %2314 = vrot.lane.b32.xlu1 %v18049_v6, %s17914_s20 }
  0x6e   :  { %2316 = vrot.lane.b32.xlu0 %v18058_v7, %s17914_s20  ;;  %2318 = vrot.lane.b32.xlu1 %v18063_v8, %s17914_s20  ;;  %s17922_s20 = smov 60  }
  0x72   :  { %2636 = vrot.lane.b32.xlu0 %v18033_v3, %s17915_s21  ;;  %2638 = vrot.lane.b32.xlu1 %v18044_v5, %s17915_s21 }
  0x74   :  { %v71_v9 = vpop.permute.xlu0 %70  ;;  %v69_v10 = vpop.permute.xlu1 %68 }
  0x75   :  { %v85_v15 = vsel %vm84_vm0, %v69_v10, %v71_v9 }
  0x76   :  { %2632 = vrot.lane.b32.xlu0 %v18014_v0, %s17915_s21  ;;  %2634 = vrot.lane.b32.xlu1 %v18028_v2, %s17915_s21 }
  0x78   :  { %v73_v11 = vpop.permute.xlu0 %72  ;;  %v75_v12 = vpop.permute.xlu1 %74 }
  0x79   :  { %v18154_v13 = vsel %vm84_vm0, %v71_v9, %v73_v11  ;;  %v18171_v19 = vsel %vm84_vm0, %v73_v11, %v75_v12 }
  0x7a   :  { %103 = vmatprep.subr.mxu1 %v18154_v13  ;;  %2630 = vrot.lane.b32.xlu0 %v18019_v1, %s17915_s21 }
  0x7b   :  { %2640 = vrot.lane.b32.xlu1 %v18049_v6, %s17915_s21  ;;  %104 = vmatpush1.msra.mxu1 %v85_v15 }
  0x7c   :  { %v77_v16 = vpop.permute.xlu0 %76  ;;  %16241 = vmatmul.mubr.msk.f32.vlgmr.msra.gmra.mrb[0].mxu1 %vm99_vm1, %v16240_v14  ;;  %v79_v17 = vpop.permute.xlu1 %78 }
  0x7d   :  { %v18165_v18 = vsel %vm84_vm0, %v75_v12, %v77_v16  ;;  %238 = vmatprep.mubr.f32.mxu1 %v20876_v4  ;;  %v18195_v24 = vsel %vm84_vm0, %v77_v16, %v79_v17 }
  0x7e   :  { %2642 = vrot.lane.b32.xlu0 %v18058_v7, %s17915_s21  ;;  %174 = vmatprep.subr.mxu1 %v18165_v18 }
  0x7f   :  { %2644 = vrot.lane.b32.xlu1 %v18063_v8, %s17915_s21  ;;  %175 = vmatpush1.msra.mxu1 %v18171_v19  ;;  %s17919_s21 = smov 63  }
  0x80   :  { %v81_v20 = vpop.permute.xlu0 %80  ;;  %16242 = vmatmul.mubr.msk.f32.vlgmr.msra.gmra.mrb[2].mxu1 %vm99_vm1, %v16240_v14  ;;  %v18176_v21 = vpop.permute.xlu1 %82  ;;  %16893 = vmatprep.subr.mxu1 %v20876_v4 }
  0x81   :  { %v18180_v22 = vsel %vm84_vm0, %v79_v17, %v81_v20  ;;  %v18184_v23 = vsel %vm84_vm0, %v81_v20, %v18176_v21  ;;  %16895 = vmatprep.mubr.msk.f32.mxu1 %vm17916_vm2, %v20876_v4 }
  0x82   :  { %2962 = vrot.lane.b32.xlu0 %v18033_v3, %s17917_s24  ;;  %245 = vmatprep.subr.mxu0 %v18180_v22 }
  0x83   :  { %2964 = vrot.lane.b32.xlu1 %v18044_v5, %s17917_s24  ;;  %16894 = vmatpush3.msra.mxu1 %v18184_v23 }
  0x84   :  { %246 = vmatpush1.msra.mxu0 %v18195_v24  ;;  %v681_v25 = vpop.permute.xlu0 %680  ;;  %16896 = vmatmul.mubr.msk.f32.vlgmr.msra.gmra.mrb[4].mxu1 %vm99_vm1, %v16240_v14  ;;  %v683_v26 = vpop.permute.xlu1 %682 }
  0x85   :  { %16243 = vmatmul.mubr.msk.f32.vlgmr.msra.gmra.mrb[0].mxu0 %vm99_vm1, %v16240_v14  ;;  %460 = vmatprep.subr.mxu1 %v18033_v3  ;;  %v18219_v30 = vsel %vm690_vm3, %v681_v25, %v683_v26 }
  0x86   :  { %2958 = vrot.lane.b32.xlu0 %v18014_v0, %s17917_s24  ;;  %389 = vmatprep.subr.mxu0 %v18014_v0 }
  0x87   :  { %2960 = vrot.lane.b32.xlu1 %v18028_v2, %s17917_s24  ;;  %461 = vmatpush1.msra.mxu1 %v18028_v2 }
  0x88   :  { %390 = vmatpush1.msra.mxu0 %v18019_v1  ;;  %524 = vmatprep.mubr.f32.mxu1 %v20876_v4  ;;  %v677_v28 = vpop.permute.xlu0 %676  ;;  %v679_v29 = vpop.permute.xlu1 %678 }
  0x89   :  { %16898 = vmatprep.subr.mxu1 %v20876_v4  ;;  %453 = vmatprep.mubr.f32.mxu0 %v20876_v4  ;;  %v18222_v31 = vsel %vm690_vm3, %v677_v28, %v679_v29  ;;  %v18236_v35 = vsel %vm690_vm3, %v679_v29, %v681_v25 }
  0x8a   :  { %16246 = vmatmul.mubr.msk.f32.vlgmr.msra.gmra.mrb[2].mxu1 %vm99_vm1, %v57_v27  ;;  %531 = vmatprep.subr.mxu0 %v18049_v6 }
  0x8b   :  { %16899 = vmatpush3.msra.mxu1 %v18058_v7  ;;  %16245 = vmatmul.mubr.msk.f32.vlgmr.msra.gmra.mrb[2].mxu0 %vm99_vm1, %v57_v27 }
  0x8c   :  { %532 = vmatpush1.msra.mxu0 %v18044_v5  ;;  %779 = vmatprep.subr.mxu1 %v18219_v30  ;;  %v675_v32 = vpop.permute.xlu0 %674  ;;  %v685_v33 = vpop.permute.xlu1 %684 }
  0x8d   :  { %2956 = vrot.lane.b32.xlu0 %v18019_v1, %s17917_s24  ;;  %2966 = vrot.lane.b32.xlu1 %v18049_v6, %s17917_s24  ;;  %v691_v34 = vsel %vm690_vm3, %v675_v32, %v677_v28  ;;  %v18272_v44 = vsel %vm690_vm3, %v683_v26, %v685_v33 }
  0x8e   :  { %708 = vmatprep.subr.mxu0 %v18222_v31  ;;  %16900 = vmatprep.mubr.msk.f32.mxu1 %vm17916_vm2, %v20876_v4 }
  0x8f   :  { %16901 = vmatmul.mubr.msk.f32.vlgmr.msra.gmra.mrb[6].mxu1 %vm99_vm1, %v57_v27  ;;  %595 = vmatprep.mubr.f32.mxu0 %v20876_v4 }
  0x90   :  { %780 = vmatpush1.msra.mxu1 %v18236_v35  ;;  %16247 = vmatmul.mubr.msk.f32.vlgmr.msra.gmra.mrb[0].mxu0 %vm99_vm1, %v57_v27  ;;  %v687_v36 = vpop.permute.xlu0 %686  ;;  %v18241_v37 = vpop.permute.xlu1 %688 }
  0x91   :  { %2968 = vrot.lane.b32.xlu0 %v18058_v7, %s17917_s24  ;;  %2970 = vrot.lane.b32.xlu1 %v18063_v8, %s17917_s24  ;;  %v18251_v39 = vsel %vm690_vm3, %v685_v33, %v687_v36  ;;  %v18258_v40 = vsel %vm690_vm3, %v687_v36, %v18241_v37  ;;  %s17920_s24 = smov 62   ;;  %v16264_v33 = vld [vmem:[%s20862_s1 + $0x28] sm:$0xff] }
  0x92   :  { %709 = vmatpush1.msra.mxu0 %v691_v34  ;;  %843 = vmatprep.mubr.f32.mxu1 %v20876_v4 }
  0x93   :  { %16903 = vmatprep.subr.mxu1 %v20876_v4  ;;  %772 = vmatprep.mubr.f32.mxu0 %v20876_v4 }
  0x94   :  { %16251 = vmatmul.mubr.msk.f32.vlgmr.msra.gmra.mrb[2].mxu1 %vm99_vm1, %v16249_v38  ;;  %850 = vmatprep.subr.mxu0 %v18251_v39  ;;  %v1007_v41 = vpop.permute.xlu0 %1006  ;;  %v1009_v42 = vpop.permute.xlu1 %1008 }
  0x95   :  { %3288 = vrot.lane.b32.xlu0 %v18033_v3, %s17918_s29  ;;  %3290 = vrot.lane.b32.xlu1 %v18044_v5, %s17918_s29  ;;  %v18267_v43 = vsel %vm1016_vm4, %v1007_v41, %v1009_v42 }
  0x96   :  { %16904 = vmatpush3.msra.mxu1 %v18258_v40  ;;  %16250 = vmatmul.mubr.msk.f32.vlgmr.msra.gmra.mrb[2].mxu0 %vm99_vm1, %v16249_v38 }
  0x97   :  { %851 = vmatpush1.msra.mxu0 %v18272_v44  ;;  %1105 = vmatprep.subr.mxu1 %v18267_v43 }
  0x98   :  { %v1003_v45 = vpop.permute.xlu0 %1002  ;;  %v1005_v46 = vpop.permute.xlu1 %1004  ;;  %16905 = vmatprep.mubr.msk.f32.mxu1 %vm17916_vm2, %v20876_v4  ;;  %914 = vmatprep.mubr.f32.mxu0 %v20876_v4 }
  0x99   :  { %3284 = vrot.lane.b32.xlu0 %v18014_v0, %s17918_s29  ;;  %3286 = vrot.lane.b32.xlu1 %v18028_v2, %s17918_s29  ;;  %v18284_v47 = vsel %vm1016_vm4, %v1003_v45, %v1005_v46  ;;  %v18287_v48 = vsel %vm1016_vm4, %v1005_v46, %v1007_v41 }
  0x9a   :  { %16906 = vmatmul.mubr.msk.f32.vlgmr.msra.gmra.mrb[8].mxu1 %vm99_vm1, %v16249_v38  ;;  %1034 = vmatprep.subr.mxu0 %v18284_v47 }
  0x9b   :  { %1106 = vmatpush1.msra.mxu1 %v18287_v48  ;;  %16252 = vmatmul.mubr.msk.f32.vlgmr.msra.gmra.mrb[0].mxu0 %vm99_vm1, %v16249_v38 }
  0x9c   :  { %v1001_v49 = vpop.permute.xlu0 %1000  ;;  %v1011_v50 = vpop.permute.xlu1 %1010  ;;  %1169 = vmatprep.mubr.f32.mxu1 %v20876_v4  ;;  %16908 = vmatprep.subr.mxu1 %v20876_v4 }
  0x9d   :  { %3282 = vrot.lane.b32.xlu0 %v18019_v1, %s17918_s29  ;;  %3292 = vrot.lane.b32.xlu1 %v18049_v6, %s17918_s29  ;;  %v1017_v52 = vsel %vm1016_vm4, %v1001_v49, %v1003_v45  ;;  %v18325_v57 = vsel %vm1016_vm4, %v1009_v42, %v1011_v50 }
  0x9e   :  { %1035 = vmatpush1.msra.mxu0 %v1017_v52  ;;  %1098 = vmatprep.mubr.f32.mxu0 %v20876_v4 }
  0x9f   :  { %16256 = vmatmul.mubr.msk.f32.vlgmr.msra.gmra.mrb[2].mxu1 %vm99_vm1, %v16254_v51  ;;  %16255 = vmatmul.mubr.msk.f32.vlgmr.msra.gmra.mrb[2].mxu0 %vm99_vm1, %v16254_v51 }
  0xa0   :  { %v1013_v53 = vpop.permute.xlu0 %1012  ;;  %v18306_v54 = vpop.permute.xlu1 %1014  ;;  %16910 = vmatprep.mubr.msk.f32.mxu1 %vm17916_vm2, %v20876_v4  ;;  %1240 = vmatprep.mubr.f32.mxu0 %v20876_v4 }
  0xa1   :  { %3294 = vrot.lane.b32.xlu0 %v18058_v7, %s17918_s29  ;;  %3296 = vrot.lane.b32.xlu1 %v18063_v8, %s17918_s29  ;;  %v18316_v55 = vsel %vm1016_vm4, %v1011_v50, %v1013_v53  ;;  %v18320_v56 = vsel %vm1016_vm4, %v1013_v53, %v18306_v54 }
  0xa2   :  { %1176 = vmatprep.subr.mxu0 %v18316_v55  ;;  %16909 = vmatpush3.msra.mxu1 %v18320_v56 }
  0xa3   :  { %1177 = vmatpush1.msra.mxu0 %v18325_v57  ;;  %16911 = vmatmul.mubr.msk.f32.vlgmr.msra.gmra.mrb[10].mxu1 %vm99_vm1, %v16254_v51 }
  0xa4   :  { %v1333_v58 = vpop.permute.xlu0 %1332  ;;  %v1335_v59 = vpop.permute.xlu1 %1334  ;;  %16257 = vmatmul.mubr.msk.f32.vlgmr.msra.gmra.mrb[0].mxu0 %vm99_vm1, %v16254_v51  ;;  %1495 = vmatprep.mubr.f32.mxu1 %v20876_v4 }
  0xa5   :  { %3614 = vrot.lane.b32.xlu0 %v18033_v3, %s17919_s21  ;;  %3616 = vrot.lane.b32.xlu1 %v18044_v5, %s17919_s21  ;;  %v18334_v60 = vsel %vm1342_vm5, %v1333_v58, %v1335_v59 }
  0xa6   :  { %1431 = vmatprep.subr.mxu1 %v18334_v60  ;;  %1424 = vmatprep.mubr.f32.mxu0 %v20876_v4 }
  0xa8   :  { %v1329_v61 = vpop.permute.xlu0 %1328  ;;  %v1331_v62 = vpop.permute.xlu1 %1330 }
  0xa9   :  { %3610 = vrot.lane.b32.xlu0 %v18014_v0, %s17919_s21  ;;  %3612 = vrot.lane.b32.xlu1 %v18028_v2, %s17919_s21  ;;  %v18344_v9 = vsel %vm1342_vm5, %v1329_v61, %v1331_v62  ;;  %v18347_v10 = vsel %vm1342_vm5, %v1331_v62, %v1333_v58  ;;  %v16269_v62 = vld [vmem:[%s20862_s1 + $0x30] sm:$0xff] }
  0xaa   :  { %1360 = vmatprep.subr.mxu0 %v18344_v9  ;;  %1432 = vmatpush1.msra.mxu1 %v18347_v10 }
  0xab   :  { %16913 = vmatprep.subr.mxu1 %v20876_v4  ;;  %16261 = vmatmul.mubr.msk.f32.vlgmr.msra.gmra.mrb[2].mxu1 %vm99_vm1, %v16259_v63 }
  0xac   :  { %v1327_v11 = vpop.permute.xlu0 %1326  ;;  %v1337_v12 = vpop.permute.xlu1 %1336  ;;  %16915 = vmatprep.mubr.msk.f32.mxu1 %vm17916_vm2, %v20876_v4 }
  0xad   :  { %3608 = vrot.lane.b32.xlu0 %v18019_v1, %s17919_s21  ;;  %3618 = vrot.lane.b32.xlu1 %v18049_v6, %s17919_s21  ;;  %v1343_v14 = vsel %vm1342_vm5, %v1327_v11, %v1329_v61  ;;  %v18374_v25 = vsel %vm1342_vm5, %v1335_v59, %v1337_v12 }
  0xae   :  { %1361 = vmatpush1.msra.mxu0 %v1343_v14 }
  0xaf   :  { %16260 = vmatmul.mubr.msk.f32.vlgmr.msra.gmra.mrb[2].mxu0 %vm99_vm1, %v16259_v63 }
  0xb0   :  { %v1339_v15 = vpop.permute.xlu0 %1338  ;;  %v18359_v16 = vpop.permute.xlu1 %1340  ;;  %1566 = vmatprep.mubr.f32.mxu0 %v20876_v4 }
  0xb1   :  { %3620 = vrot.lane.b32.xlu0 %v18058_v7, %s17919_s21  ;;  %3622 = vrot.lane.b32.xlu1 %v18063_v8, %s17919_s21  ;;  %v18365_v17 = vsel %vm1342_vm5, %v1337_v12, %v1339_v15  ;;  %v18369_v20 = vsel %vm1342_vm5, %v1339_v15, %v18359_v16  ;;  %s17925_s21 = smov 30  }
  0xb2   :  { %1502 = vmatprep.subr.mxu0 %v18365_v17  ;;  %16914 = vmatpush3.msra.mxu1 %v18369_v20 }
  0xb3   :  { %1503 = vmatpush1.msra.mxu0 %v18374_v25  ;;  %16916 = vmatmul.mubr.msk.f32.vlgmr.msra.gmra.mrb[12].mxu1 %vm99_vm1, %v16259_v63 }
  0xb4   :  { %v1659_v26 = vpop.permute.xlu0 %1658  ;;  %v1661_v27 = vpop.permute.xlu1 %1660  ;;  %16262 = vmatmul.mubr.msk.f32.vlgmr.msra.gmra.mrb[0].mxu0 %vm99_vm1, %v16259_v63  ;;  %1821 = vmatprep.mubr.f32.mxu1 %v20876_v4 }
  0xb5   :  { %3940 = vrot.lane.b32.xlu0 %v18033_v3, %s17920_s24  ;;  %3942 = vrot.lane.b32.xlu1 %v18044_v5, %s17920_s24  ;;  %v1672_v28 = vsel %vm1668_vm6, %v1659_v26, %v1661_v27 }
  0xb6   :  { %1757 = vmatprep.subr.mxu1 %v1672_v28  ;;  %1750 = vmatprep.mubr.f32.mxu0 %v20876_v4 }
  0xb8   :  { %v1655_v29 = vpop.permute.xlu0 %1654  ;;  %v1657_v32 = vpop.permute.xlu1 %1656 }
  0xb9   :  { %3936 = vrot.lane.b32.xlu0 %v18014_v0, %s17920_s24  ;;  %3938 = vrot.lane.b32.xlu1 %v18028_v2, %s17920_s24  ;;  %v1670_v34 = vsel %vm1668_vm6, %v1655_v29, %v1657_v32  ;;  %v1671_v36 = vsel %vm1668_vm6, %v1657_v32, %v1659_v26 }
  0xba   :  { %1686 = vmatprep.subr.mxu0 %v1670_v34  ;;  %1758 = vmatpush1.msra.mxu1 %v1671_v36 }
  0xbb   :  { %16918 = vmatprep.subr.mxu1 %v20876_v4  ;;  %16266 = vmatmul.mubr.msk.f32.vlgmr.msra.gmra.mrb[2].mxu1 %vm99_vm1, %v16264_v33 }
  0xbc   :  { %v1653_v38 = vpop.permute.xlu0 %1652  ;;  %v1663_v41 = vpop.permute.xlu1 %1662  ;;  %16920 = vmatprep.mubr.msk.f32.mxu1 %vm17916_vm2, %v20876_v4 }
  0xbd   :  { %3934 = vrot.lane.b32.xlu0 %v18019_v1, %s17920_s24  ;;  %3944 = vrot.lane.b32.xlu1 %v18049_v6, %s17920_s24  ;;  %v1669_v42 = vsel %vm1668_vm6, %v1653_v38, %v1655_v29  ;;  %v1673_v51 = vsel %vm1668_vm6, %v1661_v27, %v1663_v41 }
  0xbe   :  { %1687 = vmatpush1.msra.mxu0 %v1669_v42  ;;  %v16274_v42 = vld [vmem:[%s20862_s1 + $0x38] sm:$0xff] }
  0xbf   :  { %16265 = vmatmul.mubr.msk.f32.vlgmr.msra.gmra.mrb[2].mxu0 %vm99_vm1, %v16264_v33 }
  0xc0   :  { %v1665_v45 = vpop.permute.xlu0 %1664  ;;  %v1667_v46 = vpop.permute.xlu1 %1666  ;;  %1892 = vmatprep.mubr.f32.mxu0 %v20876_v4 }
  0xc1   :  { %3946 = vrot.lane.b32.xlu0 %v18058_v7, %s17920_s24  ;;  %3948 = vrot.lane.b32.xlu1 %v18063_v8, %s17920_s24  ;;  %v1675_v49 = vsel %vm1668_vm6, %v1665_v45, %v1667_v46  ;;  %v1674_v50 = vsel %vm1668_vm6, %v1663_v41, %v1665_v45 }
  0xc2   :  { %1828 = vmatprep.subr.mxu0 %v1674_v50  ;;  %16919 = vmatpush3.msra.mxu1 %v1675_v49 }
  0xc3   :  { %1829 = vmatpush1.msra.mxu0 %v1673_v51  ;;  %16921 = vmatmul.mubr.msk.f32.vlgmr.msra.gmra.mrb[14].mxu1 %vm99_vm1, %v16264_v33 }
  0xc4   :  { %v1985_v52 = vpop.permute.xlu0 %1984  ;;  %v1987_v53 = vpop.permute.xlu1 %1986  ;;  %16267 = vmatmul.mubr.msk.f32.vlgmr.msra.gmra.mrb[0].mxu0 %vm99_vm1, %v16264_v33  ;;  %2147 = vmatprep.mubr.f32.mxu1 %v20876_v4 }
  0xc5   :  { %4266 = vrot.lane.b32.xlu0 %v18033_v3, %s17921_s27  ;;  %4268 = vrot.lane.b32.xlu1 %v18044_v5, %s17921_s27  ;;  %v1998_v58 = vsel %vm1994_vm7, %v1985_v52, %v1987_v53 }
  0xc6   :  { %2083 = vmatprep.subr.mxu1 %v1998_v58  ;;  %2076 = vmatprep.mubr.f32.mxu0 %v20876_v4 }
  0xc8   :  { %v1981_v59 = vpop.permute.xlu0 %1980  ;;  %v1983_v61 = vpop.permute.xlu1 %1982 }
  0xc9   :  { %4262 = vrot.lane.b32.xlu0 %v18014_v0, %s17921_s27  ;;  %4264 = vrot.lane.b32.xlu1 %v18028_v2, %s17921_s27  ;;  %v1996_v63 = vsel %vm1994_vm7, %v1981_v59, %v1983_v61  ;;  %v1997_v11 = vsel %vm1994_vm7, %v1983_v61, %v1985_v52 }
  0xca   :  { %2012 = vmatprep.subr.mxu0 %v1996_v63  ;;  %2084 = vmatpush1.msra.mxu1 %v1997_v11 }
  0xcb   :  { %16923 = vmatprep.subr.mxu1 %v20876_v4  ;;  %16271 = vmatmul.mubr.msk.f32.vlgmr.msra.gmra.mrb[2].mxu1 %vm99_vm1, %v16269_v62 }
  0xcc   :  { %v1979_v12 = vpop.permute.xlu0 %1978  ;;  %v1989_v14 = vpop.permute.xlu1 %1988  ;;  %16925 = vmatprep.mubr.msk.f32.mxu1 %vm17916_vm2, %v20876_v4 }
  0xcd   :  { %4260 = vrot.lane.b32.xlu0 %v18019_v1, %s17921_s27  ;;  %4270 = vrot.lane.b32.xlu1 %v18049_v6, %s17921_s27  ;;  %v1995_v15 = vsel %vm1994_vm7, %v1979_v12, %v1981_v59  ;;  %v1999_v32 = vsel %vm1994_vm7, %v1987_v53, %v1989_v14 }
  0xce   :  { %2013 = vmatpush1.msra.mxu0 %v1995_v15  ;;  %v16279_v15 = vld [vmem:[%s20862_s1 + $0x40] sm:$0xff] }
  0xcf   :  { %16270 = vmatmul.mubr.msk.f32.vlgmr.msra.gmra.mrb[2].mxu0 %vm99_vm1, %v16269_v62 }
  0xd0   :  { %v1991_v26 = vpop.permute.xlu0 %1990  ;;  %v1993_v27 = vpop.permute.xlu1 %1992  ;;  %2218 = vmatprep.mubr.f32.mxu0 %v20876_v4 }
  0xd1   :  { %4272 = vrot.lane.b32.xlu0 %v18058_v7, %s17921_s27  ;;  %4274 = vrot.lane.b32.xlu1 %v18063_v8, %s17921_s27  ;;  %v2001_v28 = vsel %vm1994_vm7, %v1991_v26, %v1993_v27  ;;  %v2000_v29 = vsel %vm1994_vm7, %v1989_v14, %v1991_v26  ;;  %s17924_s27 = smov 31   ;;  %vm4928_vm7 = vcmask 261120  }
  0xd2   :  { %2154 = vmatprep.subr.mxu0 %v2000_v29  ;;  %16924 = vmatpush3.msra.mxu1 %v2001_v28 }
  0xd3   :  { %2155 = vmatpush1.msra.mxu0 %v1999_v32  ;;  %16926 = vmatmul.mubr.msk.f32.vlgmr.msra.gmra.mrb[16].mxu1 %vm99_vm1, %v16269_v62 }
  0xd4   :  { %v2311_v33 = vpop.permute.xlu0 %2310  ;;  %v2313_v34 = vpop.permute.xlu1 %2312  ;;  %16272 = vmatmul.mubr.msk.f32.vlgmr.msra.gmra.mrb[0].mxu0 %vm99_vm1, %v16269_v62  ;;  %2473 = vmatprep.mubr.f32.mxu1 %v20876_v4 }
  0xd5   :  { %4592 = vrot.lane.b32.xlu0 %v18033_v3, %s17922_s20  ;;  %4594 = vrot.lane.b32.xlu1 %v18044_v5, %s17922_s20  ;;  %v2324_v36 = vsel %vm2320_vm8, %v2311_v33, %v2313_v34 }
  0xd6   :  { %2409 = vmatprep.subr.mxu1 %v2324_v36  ;;  %2402 = vmatprep.mubr.f32.mxu0 %v20876_v4 }
  0xd8   :  { %v2307_v38 = vpop.permute.xlu0 %2306  ;;  %v2309_v41 = vpop.permute.xlu1 %2308 }
  0xd9   :  { %4588 = vrot.lane.b32.xlu0 %v18014_v0, %s17922_s20  ;;  %4590 = vrot.lane.b32.xlu1 %v18028_v2, %s17922_s20  ;;  %v2322_v45 = vsel %vm2320_vm8, %v2307_v38, %v2309_v41  ;;  %v2323_v46 = vsel %vm2320_vm8, %v2309_v41, %v2311_v33 }
  0xda   :  { %2338 = vmatprep.subr.mxu0 %v2322_v45  ;;  %2410 = vmatpush1.msra.mxu1 %v2323_v46 }
  0xdb   :  { %16928 = vmatprep.subr.mxu1 %v20876_v4  ;;  %16276 = vmatmul.mubr.msk.f32.vlgmr.msra.gmra.mrb[2].mxu1 %vm99_vm1, %v16274_v42 }
  0xdc   :  { %v2305_v49 = vpop.permute.xlu0 %2304  ;;  %v2315_v50 = vpop.permute.xlu1 %2314  ;;  %16930 = vmatprep.mubr.msk.f32.mxu1 %vm17916_vm2, %v20876_v4 }
  0xdd   :  { %4586 = vrot.lane.b32.xlu0 %v18019_v1, %s17922_s20  ;;  %4596 = vrot.lane.b32.xlu1 %v18049_v6, %s17922_s20  ;;  %v2321_v51 = vsel %vm2320_vm8, %v2305_v49, %v2307_v38  ;;  %v2325_v61 = vsel %vm2320_vm8, %v2313_v34, %v2315_v50 }
  0xde   :  { %2339 = vmatpush1.msra.mxu0 %v2321_v51  ;;  %v16284_v51 = vld [vmem:[%s20862_s1 + $0x48] sm:$0xff] }
  0xdf   :  { %16275 = vmatmul.mubr.msk.f32.vlgmr.msra.gmra.mrb[2].mxu0 %vm99_vm1, %v16274_v42 }
  0xe0   :  { %v2317_v52 = vpop.permute.xlu0 %2316  ;;  %v2319_v53 = vpop.permute.xlu1 %2318  ;;  %2544 = vmatprep.mubr.f32.mxu0 %v20876_v4 }
  0xe1   :  { %4598 = vrot.lane.b32.xlu0 %v18058_v7, %s17922_s20  ;;  %4600 = vrot.lane.b32.xlu1 %v18063_v8, %s17922_s20  ;;  %v2327_v58 = vsel %vm2320_vm8, %v2317_v52, %v2319_v53  ;;  %v2326_v59 = vsel %vm2320_vm8, %v2315_v50, %v2317_v52  ;;  %vm5254_vm8 = vcmask 252928  }
  0xe2   :  { %2480 = vmatprep.subr.mxu0 %v2326_v59  ;;  %16929 = vmatpush3.msra.mxu1 %v2327_v58 }
  0xe3   :  { %2481 = vmatpush1.msra.mxu0 %v2325_v61  ;;  %16931 = vmatmul.mubr.msk.f32.vlgmr.msra.gmra.mrb[18].mxu1 %vm99_vm1, %v16274_v42 }
  0xe4   :  { %v2637_v62 = vpop.permute.xlu0 %2636  ;;  %v2639_v63 = vpop.permute.xlu1 %2638  ;;  %16277 = vmatmul.mubr.msk.f32.vlgmr.msra.gmra.mrb[0].mxu0 %vm99_vm1, %v16274_v42  ;;  %2799 = vmatprep.mubr.f32.mxu1 %v20876_v4 }
  0xe5   :  { %4918 = vrot.lane.b32.xlu0 %v18033_v3, %s17923_s23  ;;  %4920 = vrot.lane.b32.xlu1 %v18044_v5, %s17923_s23  ;;  %v2650_v11 = vsel %vm2646_vm9, %v2637_v62, %v2639_v63 }
  0xe6   :  { %2735 = vmatprep.subr.mxu1 %v2650_v11  ;;  %2728 = vmatprep.mubr.f32.mxu0 %v20876_v4 }
  0xe8   :  { %v2633_v12 = vpop.permute.xlu0 %2632  ;;  %v2635_v14 = vpop.permute.xlu1 %2634 }
  0xe9   :  { %4914 = vrot.lane.b32.xlu0 %v18014_v0, %s17923_s23  ;;  %4916 = vrot.lane.b32.xlu1 %v18028_v2, %s17923_s23  ;;  %v2648_v26 = vsel %vm2646_vm9, %v2633_v12, %v2635_v14  ;;  %v2649_v27 = vsel %vm2646_vm9, %v2635_v14, %v2637_v62 }
  0xea   :  { %2664 = vmatprep.subr.mxu0 %v2648_v26  ;;  %2736 = vmatpush1.msra.mxu1 %v2649_v27 }
  0xeb   :  { %16933 = vmatprep.subr.mxu1 %v20876_v4  ;;  %16281 = vmatmul.mubr.msk.f32.vlgmr.msra.gmra.mrb[2].mxu1 %vm99_vm1, %v16279_v15 }
  0xec   :  { %v2631_v28 = vpop.permute.xlu0 %2630  ;;  %16935 = vmatprep.mubr.msk.f32.mxu1 %vm17916_vm2, %v20876_v4 }
  0xed   :  { %4912 = vrot.lane.b32.xlu0 %v18019_v1, %s17923_s23  ;;  %4922 = vrot.lane.b32.xlu1 %v18049_v6, %s17923_s23  ;;  %v2647_v29 = vsel %vm2646_vm9, %v2631_v28, %v2633_v12  ;;  %v2641_v32 = vpop.permute.xlu1 %2640 }
  0xee   :  { %2665 = vmatpush1.msra.mxu0 %v2647_v29  ;;  %v2651_v41 = vsel %vm2646_vm9, %v2639_v63, %v2641_v32 }
  0xef   :  { %16280 = vmatmul.mubr.msk.f32.vlgmr.msra.gmra.mrb[2].mxu0 %vm99_vm1, %v16279_v15 }
  0xf0   :  { %v2643_v33 = vpop.permute.xlu0 %2642  ;;  %2870 = vmatprep.mubr.f32.mxu0 %v20876_v4 }
  0xf1   :  { %4924 = vrot.lane.b32.xlu0 %v18058_v7, %s17923_s23  ;;  %4926 = vrot.lane.b32.xlu1 %v18063_v8, %s17923_s23  ;;  %v2645_v34 = vpop.permute.xlu1 %2644  ;;  %v2652_v36 = vsel %vm2646_vm9, %v2641_v32, %v2643_v33 }
  0xf2   :  { %v2653_v38 = vsel %vm2646_vm9, %v2643_v33, %v2645_v34  ;;  %2806 = vmatprep.subr.mxu0 %v2652_v36  ;;  %v16289_v34 = vld [vmem:[%s20862_s1 + $0x50] sm:$0xff]  ;;  %vm5580_vm9 = vcmask 244736  }
  0xf3   :  { %16934 = vmatpush3.msra.mxu1 %v2653_v38  ;;  %2807 = vmatpush1.msra.mxu0 %v2651_v41 }
  0xf4   :  { %v2963_v42 = vpop.permute.xlu0 %2962  ;;  %16936 = vmatmul.mubr.msk.f32.vlgmr.msra.gmra.mrb[20].mxu1 %vm99_vm1, %v16279_v15  ;;  %16282 = vmatmul.mubr.msk.f32.vlgmr.msra.gmra.mrb[0].mxu0 %vm99_vm1, %v16279_v15 }
  0xf5   :  { %5244 = vrot.lane.b32.xlu0 %v18033_v3, %s17924_s27  ;;  %5246 = vrot.lane.b32.xlu1 %v18044_v5, %s17924_s27  ;;  %v2965_v45 = vpop.permute.xlu1 %2964 }
  0xf6   :  { %v2976_v46 = vsel %vm2972_vm10, %v2963_v42, %v2965_v45  ;;  %3125 = vmatprep.mubr.f32.mxu1 %v20876_v4  ;;  %3054 = vmatprep.mubr.f32.mxu0 %v20876_v4 }
  0xf7   :  { %3061 = vmatprep.subr.mxu1 %v2976_v46 }
  0xf8   :  { %v2959_v49 = vpop.permute.xlu0 %2958 }
  0xf9   :  { %5240 = vrot.lane.b32.xlu0 %v18014_v0, %s17924_s27  ;;  %5242 = vrot.lane.b32.xlu1 %v18028_v2, %s17924_s27  ;;  %v2961_v50 = vpop.permute.xlu1 %2960 }
  0xfa   :  { %v2974_v52 = vsel %vm2972_vm10, %v2959_v49, %v2961_v50  ;;  %v2975_v53 = vsel %vm2972_vm10, %v2961_v50, %v2963_v42 }
  0xfb   :  { %2990 = vmatprep.subr.mxu0 %v2974_v52  ;;  %3062 = vmatpush1.msra.mxu1 %v2975_v53  ;;  %v16294_v52 = vld [vmem:[%s20862_s1 + $0x58] sm:$0xff]  ;;  %v17877_v53 = vld [vmem:[%s20861_s0] sm:$0xff] }
  0xfc   :  { %16938 = vmatprep.subr.mxu1 %v20876_v4  ;;  %16286 = vmatmul.mubr.msk.f32.vlgmr.msra.gmra.mrb[2].mxu1 %vm99_vm1, %v16284_v51 }
  0xfd   :  { %5238 = vrot.lane.b32.xlu0 %v18019_v1, %s17924_s27  ;;  %5248 = vrot.lane.b32.xlu1 %v18049_v6, %s17924_s27 }
  0xfe   :  { %16940 = vmatprep.mubr.msk.f32.mxu1 %vm17916_vm2, %v20876_v4 }
  0xff   :  { %v2957_v58 = vpop.permute.xlu0 %2956  ;;  %v2967_v59 = vpop.permute.xlu1 %2966 }
 0x100   :  { %v2973_v61 = vsel %vm2972_vm10, %v2957_v58, %v2959_v49  ;;  %v2977_v14 = vsel %vm2972_vm10, %v2965_v45, %v2967_v59  ;;  %v18604_v58 = vld [vmem:[%s20861_s0 + $0x28] sm:$0xff] }
 0x101   :  { %5250 = vrot.lane.b32.xlu0 %v18058_v7, %s17924_s27  ;;  %5252 = vrot.lane.b32.xlu1 %v18063_v8, %s17924_s27 }
 0x102   :  { %2991 = vmatpush1.msra.mxu0 %v2973_v61 }
 0x103   :  { %v2969_v62 = vpop.permute.xlu0 %2968  ;;  %v2971_v63 = vpop.permute.xlu1 %2970  ;;  %16285 = vmatmul.mubr.msk.f32.vlgmr.msra.gmra.mrb[2].mxu0 %vm99_vm1, %v16284_v51 }
 0x104   :  { %v2979_v11 = vsel %vm2972_vm10, %v2969_v62, %v2971_v63  ;;  %v2978_v12 = vsel %vm2972_vm10, %v2967_v59, %v2969_v62  ;;  %3196 = vmatprep.mubr.f32.mxu0 %v20876_v4  ;;  %v18616_v63 = vld [vmem:[%s20861_s0 + $0x30] sm:$0xff]  ;;  %vm5906_vm10 = vcmask 236544  }
 0x105   :  { %5570 = vrot.lane.b32.xlu0 %v18033_v3, %s17925_s21  ;;  %5572 = vrot.lane.b32.xlu1 %v18044_v5, %s17925_s21 }
 0x106   :  { %3132 = vmatprep.subr.mxu0 %v2978_v12  ;;  %16939 = vmatpush3.msra.mxu1 %v2979_v11  ;;  %v18623_v11 = vld [vmem:[%s20861_s0 + $0x38] sm:$0xff] }
 0x107   :  { %3133 = vmatpush1.msra.mxu0 %v2977_v14  ;;  %v3289_v15 = vpop.permute.xlu0 %3288  ;;  %v3291_v26 = vpop.permute.xlu1 %3290  ;;  %16941 = vmatmul.mubr.msk.f32.vlgmr.msra.gmra.mrb[22].mxu1 %vm99_vm1, %v16284_v51 }
 0x108   :  { %v3302_v27 = vsel %vm3298_vm11, %v3289_v15, %v3291_v26  ;;  %16287 = vmatmul.mubr.msk.f32.vlgmr.msra.gmra.mrb[0].mxu0 %vm99_vm1, %v16284_v51  ;;  %3451 = vmatprep.mubr.f32.mxu1 %v20876_v4 }
 0x109   :  { %5566 = vrot.lane.b32.xlu0 %v18014_v0, %s17925_s21  ;;  %5568 = vrot.lane.b32.xlu1 %v18028_v2, %s17925_s21 }
 0x10a   :  { %3387 = vmatprep.subr.mxu1 %v3302_v27  ;;  %3380 = vmatprep.mubr.f32.mxu0 %v20876_v4  ;;  %v18634_v27 = vld [vmem:[%s20861_s0 + $0x18] sm:$0xff] }
 0x10b   :  { %v3285_v28 = vpop.permute.xlu0 %3284  ;;  %v3287_v29 = vpop.permute.xlu1 %3286 }
 0x10c   :  { %v3300_v32 = vsel %vm3298_vm11, %v3285_v28, %v3287_v29  ;;  %v3301_v33 = vsel %vm3298_vm11, %v3287_v29, %v3289_v15 }
 0x10d   :  { %5564 = vrot.lane.b32.xlu0 %v18019_v1, %s17925_s21  ;;  %5574 = vrot.lane.b32.xlu1 %v18049_v6, %s17925_s21 }
 0x10e   :  { %3316 = vmatprep.subr.mxu0 %v3300_v32  ;;  %3388 = vmatpush1.msra.mxu1 %v3301_v33 }
 0x10f   :  { %v3283_v0 = vpop.permute.xlu0 %3282  ;;  %v3293_v2 = vpop.permute.xlu1 %3292  ;;  %16943 = vmatprep.subr.mxu1 %v20876_v4  ;;  %16291 = vmatmul.mubr.msk.f32.vlgmr.msra.gmra.mrb[2].mxu1 %vm99_vm1, %v16289_v34 }
 0x110   :  { %v3299_v36 = vsel %vm3298_vm11, %v3283_v0, %v3285_v28  ;;  %16945 = vmatprep.mubr.msk.f32.mxu1 %vm17916_vm2, %v20876_v4  ;;  %v18641_v28 = vld [vmem:[%s20861_s0 + $0x20] sm:$0xff] }
 0x111   :  { %5576 = vrot.lane.b32.xlu0 %v18058_v7, %s17925_s21  ;;  %5578 = vrot.lane.b32.xlu1 %v18063_v8, %s17925_s21  ;;  %v3303_v7 = vsel %vm3298_vm11, %v3291_v26, %v3293_v2  ;;  %s17932_s21 = smov 56  }
 0x112   :  { %3317 = vmatpush1.msra.mxu0 %v3299_v36 }
 0x113   :  { %v3295_v1 = vpop.permute.xlu0 %3294  ;;  %v3297_v6 = vpop.permute.xlu1 %3296  ;;  %16290 = vmatmul.mubr.msk.f32.vlgmr.msra.gmra.mrb[2].mxu0 %vm99_vm1, %v16289_v34 }
 0x114   :  { %v3305_v38 = vsel %vm3298_vm11, %v3295_v1, %v3297_v6  ;;  %v3304_v41 = vsel %vm3298_vm11, %v3293_v2, %v3295_v1  ;;  %3522 = vmatprep.mubr.f32.mxu0 %v20876_v4  ;;  %v16299_v6 = vld [vmem:[%s20862_s1 + $0x60] sm:$0xff] }
 0x115   :  { %5896 = vrot.lane.b32.xlu0 %v18033_v3, %s17926_s25  ;;  %5898 = vrot.lane.b32.xlu1 %v18044_v5, %s17926_s25  ;;  %v18580_v3 = vld [vmem:[%s20861_s0 + $0x8] sm:$0xff]  ;;  %v18587_v5 = vld [vmem:[%s20861_s0 + $0x10] sm:$0xff] }
 0x116   :  { %3458 = vmatprep.subr.mxu0 %v3304_v41  ;;  %16944 = vmatpush3.msra.mxu1 %v3305_v38 }
 0x117   :  { %3459 = vmatpush1.msra.mxu0 %v3303_v7  ;;  %v3615_v8 = vpop.permute.xlu0 %3614  ;;  %v3617_v42 = vpop.permute.xlu1 %3616  ;;  %16946 = vmatmul.mubr.msk.f32.vlgmr.msra.gmra.mrb[24].mxu1 %vm99_vm1, %v16289_v34 }
 0x118   :  { %v3628_v45 = vsel %vm3624_vm12, %v3615_v8, %v3617_v42  ;;  %16292 = vmatmul.mubr.msk.f32.vlgmr.msra.gmra.mrb[0].mxu0 %vm99_vm1, %v16289_v34  ;;  %3777 = vmatprep.mubr.f32.mxu1 %v20876_v4 }
 0x119   :  { %5892 = vrot.lane.b32.xlu0 %v18580_v3, %s17926_s25  ;;  %5894 = vrot.lane.b32.xlu1 %v18587_v5, %s17926_s25 }
 0x11a   :  { %3713 = vmatprep.subr.mxu1 %v3628_v45  ;;  %3706 = vmatprep.mubr.f32.mxu0 %v20876_v4 }
 0x11b   :  { %v3611_v46 = vpop.permute.xlu0 %3610  ;;  %v3613_v49 = vpop.permute.xlu1 %3612 }
 0x11c   :  { %v3626_v50 = vsel %vm3624_vm12, %v3611_v46, %v3613_v49  ;;  %v3627_v51 = vsel %vm3624_vm12, %v3613_v49, %v3615_v8  ;;  %v56_v8 = vld [vmem:[%s20861_s0 + $0x40] sm:$0xff] }
 0x11d   :  { %5890 = vrot.lane.b32.xlu0 %v17877_v53, %s17926_s25  ;;  %5900 = vrot.lane.b32.xlu1 %v18604_v58, %s17926_s25 }
 0x11e   :  { %3642 = vmatprep.subr.mxu0 %v3626_v50  ;;  %3714 = vmatpush1.msra.mxu1 %v3627_v51 }
 0x11f   :  { %v3609_v59 = vpop.permute.xlu0 %3608  ;;  %v3619_v61 = vpop.permute.xlu1 %3618  ;;  %16296 = vmatmul.mubr.msk.f32.vlgmr.msra.gmra.mrb[2].mxu1 %vm99_vm1, %v16294_v52  ;;  %16948 = vmatprep.subr.mxu1 %v20876_v4 }
 0x120   :  { %v3625_v62 = vsel %vm3624_vm12, %v3609_v59, %v3611_v46  ;;  %16950 = vmatprep.mubr.msk.f32.mxu1 %vm17916_vm2, %v20876_v4  ;;  %v3629_v29 = vsel %vm3624_vm12, %v3617_v42, %v3619_v61 }
 0x121   :  { %5902 = vrot.lane.b32.xlu0 %v18616_v63, %s17926_s25  ;;  %5904 = vrot.lane.b32.xlu1 %v18623_v11, %s17926_s25 }
 0x122   :  { %3643 = vmatpush1.msra.mxu0 %v3625_v62  ;;  %v16304_v62 = vld [vmem:[%s20862_s1 + $0x68] sm:$0xff] }
 0x123   :  { %v3621_v12 = vpop.permute.xlu0 %3620  ;;  %v3623_v14 = vpop.permute.xlu1 %3622  ;;  %16295 = vmatmul.mubr.msk.f32.vlgmr.msra.gmra.mrb[2].mxu0 %vm99_vm1, %v16294_v52 }
 0x124   :  { %v3631_v15 = vsel %vm3624_vm12, %v3621_v12, %v3623_v14  ;;  %v3630_v26 = vsel %vm3624_vm12, %v3619_v61, %v3621_v12  ;;  %3848 = vmatprep.mubr.f32.mxu0 %v20876_v4  ;;  %vm6232_vm12 = vcmask 228352  }
 0x125   :  { %6222 = vrot.lane.b32.xlu0 %v18634_v27, %s17927_s28  ;;  %6224 = vrot.lane.b32.xlu1 %v18641_v28, %s17927_s28 }
 0x126   :  { %3784 = vmatprep.subr.mxu0 %v3630_v26  ;;  %16949 = vmatpush3.msra.mxu1 %v3631_v15 }
 0x127   :  { %3785 = vmatpush1.msra.mxu0 %v3629_v29  ;;  %16951 = vmatmul.mubr.msk.f32.vlgmr.msra.gmra.mrb[26].mxu1 %vm99_vm1, %v16294_v52  ;;  %v3941_v32 = vpop.permute.xlu0 %3940  ;;  %v3943_v33 = vpop.permute.xlu1 %3942 }
 0x128   :  { %v3954_v34 = vsel %vm3950_vm13, %v3941_v32, %v3943_v33  ;;  %16297 = vmatmul.mubr.msk.f32.vlgmr.msra.gmra.mrb[0].mxu0 %vm99_vm1, %v16294_v52  ;;  %4103 = vmatprep.mubr.f32.mxu1 %v20876_v4 }
 0x129   :  { %6218 = vrot.lane.b32.xlu0 %v18580_v3, %s17927_s28  ;;  %6220 = vrot.lane.b32.xlu1 %v18587_v5, %s17927_s28 }
 0x12a   :  { %4039 = vmatprep.subr.mxu1 %v3954_v34  ;;  %4032 = vmatprep.mubr.f32.mxu0 %v20876_v4 }
 0x12b   :  { %v3937_v0 = vpop.permute.xlu0 %3936  ;;  %v3939_v2 = vpop.permute.xlu1 %3938 }
 0x12c   :  { %v3952_v36 = vsel %vm3950_vm13, %v3937_v0, %v3939_v2  ;;  %v3953_v1 = vsel %vm3950_vm13, %v3939_v2, %v3941_v32 }
 0x12d   :  { %6216 = vrot.lane.b32.xlu0 %v17877_v53, %s17927_s28  ;;  %6226 = vrot.lane.b32.xlu1 %v18604_v58, %s17927_s28 }
 0x12e   :  { %3968 = vmatprep.subr.mxu0 %v3952_v36  ;;  %4040 = vmatpush1.msra.mxu1 %v3953_v1 }
 0x12f   :  { %v3935_v38 = vpop.permute.xlu0 %3934  ;;  %v3945_v41 = vpop.permute.xlu1 %3944  ;;  %16301 = vmatmul.mubr.msk.f32.vlgmr.msra.gmra.mrb[2].mxu1 %vm99_vm1, %v16299_v6  ;;  %16953 = vmatprep.subr.mxu1 %v20876_v4 }
 0x130   :  { %v3951_v7 = vsel %vm3950_vm13, %v3935_v38, %v3937_v0  ;;  %16955 = vmatprep.mubr.msk.f32.mxu1 %vm17916_vm2, %v20876_v4  ;;  %v3955_v50 = vsel %vm3950_vm13, %v3943_v33, %v3945_v41 }
 0x131   :  { %6228 = vrot.lane.b32.xlu0 %v18616_v63, %s17927_s28  ;;  %6230 = vrot.lane.b32.xlu1 %v18623_v11, %s17927_s28  ;;  %s17935_s28 = smov [#allocation2]  }
 0x132   :  { %3969 = vmatpush1.msra.mxu0 %v3951_v7  ;;  %v16309_v7 = vld [vmem:[%s20862_s1 + $0x70] sm:$0xff] }
 0x133   :  { %v3947_v42 = vpop.permute.xlu0 %3946  ;;  %v3949_v45 = vpop.permute.xlu1 %3948  ;;  %16300 = vmatmul.mubr.msk.f32.vlgmr.msra.gmra.mrb[2].mxu0 %vm99_vm1, %v16299_v6 }
 0x134   :  { %v3957_v46 = vsel %vm3950_vm13, %v3947_v42, %v3949_v45  ;;  %v3956_v49 = vsel %vm3950_vm13, %v3945_v41, %v3947_v42  ;;  %4174 = vmatprep.mubr.f32.mxu0 %v20876_v4 }
 0x135   :  { %6838 = vrot.lane.b32.xlu0 %v56_v8, %s17907_s17  ;;  %7137 = vrot.lane.b32.xlu1 %v56_v8, %s17909_s30 }
 0x136   :  { %4110 = vmatprep.subr.mxu0 %v3956_v49  ;;  %16954 = vmatpush3.msra.mxu1 %v3957_v46 }
 0x137   :  { %4111 = vmatpush1.msra.mxu0 %v3955_v50  ;;  %16956 = vmatmul.mubr.msk.f32.vlgmr.msra.gmra.mrb[28].mxu1 %vm99_vm1, %v16299_v6  ;;  %v4267_v51 = vpop.permute.xlu0 %4266  ;;  %v4269_v52 = vpop.permute.xlu1 %4268 }
 0x138   :  { %v4280_v53 = vsel %vm4276_vm14, %v4267_v51, %v4269_v52  ;;  %16302 = vmatmul.mubr.msk.f32.vlgmr.msra.gmra.mrb[0].mxu0 %vm99_vm1, %v16299_v6  ;;  %4429 = vmatprep.mubr.f32.mxu1 %v20876_v4 }
 0x139   :  { %7436 = vrot.lane.b32.xlu0 %v56_v8, %s17910_s15  ;;  %7735 = vrot.lane.b32.xlu1 %v56_v8, %s17911_s16 }
 0x13a   :  { %4365 = vmatprep.subr.mxu1 %v4280_v53  ;;  %4358 = vmatprep.mubr.f32.mxu0 %v20876_v4 }
 0x13b   :  { %v4263_v59 = vpop.permute.xlu0 %4262  ;;  %v4265_v61 = vpop.permute.xlu1 %4264 }
 0x13c   :  { %v4278_v12 = vsel %vm4276_vm14, %v4263_v59, %v4265_v61  ;;  %v4279_v14 = vsel %vm4276_vm14, %v4265_v61, %v4267_v51 }
 0x13d   :  { %4294 = vmatprep.subr.mxu0 %v4278_v12  ;;  %4366 = vmatpush1.msra.mxu1 %v4279_v14 }
 0x13e   :  { %16306 = vmatmul.mubr.msk.f32.vlgmr.msra.gmra.mrb[2].mxu1 %vm99_vm1, %v16304_v62  ;;  %16958 = vmatprep.subr.mxu1 %v20876_v4 }
 0x13f   :  { %v4261_v15 = vpop.permute.xlu0 %4260  ;;  %v4271_v26 = vpop.permute.xlu1 %4270  ;;  %16960 = vmatprep.mubr.msk.f32.mxu1 %vm17916_vm2, %v20876_v4 }
 0x140   :  { %v4277_v29 = vsel %vm4276_vm14, %v4261_v15, %v4263_v59  ;;  %v4281_v2 = vsel %vm4276_vm14, %v4269_v52, %v4271_v26 }
 0x141   :  { %4295 = vmatpush1.msra.mxu0 %v4277_v29 }
 0x142   :  { %16305 = vmatmul.mubr.msk.f32.vlgmr.msra.gmra.mrb[2].mxu0 %vm99_vm1, %v16304_v62 }
 0x143   :  { %v4273_v32 = vpop.permute.xlu0 %4272  ;;  %v4275_v33 = vpop.permute.xlu1 %4274  ;;  %4500 = vmatprep.mubr.f32.mxu0 %v20876_v4 }
 0x144   :  { %v4283_v34 = vsel %vm4276_vm14, %v4273_v32, %v4275_v33  ;;  %v4282_v0 = vsel %vm4276_vm14, %v4271_v26, %v4273_v32  ;;  %vm10533_vm14 = vcmask 457728  }
 0x145   :  { %4436 = vmatprep.subr.mxu0 %v4282_v0  ;;  %16959 = vmatpush3.msra.mxu1 %v4283_v34  ;;  %v16314_v34 = vld [vmem:[%s20862_s1 + $0x78] sm:$0xff] }
 0x146   :  { %4437 = vmatpush1.msra.mxu0 %v4281_v2  ;;  %16961 = vmatmul.mubr.msk.f32.vlgmr.msra.gmra.mrb[30].mxu1 %vm99_vm1, %v16304_v62 }
 0x147   :  { %v4593_v36 = vpop.permute.xlu0 %4592  ;;  %v4595_v1 = vpop.permute.xlu1 %4594  ;;  %16307 = vmatmul.mubr.msk.f32.vlgmr.msra.gmra.mrb[0].mxu0 %vm99_vm1, %v16304_v62  ;;  %4755 = vmatprep.mubr.f32.mxu1 %v20876_v4 }
 0x148   :  { %v4606_v6 = vsel %vm4602_vm15, %v4593_v36, %v4595_v1  ;;  %4684 = vmatprep.mubr.f32.mxu0 %v20876_v4 }
 0x149   :  { %4691 = vmatprep.subr.mxu1 %v4606_v6 }
 0x14b   :  { %v4589_v38 = vpop.permute.xlu0 %4588  ;;  %v4591_v41 = vpop.permute.xlu1 %4590 }
 0x14c   :  { %v4604_v8 = vsel %vm4602_vm15, %v4589_v38, %v4591_v41  ;;  %v4605_v42 = vsel %vm4602_vm15, %v4591_v41, %v4593_v36 }
 0x14d   :  { %4620 = vmatprep.subr.mxu0 %v4604_v8  ;;  %4692 = vmatpush1.msra.mxu1 %v4605_v42 }
 0x14e   :  { %16311 = vmatmul.mubr.msk.f32.vlgmr.msra.gmra.mrb[2].mxu1 %vm99_vm1, %v16309_v7  ;;  %16963 = vmatprep.subr.mxu1 %v20876_v4 }
 0x14f   :  { %v4587_v45 = vpop.permute.xlu0 %4586  ;;  %v4597_v46 = vpop.permute.xlu1 %4596  ;;  %16965 = vmatprep.mubr.msk.f32.mxu1 %vm17916_vm2, %v20876_v4 }
 0x150   :  { %v4603_v49 = vsel %vm4602_vm15, %v4587_v45, %v4589_v38  ;;  %v18719_v50 = vpop.f32.mrb[0].mxu1  ;;  %v4607_v62 = vsel %vm4602_vm15, %v4595_v1, %v4597_v46 }
 0x151   :  { %4621 = vmatpush1.msra.mxu0 %v4603_v49  ;;  %v18721_v51 = vpop.f32.mrb[1].mxu1 }
 0x152   :  { %16310 = vmatmul.mubr.msk.f32.vlgmr.msra.gmra.mrb[2].mxu0 %vm99_vm1, %v16309_v7 }
 0x153   :  { %v4599_v52 = vpop.permute.xlu0 %4598  ;;  %v4601_v53 = vpop.permute.xlu1 %4600  ;;  %4826 = vmatprep.mubr.f32.mxu0 %v20876_v4 }
 0x154   :  { %v4609_v59 = vsel %vm4602_vm15, %v4599_v52, %v4601_v53  ;;  %v4608_v61 = vsel %vm4602_vm15, %v4597_v46, %v4599_v52 }
 0x155   :  { %4762 = vmatprep.subr.mxu0 %v4608_v61  ;;  %16964 = vmatpush3.msra.mxu1 %v4609_v59 }
 0x156   :  { %4763 = vmatpush1.msra.mxu0 %v4607_v62  ;;  %16966 = vmatmul.mubr.msk.f32.vlgmr.msra.gmra.mrb[32].mxu1 %vm99_vm1, %v16309_v7 }
 0x157   :  { %v4919_v12 = vpop.permute.xlu0 %4918  ;;  %v4921_v14 = vpop.permute.xlu1 %4920  ;;  %16312 = vmatmul.mubr.msk.f32.vlgmr.msra.gmra.mrb[0].mxu0 %vm99_vm1, %v16309_v7  ;;  %5081 = vmatprep.mubr.f32.mxu1 %v20876_v4 }
 0x158   :  { %v4932_v15 = vsel %vm4928_vm7, %v4919_v12, %v4921_v14  ;;  %5010 = vmatprep.mubr.f32.mxu0 %v20876_v4  ;;  %v382_v26 = vpop.f32.mrb[4].mxu1 }
 0x159   :  { %5017 = vmatprep.subr.mxu1 %v4932_v15  ;;  %v16897_v29 = vpop.f32.mrb[5].mxu1 }
 0x15b   :  { %v4915_v32 = vpop.permute.xlu0 %4914  ;;  %v4917_v33 = vpop.permute.xlu1 %4916 }
 0x15c   :  { %v4930_v0 = vsel %vm4928_vm7, %v4915_v32, %v4917_v33  ;;  %v4931_v2 = vsel %vm4928_vm7, %v4917_v33, %v4919_v12  ;;  %v16319_v12 = vld [vmem:[%s20862_s1 + $0x80] sm:$0xff] }
 0x15d   :  { %4946 = vmatprep.subr.mxu0 %v4930_v0  ;;  %5018 = vmatpush1.msra.mxu1 %v4931_v2 }
 0x15e   :  { %16316 = vmatmul.mubr.msk.f32.vlgmr.msra.gmra.mrb[2].mxu1 %vm99_vm1, %v16314_v34  ;;  %16968 = vmatprep.subr.mxu1 %v20876_v4 }
 0x15f   :  { %v4913_v36 = vpop.permute.xlu0 %4912  ;;  %v4923_v1 = vpop.permute.xlu1 %4922  ;;  %16970 = vmatprep.mubr.msk.f32.mxu1 %vm17916_vm2, %v20876_v4 }
 0x160   :  { %v4929_v6 = vsel %vm4928_vm7, %v4913_v36, %v4915_v32  ;;  %v4933_v49 = vsel %vm4928_vm7, %v4921_v14, %v4923_v1 }
 0x161   :  { %4947 = vmatpush1.msra.mxu0 %v4929_v6 }
 0x162   :  { %16315 = vmatmul.mubr.msk.f32.vlgmr.msra.gmra.mrb[2].mxu0 %vm99_vm1, %v16314_v34  ;;  %v668_v38 = vpop.f32.mrb[6].mxu1 }
 0x163   :  { %v4925_v41 = vpop.permute.xlu0 %4924  ;;  %v4927_v7 = vpop.permute.xlu1 %4926  ;;  %5152 = vmatprep.mubr.f32.mxu0 %v20876_v4  ;;  %v669_v8 = vadd.f32 %v668_v38, %v382_v26 }
 0x164   :  { %v4935_v42 = vsel %vm4928_vm7, %v4925_v41, %v4927_v7  ;;  %v4934_v45 = vsel %vm4928_vm7, %v4923_v1, %v4925_v41  ;;  %v16902_v46 = vpop.f32.mrb[7].mxu1 }
 0x165   :  { %5088 = vmatprep.subr.mxu0 %v4934_v45  ;;  %16969 = vmatpush3.msra.mxu1 %v4935_v42 }
 0x166   :  { %5089 = vmatpush1.msra.mxu0 %v4933_v49  ;;  %16971 = vmatmul.mubr.msk.f32.vlgmr.msra.gmra.mrb[34].mxu1 %vm99_vm1, %v16314_v34 }
 0x167   :  { %v5245_v52 = vpop.permute.xlu0 %5244  ;;  %v5247_v53 = vpop.permute.xlu1 %5246  ;;  %16317 = vmatmul.mubr.msk.f32.vlgmr.msra.gmra.mrb[0].mxu0 %vm99_vm1, %v16314_v34  ;;  %5407 = vmatprep.mubr.f32.mxu1 %v20876_v4 }
 0x168   :  { %v5258_v59 = vsel %vm5254_vm8, %v5245_v52, %v5247_v53  ;;  %5336 = vmatprep.mubr.f32.mxu0 %v20876_v4 }
 0x169   :  { %5343 = vmatprep.subr.mxu1 %v5258_v59 }
 0x16b   :  { %v5241_v61 = vpop.permute.xlu0 %5240  ;;  %v5243_v62 = vpop.permute.xlu1 %5242 }
 0x16c   :  { %v5256_v14 = vsel %vm5254_vm8, %v5241_v61, %v5243_v62  ;;  %v5257_v15 = vsel %vm5254_vm8, %v5243_v62, %v5245_v52 }
 0x16d   :  { %5272 = vmatprep.subr.mxu0 %v5256_v14  ;;  %5344 = vmatpush1.msra.mxu1 %v5257_v15  ;;  %v987_v26 = vpop.f32.mrb[8].mxu1 }
 0x16e   :  { %16321 = vmatmul.mubr.msk.f32.vlgmr.msra.gmra.mrb[2].mxu1 %vm99_vm1, %v16319_v12  ;;  %16973 = vmatprep.subr.mxu1 %v20876_v4  ;;  %v997_v29 = vadd.f32 %v987_v26, %v669_v8  ;;  %v16907_v32 = vpop.f32.mrb[9].mxu1 }
 0x16f   :  { %v5239_v33 = vpop.permute.xlu0 %5238  ;;  %v5249_v34 = vpop.permute.xlu1 %5248  ;;  %16975 = vmatprep.mubr.msk.f32.mxu1 %vm17916_vm2, %v20876_v4 }
 0x170   :  { %v5255_v0 = vsel %vm5254_vm8, %v5239_v33, %v5241_v61  ;;  %v5259_v38 = vsel %vm5254_vm8, %v5247_v53, %v5249_v34  ;;  %v16324_v53 = vld [vmem:[%s20862_s1 + $0x88] sm:$0xff] }
 0x171   :  { %5273 = vmatpush1.msra.mxu0 %v5255_v0 }
 0x172   :  { %16320 = vmatmul.mubr.msk.f32.vlgmr.msra.gmra.mrb[2].mxu0 %vm99_vm1, %v16319_v12 }
 0x173   :  { %v5251_v2 = vpop.permute.xlu0 %5250  ;;  %v5253_v36 = vpop.permute.xlu1 %5252  ;;  %5478 = vmatprep.mubr.f32.mxu0 %v20876_v4 }
 0x174   :  { %v5261_v1 = vsel %vm5254_vm8, %v5251_v2, %v5253_v36  ;;  %v5260_v6 = vsel %vm5254_vm8, %v5249_v34, %v5251_v2  ;;  %vm15126_vm8 = vcmask 203776  }
 0x175   :  { %5414 = vmatprep.subr.mxu0 %v5260_v6  ;;  %16974 = vmatpush3.msra.mxu1 %v5261_v1 }
 0x176   :  { %5415 = vmatpush1.msra.mxu0 %v5259_v38  ;;  %16976 = vmatmul.mubr.msk.f32.vlgmr.msra.gmra.mrb[36].mxu1 %vm99_vm1, %v16319_v12  ;;  %v1313_v41 = vpop.f32.mrb[10].mxu1 }
 0x177   :  { %v5571_v7 = vpop.permute.xlu0 %5570  ;;  %v5573_v8 = vpop.permute.xlu1 %5572  ;;  %16322 = vmatmul.mubr.msk.f32.vlgmr.msra.gmra.mrb[0].mxu0 %vm99_vm1, %v16319_v12  ;;  %5733 = vmatprep.mubr.f32.mxu1 %v20876_v4  ;;  %v1323_v42 = vadd.f32 %v1313_v41, %v997_v29 }
 0x178   :  { %v5584_v45 = vsel %vm5580_vm9, %v5571_v7, %v5573_v8  ;;  %5662 = vmatprep.mubr.f32.mxu0 %v20876_v4  ;;  %v16912_v46 = vpop.f32.mrb[11].mxu1 }
 0x179   :  { %5669 = vmatprep.subr.mxu1 %v5584_v45 }
 0x17b   :  { %v5567_v49 = vpop.permute.xlu0 %5566  ;;  %v5569_v52 = vpop.permute.xlu1 %5568 }
 0x17c   :  { %v5582_v59 = vsel %vm5580_vm9, %v5567_v49, %v5569_v52  ;;  %v5583_v61 = vsel %vm5580_vm9, %v5569_v52, %v5571_v7  ;;  %v16329_v7 = vld [vmem:[%s20862_s1 + $0x90] sm:$0xff] }
 0x17d   :  { %5598 = vmatprep.subr.mxu0 %v5582_v59  ;;  %5670 = vmatpush1.msra.mxu1 %v5583_v61 }
 0x17e   :  { %16326 = vmatmul.mubr.msk.f32.vlgmr.msra.gmra.mrb[2].mxu1 %vm99_vm1, %v16324_v53  ;;  %16978 = vmatprep.subr.mxu1 %v20876_v4 }
 0x17f   :  { %v5565_v62 = vpop.permute.xlu0 %5564  ;;  %v5575_v12 = vpop.permute.xlu1 %5574  ;;  %16980 = vmatprep.mubr.msk.f32.mxu1 %vm17916_vm2, %v20876_v4 }
 0x180   :  { %v5581_v14 = vsel %vm5580_vm9, %v5565_v62, %v5567_v49  ;;  %v5585_v33 = vsel %vm5580_vm9, %v5573_v8, %v5575_v12 }
 0x181   :  { %5599 = vmatpush1.msra.mxu0 %v5581_v14 }
 0x182   :  { %16325 = vmatmul.mubr.msk.f32.vlgmr.msra.gmra.mrb[2].mxu0 %vm99_vm1, %v16324_v53 }
 0x183   :  { %v5577_v15 = vpop.permute.xlu0 %5576  ;;  %v5579_v26 = vpop.permute.xlu1 %5578  ;;  %5804 = vmatprep.mubr.f32.mxu0 %v20876_v4 }
 0x184   :  { %v5587_v29 = vsel %vm5580_vm9, %v5577_v15, %v5579_v26  ;;  %v5586_v32 = vsel %vm5580_vm9, %v5575_v12, %v5577_v15  ;;  %vm16057_vm9 = vcmask 588800  }
 0x185   :  { %5740 = vmatprep.subr.mxu0 %v5586_v32  ;;  %16979 = vmatpush3.msra.mxu1 %v5587_v29 }
 0x186   :  { %5741 = vmatpush1.msra.mxu0 %v5585_v33  ;;  %16981 = vmatmul.mubr.msk.f32.vlgmr.msra.gmra.mrb[38].mxu1 %vm99_vm1, %v16324_v53  ;;  %v1639_v34 = vpop.f32.mrb[12].mxu1  ;;  %v8032_v33 = vld [vmem:[%s20863_s2] sm:$0xff]  ;;  %s17931_s2 = smov 58  }
 0x187   :  { %v5897_v0 = vpop.permute.xlu0 %5896  ;;  %v5899_v2 = vpop.permute.xlu1 %5898  ;;  %16327 = vmatmul.mubr.msk.f32.vlgmr.msra.gmra.mrb[0].mxu0 %vm99_vm1, %v16324_v53  ;;  %6059 = vmatprep.mubr.f32.mxu1 %v20876_v4  ;;  %v1649_v36 = vadd.f32 %v1639_v34, %v1323_v42 }
 0x188   :  { %v5910_v1 = vsel %vm5906_vm10, %v5897_v0, %v5899_v2  ;;  %5988 = vmatprep.mubr.f32.mxu0 %v20876_v4  ;;  %v16917_v6 = vpop.f32.mrb[13].mxu1 }
 0x189   :  { %5995 = vmatprep.subr.mxu1 %v5910_v1  ;;  %v17928_v1 = vmov 0  }
 0x18a   :  { %17838 = vset.pattern.permute.xlu0 %v17928_v1  ;;  %17839 = vset.pattern.permute.xlu1 %v17928_v1 }
 0x18b   :  { %v5893_v38 = vpop.permute.xlu0 %5892  ;;  %v5895_v41 = vpop.permute.xlu1 %5894  ;;  %8035 = vperm.xlu0 %17838, %v8032_v33  }
 0x18c   :  { %v5908_v8 = vsel %vm5906_vm10, %v5893_v38, %v5895_v41  ;;  %v5909_v45 = vsel %vm5906_vm10, %v5895_v41, %v5897_v0 }
 0x18d   :  { %5924 = vmatprep.subr.mxu0 %v5908_v8  ;;  %5996 = vmatpush1.msra.mxu1 %v5909_v45 }
 0x18e   :  { %16331 = vmatmul.mubr.msk.f32.vlgmr.msra.gmra.mrb[2].mxu1 %vm99_vm1, %v16329_v7  ;;  %16983 = vmatprep.subr.mxu1 %v20876_v4 }
 0x18f   :  { %v5891_v42 = vpop.permute.xlu0 %5890  ;;  %v5901_v46 = vpop.permute.xlu1 %5900  ;;  %16985 = vmatprep.mubr.msk.f32.mxu1 %vm17916_vm2, %v20876_v4 }
 0x190   :  { %v5907_v49 = vsel %vm5906_vm10, %v5891_v42, %v5893_v38  ;;  %v5911_v62 = vsel %vm5906_vm10, %v5899_v2, %v5901_v46  ;;  %v16334_v2 = vld [vmem:[%s20862_s1 + $0x98] sm:$0xff] }
 0x191   :  { %5925 = vmatpush1.msra.mxu0 %v5907_v49 }
 0x192   :  { %16330 = vmatmul.mubr.msk.f32.vlgmr.msra.gmra.mrb[2].mxu0 %vm99_vm1, %v16329_v7 }
 0x193   :  { %v5903_v52 = vpop.permute.xlu0 %5902  ;;  %v5905_v53 = vpop.permute.xlu1 %5904  ;;  %6130 = vmatprep.mubr.f32.mxu0 %v20876_v4 }
 0x194   :  { %v5913_v59 = vsel %vm5906_vm10, %v5903_v52, %v5905_v53  ;;  %v5912_v61 = vsel %vm5906_vm10, %v5901_v46, %v5903_v52  ;;  %vm16146_vm10 = vcmask 818176  }
 0x195   :  { %6066 = vmatprep.subr.mxu0 %v5912_v61  ;;  %16984 = vmatpush3.msra.mxu1 %v5913_v59  ;;  %v16339_v59 = vld [vmem:[%s20862_s1 + $0xa0] sm:$0xff] }
 0x196   :  { %6067 = vmatpush1.msra.mxu0 %v5911_v62  ;;  %16986 = vmatmul.mubr.msk.f32.vlgmr.msra.gmra.mrb[40].mxu1 %vm99_vm1, %v16329_v7  ;;  %v1965_v12 = vpop.f32.mrb[14].mxu1 }
 0x197   :  { %v6223_v14 = vpop.permute.xlu0 %6222  ;;  %v6225_v15 = vpop.permute.xlu1 %6224  ;;  %16332 = vmatmul.mubr.msk.f32.vlgmr.msra.gmra.mrb[0].mxu0 %vm99_vm1, %v16329_v7  ;;  %6385 = vmatprep.mubr.f32.mxu1 %v20876_v4  ;;  %v1975_v26 = vadd.f32 %v1965_v12, %v1649_v36 }
 0x198   :  { %v6236_v29 = vsel %vm6232_vm12, %v6223_v14, %v6225_v15  ;;  %6314 = vmatprep.mubr.f32.mxu0 %v20876_v4  ;;  %v16922_v32 = vpop.f32.mrb[15].mxu1 }
 0x199   :  { %6321 = vmatprep.subr.mxu1 %v6236_v29 }
 0x19b   :  { %v6219_v34 = vpop.permute.xlu0 %6218  ;;  %v6221_v0 = vpop.permute.xlu1 %6220 }
 0x19c   :  { %v6234_v36 = vsel %vm6232_vm12, %v6219_v34, %v6221_v0  ;;  %v6235_v6 = vsel %vm6232_vm12, %v6221_v0, %v6223_v14 }
 0x19d   :  { %6250 = vmatprep.subr.mxu0 %v6234_v36  ;;  %6322 = vmatpush1.msra.mxu1 %v6235_v6 }
 0x19e   :  { %16336 = vmatmul.mubr.msk.f32.vlgmr.msra.gmra.mrb[2].mxu1 %vm99_vm1, %v16334_v2  ;;  %16988 = vmatprep.subr.mxu1 %v20876_v4 }
 0x19f   :  { %v6217_v38 = vpop.permute.xlu0 %6216  ;;  %v6227_v41 = vpop.permute.xlu1 %6226  ;;  %16990 = vmatprep.mubr.msk.f32.mxu1 %vm17916_vm2, %v20876_v4 }
 0x1a0   :  { %v6233_v7 = vsel %vm6232_vm12, %v6217_v38, %v6219_v34  ;;  %v6237_v49 = vsel %vm6232_vm12, %v6225_v15, %v6227_v41 }
 0x1a1   :  { %6251 = vmatpush1.msra.mxu0 %v6233_v7 }
 0x1a2   :  { %16335 = vmatmul.mubr.msk.f32.vlgmr.msra.gmra.mrb[2].mxu0 %vm99_vm1, %v16334_v2 }
 0x1a3   :  { %v6229_v8 = vpop.permute.xlu0 %6228  ;;  %v6231_v45 = vpop.permute.xlu1 %6230  ;;  %6456 = vmatprep.mubr.f32.mxu0 %v20876_v4 }
 0x1a4   :  { %v6239_v42 = vsel %vm6232_vm12, %v6229_v8, %v6231_v45  ;;  %v6238_v46 = vsel %vm6232_vm12, %v6227_v41, %v6229_v8  ;;  %vm16224_vm12 = vcmask 24576  }
 0x1a5   :  { %6392 = vmatprep.subr.mxu0 %v6238_v46  ;;  %16989 = vmatpush3.msra.mxu1 %v6239_v42 }
 0x1a6   :  { %6393 = vmatpush1.msra.mxu0 %v6237_v49  ;;  %16991 = vmatmul.mubr.msk.f32.vlgmr.msra.gmra.mrb[42].mxu1 %vm99_vm1, %v16334_v2  ;;  %v2291_v52 = vpop.f32.mrb[16].mxu1 }
 0x1a7   :  { %16337 = vmatmul.mubr.msk.f32.vlgmr.msra.gmra.mrb[0].mxu0 %vm99_vm1, %v16334_v2  ;;  %6616 = vmatprep.subr.mxu1 %v18641_v28  ;;  %v2301_v53 = vadd.f32 %v2291_v52, %v1975_v26  ;;  %v16927_v61 = vpop.f32.mrb[17].mxu1 }
 0x1a8   :  { %6545 = vmatprep.subr.mxu0 %v18587_v5  ;;  %6617 = vmatpush1.msra.mxu1 %v18634_v27  ;;  %v16344_v5 = vld [vmem:[%s20862_s1 + $0xa8] sm:$0xff] }
 0x1a9   :  { %6546 = vmatpush1.msra.mxu0 %v18580_v3  ;;  %6680 = vmatprep.mubr.f32.mxu1 %v20876_v4  ;;  %v6839_v3 = vpop.permute.xlu0 %6838 }
 0x1aa   :  { %16993 = vmatprep.subr.mxu1 %v20876_v4  ;;  %6609 = vmatprep.mubr.f32.mxu0 %v20876_v4 }
 0x1ab   :  { %16341 = vmatmul.mubr.msk.f32.vlgmr.msra.gmra.mrb[2].mxu1 %vm99_vm1, %v16339_v59  ;;  %6687 = vmatprep.subr.mxu0 %v18616_v63 }
 0x1ac   :  { %16994 = vmatpush3.msra.mxu1 %v18623_v11  ;;  %16340 = vmatmul.mubr.msk.f32.vlgmr.msra.gmra.mrb[2].mxu0 %vm99_vm1, %v16339_v59 }
 0x1ad   :  { %6688 = vmatpush1.msra.mxu0 %v18604_v58  ;;  %6916 = vmatprep.subr.mxu1 %v18195_v24 }
 0x1ae   :  { %6845 = vmatprep.subr.mxu0 %v18171_v19  ;;  %16995 = vmatprep.mubr.msk.f32.mxu1 %vm17916_vm2, %v20876_v4  ;;  %v6840_v19 = vsel %vm84_vm0, %v18176_v21, %v6839_v3 }
 0x1af   :  { %6751 = vmatprep.mubr.f32.mxu0 %v20876_v4  ;;  %16996 = vmatmul.mubr.msk.f32.vlgmr.msra.gmra.mrb[44].mxu1 %vm99_vm1, %v16339_v59 }
 0x1b0   :  { %6917 = vmatpush1.msra.mxu1 %v18165_v18  ;;  %16342 = vmatmul.mubr.msk.f32.vlgmr.msra.gmra.mrb[0].mxu0 %vm99_vm1, %v16339_v59 }
 0x1b1   :  { %6846 = vmatpush1.msra.mxu0 %v18154_v13  ;;  %6980 = vmatprep.mubr.f32.mxu1 %v20876_v4 }
 0x1b2   :  { %6987 = vmatprep.subr.mxu0 %v18184_v23  ;;  %16998 = vmatprep.subr.mxu1 %v20876_v4  ;;  %v7138_v23 = vpop.permute.xlu1 %7137 }
 0x1b3   :  { %6909 = vmatprep.mubr.f32.mxu0 %v20876_v4  ;;  %16346 = vmatmul.mubr.msk.f32.vlgmr.msra.gmra.mrb[2].mxu1 %vm99_vm1, %v16344_v5  ;;  %v7139_v24 = vsel %vm690_vm3, %v18241_v37, %v7138_v23 }
 0x1b4   :  { %16999 = vmatpush3.msra.mxu1 %v6840_v19  ;;  %16345 = vmatmul.mubr.msk.f32.vlgmr.msra.gmra.mrb[2].mxu0 %vm99_vm1, %v16344_v5 }
 0x1b5   :  { %6988 = vmatpush1.msra.mxu0 %v18180_v22  ;;  %7215 = vmatprep.subr.mxu1 %v18272_v44  ;;  %v16349_v22 = vld [vmem:[%s20862_s1 + $0xb0] sm:$0xff] }
 0x1b6   :  { %7144 = vmatprep.subr.mxu0 %v18236_v35  ;;  %17000 = vmatprep.mubr.msk.f32.mxu1 %vm17916_vm2, %v20876_v4  ;;  %v2617_v13 = vpop.f32.mrb[18].mxu1 }
 0x1b7   :  { %7051 = vmatprep.mubr.f32.mxu0 %v20876_v4  ;;  %17001 = vmatmul.mubr.msk.f32.vlgmr.msra.gmra.mrb[46].mxu1 %vm99_vm1, %v16344_v5  ;;  %v2627_v18 = vadd.f32 %v2617_v13, %v2301_v53  ;;  %v16932_v21 = vpop.f32.mrb[19].mxu1 }
 0x1b8   :  { %7216 = vmatpush1.msra.mxu1 %v18219_v30  ;;  %16347 = vmatmul.mubr.msk.f32.vlgmr.msra.gmra.mrb[0].mxu0 %vm99_vm1, %v16344_v5  ;;  %v7437_v30 = vpop.permute.xlu0 %7436 }
 0x1b9   :  { %7145 = vmatpush1.msra.mxu0 %v18222_v31  ;;  %7279 = vmatprep.mubr.f32.mxu1 %v20876_v4  ;;  %v16354_v31 = vld [vmem:[%s20862_s1 + $0xb8] sm:$0xff]  ;;  %v7438_v35 = vsel %vm1016_vm4, %v18306_v54, %v7437_v30  ;;  %vm9181_vm4 = vcmask 982016  }
 0x1ba   :  { %7286 = vmatprep.subr.mxu0 %v18258_v40  ;;  %17003 = vmatprep.subr.mxu1 %v20876_v4  ;;  %v16359_v40 = vld [vmem:[%s20862_s1 + $0xc0] sm:$0xff] }
 0x1bb   :  { %7208 = vmatprep.mubr.f32.mxu0 %v20876_v4  ;;  %16351 = vmatmul.mubr.msk.f32.vlgmr.msra.gmra.mrb[2].mxu1 %vm99_vm1, %v16349_v22 }
 0x1bc   :  { %17004 = vmatpush3.msra.mxu1 %v7139_v24  ;;  %16350 = vmatmul.mubr.msk.f32.vlgmr.msra.gmra.mrb[2].mxu0 %vm99_vm1, %v16349_v22 }
 0x1bd   :  { %7287 = vmatpush1.msra.mxu0 %v18251_v39  ;;  %7514 = vmatprep.subr.mxu1 %v18325_v57  ;;  %v7736_v39 = vpop.permute.xlu1 %7735 }
 0x1be   :  { %7443 = vmatprep.subr.mxu0 %v18287_v48  ;;  %17005 = vmatprep.mubr.msk.f32.mxu1 %vm17916_vm2, %v20876_v4 }
 0x1bf   :  { %7350 = vmatprep.mubr.f32.mxu0 %v20876_v4  ;;  %17006 = vmatmul.mubr.msk.f32.vlgmr.msra.gmra.mrb[48].mxu1 %vm99_vm1, %v16349_v22 }
 0x1c0   :  { %7515 = vmatpush1.msra.mxu1 %v18267_v43  ;;  %16352 = vmatmul.mubr.msk.f32.vlgmr.msra.gmra.mrb[0].mxu0 %vm99_vm1, %v16349_v22 }
 0x1c1   :  { %7444 = vmatpush1.msra.mxu0 %v18284_v47  ;;  %7578 = vmatprep.mubr.f32.mxu1 %v20876_v4  ;;  %v7737_v47 = vsel %vm1342_vm5, %v18359_v16, %v7736_v39 }
 0x1c2   :  { %7585 = vmatprep.subr.mxu0 %v18320_v56  ;;  %17008 = vmatprep.subr.mxu1 %v20876_v4 }
 0x1c3   :  { %7507 = vmatprep.mubr.f32.mxu0 %v20876_v4  ;;  %16356 = vmatmul.mubr.msk.f32.vlgmr.msra.gmra.mrb[2].mxu1 %vm99_vm1, %v16354_v31 }
 0x1c4   :  { %17009 = vmatpush3.msra.mxu1 %v7438_v35  ;;  %16355 = vmatmul.mubr.msk.f32.vlgmr.msra.gmra.mrb[2].mxu0 %vm99_vm1, %v16354_v31 }
 0x1c5   :  { %7586 = vmatpush1.msra.mxu0 %v18316_v55  ;;  %7813 = vmatprep.subr.mxu1 %v18374_v25 }
 0x1c6   :  { %7742 = vmatprep.subr.mxu0 %v18347_v10  ;;  %17010 = vmatprep.mubr.msk.f32.mxu1 %vm17916_vm2, %v20876_v4 }
 0x1c7   :  { %7649 = vmatprep.mubr.f32.mxu0 %v20876_v4  ;;  %17011 = vmatmul.mubr.msk.f32.vlgmr.msra.gmra.mrb[50].mxu1 %vm99_vm1, %v16354_v31  ;;  %v2943_v37 = vpop.f32.mrb[20].mxu1 }
 0x1c8   :  { %7814 = vmatpush1.msra.mxu1 %v18334_v60  ;;  %16357 = vmatmul.mubr.msk.f32.vlgmr.msra.gmra.mrb[0].mxu0 %vm99_vm1, %v16354_v31  ;;  %v2953_v43 = vadd.f32 %v2943_v37, %v2627_v18  ;;  %v16937_v44 = vpop.f32.mrb[21].mxu1 }
 0x1c9   :  { %7743 = vmatpush1.msra.mxu0 %v18344_v9  ;;  %7877 = vmatprep.mubr.f32.mxu1 %v20876_v4 }
 0x1ca   :  { %7884 = vmatprep.subr.mxu0 %v18369_v20  ;;  %17013 = vmatprep.subr.mxu1 %v20876_v4 }
 0x1cb   :  { %7806 = vmatprep.mubr.f32.mxu0 %v20876_v4  ;;  %16361 = vmatmul.mubr.msk.f32.vlgmr.msra.gmra.mrb[2].mxu1 %vm99_vm1, %v16359_v40 }
 0x1cc   :  { %17014 = vmatpush3.msra.mxu1 %v7737_v47  ;;  %16360 = vmatmul.mubr.msk.f32.vlgmr.msra.gmra.mrb[2].mxu0 %vm99_vm1, %v16359_v40 }
 0x1cd   :  { %7885 = vmatpush1.msra.mxu0 %v18365_v17  ;;  %17015 = vmatprep.mubr.msk.f32.mxu1 %vm17916_vm2, %v20876_v4 }
 0x1ce   :  { %7948 = vmatprep.mubr.f32.mxu0 %v20876_v4 }
 0x1cf   :  { %17016 = vmatmul.mubr.msk.f32.vlgmr.msra.gmra.mrb[52].mxu1 %vm99_vm1, %v16359_v40 }
 0x1d0   :  { %16362 = vmatmul.mubr.msk.f32.vlgmr.msra.gmra.mrb[0].mxu0 %vm99_vm1, %v16359_v40  ;;  %8233 = vmatprep.mubr.f32.mxu1 %v20876_v4 }
 0x1da   :  { %v3269_v48 = vpop.f32.mrb[22].mxu1 }
 0x1db   :  { %v3279_v54 = vadd.f32 %v3269_v48, %v2953_v43  ;;  %v16942_v55 = vpop.f32.mrb[23].mxu1 }
 0x1ea   :  { %v3595_v56 = vpop.f32.mrb[24].mxu1 }
 0x1eb   :  { %v3605_v57 = vadd.f32 %v3595_v56, %v3279_v54  ;;  %v16947_v60 = vpop.f32.mrb[25].mxu1 }
 0x1fa   :  { %v3921_v9 = vpop.f32.mrb[26].mxu1 }
 0x1fb   :  { %v3931_v10 = vadd.f32 %v3921_v9, %v3605_v57  ;;  %v16952_v16 = vpop.f32.mrb[27].mxu1 }
 0x20a   :  { %v4247_v17 = vpop.f32.mrb[28].mxu1  ;;  %v8036_v24 = vpop.permute.xlu0 %8035 }
 0x20b   :  { %v4257_v20 = vadd.f32 %v4247_v17, %v3931_v10  ;;  %v16957_v25 = vpop.f32.mrb[29].mxu1 }
 0x219   :  { %v4573_v58 = vpop.f32.mrb[30].mxu1 }
 0x21a   :  { %v4583_v63 = vadd.f32 %v4573_v58, %v4257_v20  ;;  %v16962_v11 = vpop.f32.mrb[31].mxu1 }
 0x229   :  { %v4899_v27 = vpop.f32.mrb[32].mxu1 }
 0x22a   :  { %v4909_v28 = vadd.f32 %v4899_v27, %v4583_v63  ;;  %v16967_v62 = vpop.f32.mrb[33].mxu1 }
 0x239   :  { %v5225_v12 = vpop.f32.mrb[34].mxu1 }
 0x23a   :  { %v5235_v14 = vadd.f32 %v5225_v12, %v4909_v28  ;;  %v16972_v15 = vpop.f32.mrb[35].mxu1 }
 0x249   :  { %v5551_v26 = vpop.f32.mrb[36].mxu1 }
 0x24a   :  { %v5561_v29 = vadd.f32 %v5551_v26, %v5235_v14  ;;  %v16977_v32 = vpop.f32.mrb[37].mxu1 }
 0x259   :  { %v5877_v33 = vpop.f32.mrb[38].mxu1 }
 0x25a   :  { %v5887_v34 = vadd.f32 %v5877_v33, %v5561_v29  ;;  %v16982_v0 = vpop.f32.mrb[39].mxu1 }
 0x269   :  { %v6203_v2 = vpop.f32.mrb[40].mxu1 }
 0x26a   :  { %v6213_v1 = vadd.f32 %v6203_v2, %v5887_v34  ;;  %v16987_v36 = vpop.f32.mrb[41].mxu1 }
 0x279   :  { %v6529_v6 = vpop.f32.mrb[42].mxu1 }
 0x27a   :  { %v6539_v38 = vadd.f32 %v6529_v6, %v6213_v1  ;;  %v16992_v41 = vpop.f32.mrb[43].mxu1  ;;  %v18969_v1 = vld [vmem:[%s20864_s3 + $0x10] sm:$0xff] }
 0x27b   :  { %17020 = vmatprep.mubr.msk.f32.mxu0 %vm99_vm1, %v18969_v1 }
 0x282   :  { %v6824_v7 = vpop.f32.mrb[44].mxu1 }
 0x283   :  { %v6834_v8 = vadd.f32 %v6824_v7, %v6539_v38  ;;  %v16997_v45 = vpop.f32.mrb[45].mxu1 }
 0x28a   :  { %v7124_v42 = vpop.f32.mrb[46].mxu1 }
 0x28b   :  { %v7134_v46 = vadd.f32 %v7124_v42, %v6834_v8  ;;  %v17002_v49 = vpop.f32.mrb[47].mxu1 }
 0x292   :  { %v7423_v52 = vpop.f32.mrb[48].mxu1 }
 0x293   :  { %v7433_v53 = vadd.f32 %v7423_v52, %v7134_v46  ;;  %v17007_v59 = vpop.f32.mrb[49].mxu1 }
 0x29a   :  { %v7722_v61 = vpop.f32.mrb[50].mxu1 }
 0x29b   :  { %v7732_v3 = vadd.f32 %v7722_v61, %v7433_v53  ;;  %v17012_v5 = vpop.f32.mrb[51].mxu1 }
 0x29e   :  { %v7879_v19 = vpop.f32.mrb[2].mxu1 }
 0x29f   :  { %v7808_v13 = vpop.f32.mrb[2].mxu0  ;;  %v7881_v18 = vpop.f32.mrb[3].mxu1  ;;  %v8040_v48 = vadd.f32 %v8036_v24, %v7879_v19 }
 0x2a0   :  { %v17403_v21 = vadd.f32 %v7808_v13, %v18719_v50  ;;  %v7810_v23 = vpop.f32.mrb[3].mxu0  ;;  %v8041_v57 = vadd.f32 %v8036_v24, %v7881_v18 }
 0x2a1   :  { %v17404_v22 = vadd.f32 %v7810_v23, %v18721_v51  ;;  %v8047_v56 = vmax.f32 %v8040_v48, 0.0 }
 0x2a2   :  { %v8021_v30 = vpop.f32.mrb[52].mxu1  ;;  %v8038_v51 = vadd.f32 %v17403_v21, %v8036_v24  ;;  %v8048_v10 = vmax.f32 %v8041_v57, 0.0 }
 0x2a3   :  { %v8031_v31 = vadd.f32 %v8021_v30, %v7732_v3  ;;  %v7950_v35 = vpop.f32.mrb[0].mxu0  ;;  %v17017_v37 = vpop.f32.mrb[53].mxu1  ;;  %v8039_v50 = vadd.f32 %v17404_v22, %v8036_v24  ;;  %v19110_v22 = vld [vmem:[%s20864_s3 + $0x18] sm:$0x3] }
 0x2a4   :  { %v8042_v39 = vadd.f32 %v8036_v24, %v7950_v35  ;;  %v7952_v40 = vpop.f32.mrb[1].mxu0  ;;  %v8045_v9 = vmax.f32 %v8038_v51, 0.0  ;;  %v19142_v35 = vld [vmem:[%s20864_s3 + $0x8] sm:$0x3] }
 0x2a5   :  { %v8044_v43 = vadd.f32 %v8036_v24, %v8031_v31  ;;  %v8043_v47 = vadd.f32 %v8036_v24, %v7952_v40  ;;  %v8046_v60 = vmax.f32 %v8039_v50, 0.0  ;;  %v19125_v24 = vld [vmem:[%s20864_s3] sm:$0xff]  ;;  %v19191_v51 = vld [vmem:[%s20864_s3 + $0x28] sm:$0x3] }
 0x2a6   :  { %v8049_v44 = vmax.f32 %v8042_v39, 0.0 }
 0x2a7   :  { %v8051_v54 = vmax.f32 %v8044_v43, 0.0  ;;  %v8050_v55 = vmax.f32 %v8043_v47, 0.0 }
 0x2a8   :  { %8067 = vrot.lane.b32.xlu1 %v8049_v44, %s17907_s17 }
 0x2a9   :  { %8071 = vrot.lane.b32.xlu0 %v8051_v54, %s17907_s17 }
 0x2ac   :  { %8069 = vrot.lane.b32.xlu1 %v8050_v55, %s17907_s17 }
 0x2ad   :  { %8063 = vrot.lane.b32.xlu0 %v8047_v56, %s17907_s17 }
 0x2b0   :  { %8061 = vrot.lane.b32.xlu1 %v8046_v60, %s17907_s17 }
 0x2b1   :  { %8059 = vrot.lane.b32.xlu0 %v8045_v9, %s17907_s17 }
 0x2b4   :  { %8065 = vrot.lane.b32.xlu1 %v8048_v10, %s17907_s17 }
 0x31a   :  { %v8068_v16 = vpop.permute.xlu1 %8067 }
 0x31b   :  { %v8072_v17 = vpop.permute.xlu0 %8071 }
 0x31c   :  { %v18961_v0 = vmax.f32 %v8051_v54, %v8072_v17  ;;  %v19175_v54 = vld [vmem:[%s20864_s3 + $0x20] sm:$0xff] }
 0x31e   :  { %v8070_v20 = vpop.permute.xlu1 %8069 }
 0x31f   :  { %v8077_v25 = vsel %vm84_vm0, %v8068_v16, %v8070_v20  ;;  %v8078_v58 = vsel %vm84_vm0, %v8070_v20, %v8072_v17  ;;  %v8064_v27 = vpop.permute.xlu0 %8063  ;;  %v19209_v17 = vld [vmem:[%s20864_s3 + $0x30] sm:$0xff] }
 0x320   :  { %v8090_v63 = vmax.f32 %v8049_v44, %v8077_v25  ;;  %v8091_v11 = vmax.f32 %v8050_v55, %v8078_v58  ;;  %v14571_v44 = vld [vmem:[%s20865_s4 + $0x8] sm:$0x3] }
 0x322   :  { %8110 = vrot.lane.b32.xlu0 %v8091_v11, %s17912_s18  ;;  %8108 = vrot.lane.b32.xlu1 %v8090_v63, %s17912_s18  ;;  %v8062_v28 = vpop.permute.xlu1 %8061 }
 0x323   :  { %v8074_v62 = vsel %vm84_vm0, %v8062_v28, %v8064_v27  ;;  %v8060_v14 = vpop.permute.xlu0 %8059 }
 0x324   :  { %v8087_v12 = vmax.f32 %v8046_v60, %v8074_v62  ;;  %v8073_v34 = vsel %vm84_vm0, %v8060_v14, %v8062_v28  ;;  %v19243_v14 = vld [vmem:[%s20864_s3 + $0x40] sm:$0xff] }
 0x325   :  { %v8086_v2 = vmax.f32 %v8045_v9, %v8073_v34 }
 0x326   :  { %8102 = vrot.lane.b32.xlu1 %v8087_v12, %s17912_s18  ;;  %v8066_v15 = vpop.permute.xlu1 %8065 }
 0x327   :  { %v8075_v26 = vsel %vm84_vm0, %v8064_v27, %v8066_v15  ;;  %v8076_v29 = vsel %vm84_vm0, %v8066_v15, %v8068_v16  ;;  %vm8913_vm0 = vcmask 998400  }
 0x328   :  { %v8088_v32 = vmax.f32 %v8047_v56, %v8075_v26  ;;  %v18955_v33 = vmax.f32 %v8048_v10, %v8076_v29 }
 0x32a   :  { %8106 = vrot.lane.b32.xlu1 %v18955_v33, %s17912_s18  ;;  %8104 = vrot.lane.b32.xlu0 %v8088_v32, %s17912_s18 }
 0x32e   :  { %8112 = vrot.lane.b32.xlu1 %v18961_v0, %s17912_s18  ;;  %8100 = vrot.lane.b32.xlu0 %v8086_v2, %s17912_s18  ;;  %s17929_s18 = smov 122  }
 0x394   :  { %v8111_v36 = vpop.permute.xlu0 %8110  ;;  %v8109_v6 = vpop.permute.xlu1 %8108 }
 0x395   :  { %v8118_v38 = vsel %vm1668_vm6, %v8109_v6, %v8111_v36 }
 0x396   :  { %v18974_v41 = vmax.f32 %v8090_v63, %v8118_v38  ;;  %v19225_v63 = vld [vmem:[%s20864_s3 + $0x38] sm:$0x3]  ;;  %v19284_v38 = vld [vmem:[%s20864_s3 + $0x50] sm:$0xff] }
 0x398   :  { %8152 = vrot.lane.b32.xlu0 %v18974_v41, %s17909_s30  ;;  %v8103_v7 = vpop.permute.xlu1 %8102 }
 0x39c   :  { %v8105_v8 = vpop.permute.xlu0 %8104  ;;  %v8107_v45 = vpop.permute.xlu1 %8106 }
 0x39d   :  { %v8115_v42 = vsel %vm1668_vm6, %v8103_v7, %v8105_v8  ;;  %v8116_v46 = vsel %vm1668_vm6, %v8105_v8, %v8107_v45  ;;  %v8117_v49 = vsel %vm1668_vm6, %v8107_v45, %v8109_v6 }
 0x39e   :  { %v18981_v52 = vmax.f32 %v8087_v12, %v8115_v42  ;;  %v18983_v53 = vmax.f32 %v8088_v32, %v8116_v46  ;;  %v19056_v18 = vmax.f32 %v18955_v33, %v8117_v49  ;;  %v19259_v32 = vld [vmem:[%s20864_s3 + $0x48] sm:$0x3]  ;;  %v19298_v42 = vld [vmem:[%s20864_s3 + $0x58] sm:$0x3] }
 0x3a0   :  { %20887 = vst [vmem:[#allocation5_spill] sm:$0xff] %v18983_v53  ;;  %v8101_v59 = vpop.permute.xlu0 %8100  ;;  %8638 = vrot.lane.b32.xlu1 %v18981_v52, %s17911_s16  ;;  %8640 = vrot.lane.b32.xlu0 %v18983_v53, %s17911_s16  ;;  %v8113_v5 = vpop.permute.xlu1 %8112 }
 0x3a1   :  { %v8114_v61 = vsel %vm1668_vm6, %v8101_v59, %v8103_v7  ;;  %v8119_v19 = vsel %vm1668_vm6, %v8111_v36, %v8113_v5  ;;  %v19099_v21 = vmax.f32 %v18961_v0, %v8113_v5  ;;  %vm10262_vm6 = vcmask 474112  }
 0x3a2   :  { %v18990_v3 = vmax.f32 %v8086_v2, %v8114_v61  ;;  %v19021_v13 = vmax.f32 %v8091_v11, %v8119_v19 }
 0x3a3   :  { %20888 = vst [vmem:[#allocation6_spill] sm:$0xff] %v19099_v21 }
 0x3a4   :  { %8636 = vrot.lane.b32.xlu1 %v18990_v3, %s17911_s16  ;;  %8644 = vrot.lane.b32.xlu0 %v18974_v41, %s17911_s16 }
 0x3a8   :  { %8905 = vrot.lane.b32.xlu1 %v18981_v52, %s17929_s18  ;;  %8907 = vrot.lane.b32.xlu0 %v18983_v53, %s17929_s18 }
 0x3ac   :  { %8903 = vrot.lane.b32.xlu1 %v18990_v3, %s17929_s18  ;;  %8911 = vrot.lane.b32.xlu0 %v18974_v41, %s17929_s18 }
 0x3b0   :  { %9173 = vrot.lane.b32.xlu1 %v18981_v52, %s17930_s19  ;;  %9175 = vrot.lane.b32.xlu0 %v18983_v53, %s17930_s19 }
 0x3b4   :  { %9171 = vrot.lane.b32.xlu1 %v18990_v3, %s17930_s19  ;;  %9179 = vrot.lane.b32.xlu0 %v18974_v41, %s17930_s19 }
 0x3b8   :  { %9442 = vrot.lane.b32.xlu1 %v18981_v52, %s17918_s29  ;;  %9444 = vrot.lane.b32.xlu0 %v18983_v53, %s17918_s29 }
 0x3bc   :  { %9440 = vrot.lane.b32.xlu1 %v18990_v3, %s17918_s29  ;;  %9712 = vrot.lane.b32.xlu0 %v18981_v52, %s17920_s24 }
 0x3c0   :  { %9448 = vrot.lane.b32.xlu0 %v18974_v41, %s17918_s29  ;;  %9450 = vrot.lane.b32.xlu1 %v19021_v13, %s17918_s29 }
 0x3c4   :  { %9710 = vrot.lane.b32.xlu0 %v18990_v3, %s17920_s24  ;;  %9714 = vrot.lane.b32.xlu1 %v18983_v53, %s17920_s24 }
 0x3c8   :  { %9984 = vrot.lane.b32.xlu0 %v18983_v53, %s17922_s20  ;;  %9982 = vrot.lane.b32.xlu1 %v18981_v52, %s17922_s20 }
 0x3cc   :  { %9720 = vrot.lane.b32.xlu0 %v19021_v13, %s17920_s24  ;;  %9718 = vrot.lane.b32.xlu1 %v18974_v41, %s17920_s24 }
 0x3d0   :  { %8146 = vrot.lane.b32.xlu0 %v18981_v52, %s17909_s30  ;;  %9980 = vrot.lane.b32.xlu1 %v18990_v3, %s17922_s20 }
 0x3d4   :  { %8144 = vrot.lane.b32.xlu0 %v18990_v3, %s17909_s30  ;;  %8148 = vrot.lane.b32.xlu1 %v18983_v53, %s17909_s30 }
 0x3d8   :  { %9990 = vrot.lane.b32.xlu0 %v19021_v13, %s17922_s20  ;;  %9988 = vrot.lane.b32.xlu1 %v18974_v41, %s17922_s20 }
 0x3dc   :  { %10254 = vrot.lane.b32.xlu0 %v18983_v53, %s17931_s2  ;;  %10252 = vrot.lane.b32.xlu1 %v18981_v52, %s17931_s2 }
 0x3e0   :  { %8150 = vrot.lane.b32.xlu0 %v19056_v18, %s17909_s30  ;;  %10250 = vrot.lane.b32.xlu1 %v18990_v3, %s17931_s2 }
 0x3e4   :  { %10260 = vrot.lane.b32.xlu0 %v19021_v13, %s17931_s2  ;;  %10258 = vrot.lane.b32.xlu1 %v18974_v41, %s17931_s2 }
 0x3e8   :  { %10525 = vrot.lane.b32.xlu0 %v18983_v53, %s17932_s21  ;;  %10523 = vrot.lane.b32.xlu1 %v18981_v52, %s17932_s21 }
 0x3ec   :  { %8642 = vrot.lane.b32.xlu0 %v19056_v18, %s17911_s16  ;;  %10521 = vrot.lane.b32.xlu1 %v18990_v3, %s17932_s21 }
 0x3f0   :  { %10531 = vrot.lane.b32.xlu0 %v19021_v13, %s17932_s21  ;;  %10529 = vrot.lane.b32.xlu1 %v18974_v41, %s17932_s21 }
 0x3f4   :  { %9177 = vrot.lane.b32.xlu0 %v19056_v18, %s17930_s19  ;;  %8909 = vrot.lane.b32.xlu1 %v19056_v18, %s17929_s18 }
 0x3f8   :  { %11040 = vrot.lane.b32.xlu0 %v19021_v13, %s17909_s30  ;;  %9446 = vrot.lane.b32.xlu1 %v19056_v18, %s17918_s29 }
 0x3fc   :  { %11293 = vrot.lane.b32.xlu0 %v19021_v13, %s17911_s16  ;;  %9716 = vrot.lane.b32.xlu1 %v19056_v18, %s17920_s24 }
 0x400   :  { %10256 = vrot.lane.b32.xlu0 %v19056_v18, %s17931_s2  ;;  %9986 = vrot.lane.b32.xlu1 %v19056_v18, %s17922_s20 }
 0x404   :  { %10527 = vrot.lane.b32.xlu0 %v19056_v18, %s17932_s21  ;;  %11546 = vrot.lane.b32.xlu1 %v19021_v13, %s17929_s18 }
 0x408   :  { %12053 = vrot.lane.b32.xlu0 %v19099_v21, %s17918_s29  ;;  %11799 = vrot.lane.b32.xlu1 %v19021_v13, %s17930_s19 }
 0x40a   :  { %v19105_v23 = vpop.permute.xlu0 %8152 }
 0x40b   :  { %17018 = vmatprep.subr.mxu0 %v19105_v23 }
 0x40c   :  { %17019 = vmatpush3.msra.mxu0 %v19105_v23  ;;  %12557 = vrot.lane.b32.xlu0 %v19099_v21, %s17922_s20 }
 0x40d   :  { %12305 = vrot.lane.b32.xlu1 %v19099_v21, %s17920_s24  ;;  %17021 = vmatmul.mubr.msk.f32.vlgmr.msra.gmra.mrb[4].mxu0 %vm99_vm1, %v19110_v22 }
 0x40e   :  { %8404 = vmatprep.subr.mxu0 %v18981_v52  ;;  %8468 = vmatprep.mubr.f32.mxu0 %v20876_v4 }
 0x40f   :  { %8405 = vmatpush1.msra.mxu0 %v18990_v3 }
 0x410   :  { %17023 = vmatprep.subr.mxu0 %v18974_v41  ;;  %13061 = vrot.lane.b32.xlu0 %v19099_v21, %s17932_s21 }
 0x411   :  { %12809 = vrot.lane.b32.xlu1 %v19099_v21, %s17931_s2  ;;  %16372 = vmatmul.mubr.msk.f32.vlgmr.msra.gmra.mrb[6].mxu0 %vm99_vm1, %v19125_v24 }
 0x412   :  { %17024 = vmatpush3.msra.mxu0 %v18974_v41  ;;  %v19136_v30 = vpop.permute.xlu0 %8640  ;;  %v8639_v31 = vpop.permute.xlu1 %8638  ;;  %8474 = vmatprep.mubr.f32.mxu0 %v20876_v4 }
 0x413   :  { %v19146_v37 = vsel %vm1342_vm5, %v8639_v31, %v19136_v30 }
 0x414   :  { %13814 = vrot.lane.b32.xlu0 %v19099_v21, %s17911_s16  ;;  %8661 = vmatprep.subr.mxu0 %v19146_v37 }
 0x415   :  { %13561 = vrot.lane.b32.xlu1 %v19099_v21, %s17909_s30  ;;  %16373 = vmatmul.mubr.msk.f32.gmra.mrb[8].mxu0 %vm99_vm1, %v19142_v35 }
 0x416   :  { %v19155_v39 = vpop.permute.xlu0 %8644  ;;  %v8637_v40 = vpop.permute.xlu1 %8636  ;;  %17025 = vmatprep.mubr.msk.f32.mxu0 %vm99_vm1, %v19125_v24 }
 0x417   :  { %v8646_v43 = vsel %vm1342_vm5, %v8637_v40, %v8639_v31  ;;  %v19326_v40 = vld [vmem:[%s20864_s3 + $0x60] sm:$0xff] }
 0x418   :  { %14320 = vrot.lane.b32.xlu0 %v19099_v21, %s17930_s19 }
 0x419   :  { %14067 = vrot.lane.b32.xlu1 %v19099_v21, %s17929_s18  ;;  %17026 = vmatmul.mubr.msk.f32.vlgmr.msra.gmra.mrb[4].mxu0 %vm99_vm1, %v19142_v35 }
 0x41a   :  { %8662 = vmatpush1.msra.mxu0 %v8646_v43  ;;  %v19169_v47 = vpop.permute.xlu0 %8907  ;;  %v8906_v48 = vpop.permute.xlu1 %8905  ;;  %8725 = vmatprep.mubr.f32.mxu0 %v20876_v4 }
 0x41b   :  { %17028 = vmatprep.subr.mxu0 %v19155_v39  ;;  %v19185_v55 = vsel %vm8913_vm0, %v8906_v48, %v19169_v47 }
 0x41c   :  { %14579 = vperm.xlu0 %17838, %v14571_v44  }
 0x41d   :  { %16380 = vmatmul.mubr.msk.f32.vlgmr.msra.gmra.mrb[6].mxu0 %vm99_vm1, %v19175_v54 }
 0x41e   :  { %17029 = vmatpush3.msra.mxu0 %v19155_v39  ;;  %v19181_v50 = vpop.permute.xlu0 %8911  ;;  %v8904_v56 = vpop.permute.xlu1 %8903  ;;  %8731 = vmatprep.mubr.f32.mxu0 %v20876_v4 }
 0x41f   :  { %8929 = vmatprep.subr.mxu0 %v19185_v55  ;;  %v8914_v9 = vsel %vm8913_vm0, %v8904_v56, %v8906_v48  ;;  %v19345_v56 = vld [vmem:[%s20864_s3 + $0x68] sm:$0x3] }
 0x421   :  { %16381 = vmatmul.mubr.msk.f32.gmra.mrb[8].mxu0 %vm99_vm1, %v19191_v51 }
 0x422   :  { %v19196_v57 = vpop.permute.xlu0 %9175  ;;  %v9174_v60 = vpop.permute.xlu1 %9173  ;;  %17030 = vmatprep.mubr.msk.f32.mxu0 %vm99_vm1, %v19175_v54 }
 0x423   :  { %v19219_v25 = vsel %vm9181_vm4, %v9174_v60, %v19196_v57 }
 0x425   :  { %17031 = vmatmul.mubr.msk.f32.vlgmr.msra.gmra.mrb[4].mxu0 %vm99_vm1, %v19191_v51 }
 0x426   :  { %8930 = vmatpush1.msra.mxu0 %v8914_v9  ;;  %v19203_v10 = vpop.permute.xlu0 %9179  ;;  %v9172_v16 = vpop.permute.xlu1 %9171  ;;  %8993 = vmatprep.mubr.f32.mxu0 %v20876_v4 }
 0x427   :  { %17033 = vmatprep.subr.mxu0 %v19181_v50  ;;  %v9182_v28 = vsel %vm9181_vm4, %v9172_v16, %v9174_v60 }
 0x429   :  { %16388 = vmatmul.mubr.msk.f32.vlgmr.msra.gmra.mrb[6].mxu0 %vm99_vm1, %v19209_v17 }
 0x42a   :  { %17034 = vmatpush3.msra.mxu0 %v19181_v50  ;;  %v19215_v20 = vpop.permute.xlu0 %9444  ;;  %v9443_v58 = vpop.permute.xlu1 %9442  ;;  %8999 = vmatprep.mubr.f32.mxu0 %v20876_v4 }
 0x42b   :  { %9197 = vmatprep.subr.mxu0 %v19219_v25  ;;  %v19251_v26 = vsel %vm3298_vm11, %v9443_v58, %v19215_v20 }
 0x42d   :  { %16389 = vmatmul.mubr.msk.f32.gmra.mrb[8].mxu0 %vm99_vm1, %v19225_v63 }
 0x42e   :  { %v9713_v11 = vpop.permute.xlu0 %9712  ;;  %v9441_v27 = vpop.permute.xlu1 %9440  ;;  %17035 = vmatprep.mubr.msk.f32.mxu0 %vm99_vm1, %v19209_v17 }
 0x42f   :  { %v9452_v0 = vsel %vm3298_vm11, %v9441_v27, %v9443_v58 }
 0x431   :  { %17036 = vmatmul.mubr.msk.f32.vlgmr.msra.gmra.mrb[4].mxu0 %vm99_vm1, %v19225_v63 }
 0x432   :  { %9198 = vmatpush1.msra.mxu0 %v9182_v28  ;;  %v19235_v62 = vpop.permute.xlu0 %9448  ;;  %v19237_v12 = vpop.permute.xlu1 %9450  ;;  %9261 = vmatprep.mubr.f32.mxu0 %v20876_v4 }
 0x433   :  { %17038 = vmatprep.subr.mxu0 %v19203_v10  ;;  %v19276_v36 = vsel %vm3298_vm11, %v19235_v62, %v19237_v12 }
 0x435   :  { %16396 = vmatmul.mubr.msk.f32.vlgmr.msra.gmra.mrb[6].mxu0 %vm99_vm1, %v19243_v14 }
 0x436   :  { %17039 = vmatpush3.msra.mxu0 %v19203_v10  ;;  %v9711_v15 = vpop.permute.xlu0 %9710  ;;  %v19253_v29 = vpop.permute.xlu1 %9714  ;;  %9267 = vmatprep.mubr.f32.mxu0 %v20876_v4 }
 0x437   :  { %9468 = vmatprep.subr.mxu0 %v19251_v26  ;;  %v19292_v8 = vsel %vm3950_vm13, %v9713_v11, %v19253_v29  ;;  %v9722_v3 = vsel %vm3950_vm13, %v9711_v15, %v9713_v11 }
 0x439   :  { %16397 = vmatmul.mubr.msk.f32.gmra.mrb[8].mxu0 %vm99_vm1, %v19259_v32 }
 0x43a   :  { %v19264_v33 = vpop.permute.xlu0 %9984  ;;  %v9983_v34 = vpop.permute.xlu1 %9982  ;;  %17040 = vmatprep.mubr.msk.f32.mxu0 %vm99_vm1, %v19243_v14 }
 0x43b   :  { %v19339_v44 = vsel %vm4602_vm15, %v9983_v34, %v19264_v33 }
 0x43d   :  { %17041 = vmatmul.mubr.msk.f32.vlgmr.msra.gmra.mrb[4].mxu0 %vm99_vm1, %v19259_v32 }
 0x43e   :  { %9469 = vmatpush1.msra.mxu0 %v9452_v0  ;;  %v19271_v2 = vpop.permute.xlu0 %9720  ;;  %v19278_v6 = vpop.permute.xlu1 %9718  ;;  %9532 = vmatprep.mubr.f32.mxu0 %v20876_v4 }
 0x43f   :  { %17043 = vmatprep.subr.mxu0 %v19276_v36  ;;  %v19318_v19 = vsel %vm3950_vm13, %v19278_v6, %v19271_v2 }
 0x441   :  { %16404 = vmatmul.mubr.msk.f32.vlgmr.msra.gmra.mrb[6].mxu0 %vm99_vm1, %v19284_v38 }
 0x442   :  { %17044 = vmatpush3.msra.mxu0 %v19276_v36  ;;  %v8147_v7 = vpop.permute.xlu0 %8146  ;;  %v9981_v45 = vpop.permute.xlu1 %9980  ;;  %9538 = vmatprep.mubr.f32.mxu0 %v20876_v4 }
 0x443   :  { %9738 = vmatprep.subr.mxu0 %v19292_v8  ;;  %v9992_v11 = vsel %vm4602_vm15, %v9981_v45, %v9983_v34  ;;  %v19381_v34 = vld [vmem:[%s20864_s3 + $0x70] sm:$0xff]  ;;  %v19402_v45 = vld [vmem:[%s20864_s3 + $0x78] sm:$0x3] }
 0x445   :  { %16405 = vmatmul.mubr.msk.f32.gmra.mrb[8].mxu0 %vm99_vm1, %v19298_v42 }
 0x446   :  { %v8145_v46 = vpop.permute.xlu0 %8144  ;;  %v8149_v49 = vpop.permute.xlu1 %8148  ;;  %17045 = vmatprep.mubr.msk.f32.mxu0 %vm99_vm1, %v19284_v38 }
 0x447   :  { %v8154_v59 = vsel %vm690_vm3, %v8145_v46, %v8147_v7  ;;  %v19307_v61 = vsel %vm690_vm3, %v8147_v7, %v8149_v49 }
 0x448   :  { %8169 = vmatprep.subr.mxu1 %v19307_v61 }
 0x449   :  { %8170 = vmatpush1.msra.mxu1 %v8154_v59  ;;  %17046 = vmatmul.mubr.msk.f32.vlgmr.msra.gmra.mrb[4].mxu0 %vm99_vm1, %v19298_v42 }
 0x44a   :  { %9739 = vmatpush1.msra.mxu0 %v9722_v3  ;;  %v19313_v5 = vpop.permute.xlu0 %9990  ;;  %v19320_v31 = vpop.permute.xlu1 %9988  ;;  %9802 = vmatprep.mubr.f32.mxu0 %v20876_v4 }
 0x44b   :  { %17048 = vmatprep.subr.mxu0 %v19318_v19  ;;  %16366 = vmatmul.mubr.msk.f32.vlgmr.msra.gmra.mrb[54].mxu1 %vm99_vm1, %v18969_v1  ;;  %v19374_v28 = vsel %vm4602_vm15, %v19320_v31, %v19313_v5 }
 0x44c   :  { %8239 = vmatprep.mubr.f32.mxu1 %v20876_v4  ;;  %20890 = vst [vmem:[#allocation8_spill] sm:$0xff] %v19374_v28 }
 0x44d   :  { %16412 = vmatmul.mubr.msk.f32.vlgmr.msra.gmra.mrb[6].mxu0 %vm99_vm1, %v19326_v40 }
 0x44e   :  { %17049 = vmatpush3.msra.mxu0 %v19318_v19  ;;  %v19335_v43 = vpop.permute.xlu0 %10254  ;;  %v10253_v48 = vpop.permute.xlu1 %10252  ;;  %9808 = vmatprep.mubr.f32.mxu0 %v20876_v4 }
 0x44f   :  { %10008 = vmatprep.subr.mxu0 %v19339_v44  ;;  %16367 = vmatmul.mubr.msk.f32.gmra.mrb[56].mxu1 %vm99_vm1, %v19110_v22  ;;  %v19397_v0 = vsel %vm10262_vm6, %v10253_v48, %v19335_v43 }
 0x450   :  { %8310 = vmatprep.mubr.f32.mxu1 %v20876_v4  ;;  %20891 = vst [vmem:[#allocation9_spill] sm:$0xff] %v19397_v0 }
 0x451   :  { %16413 = vmatmul.mubr.msk.f32.gmra.mrb[8].mxu0 %vm99_vm1, %v19345_v56 }
 0x452   :  { %v8151_v60 = vpop.permute.xlu0 %8150  ;;  %v10251_v9 = vpop.permute.xlu1 %10250  ;;  %17050 = vmatprep.mubr.msk.f32.mxu0 %vm99_vm1, %v19326_v40 }
 0x453   :  { %v19356_v16 = vsel %vm690_vm3, %v8149_v49, %v8151_v60  ;;  %v19360_v58 = vsel %vm690_vm3, %v8151_v60, %v19105_v23  ;;  %v10263_v3 = vsel %vm10262_vm6, %v10251_v9, %v10253_v48  ;;  %v19441_v48 = vld [vmem:[%s20864_s3 + $0x80] sm:$0xff] }
 0x454   :  { %20889 = vst [vmem:[#allocation7_spill] sm:$0xff] %v19356_v16  ;;  %8246 = vmatprep.subr.mxu1 %v19360_v58 }
 0x455   :  { %8247 = vmatpush1.msra.mxu1 %v19356_v16  ;;  %17051 = vmatmul.mubr.msk.f32.vlgmr.msra.gmra.mrb[4].mxu0 %vm99_vm1, %v19345_v56 }
 0x456   :  { %10009 = vmatpush1.msra.mxu0 %v9992_v11  ;;  %v19367_v27 = vpop.permute.xlu0 %10260  ;;  %16368 = vmatmul.mubr.msk.f32.vlgmr.msra.gmra.mrb[58].mxu1 %vm99_vm1, %v18969_v1  ;;  %v19376_v15 = vpop.permute.xlu1 %10258 }
 0x457   :  { %8481 = vmatprep.subr.mxu1 %v19056_v18  ;;  %17053 = vmatprep.subr.mxu0 %v19374_v28 }
 0x458   :  { %8482 = vmatpush1.msra.mxu1 %v18983_v53  ;;  %10072 = vmatprep.mubr.f32.mxu0 %v20876_v4 }
 0x459   :  { %8316 = vmatprep.mubr.f32.mxu1 %v20876_v4  ;;  %16420 = vmatmul.mubr.msk.f32.vlgmr.msra.gmra.mrb[6].mxu0 %vm99_vm1, %v19381_v34 }
 0x45a   :  { %17054 = vmatpush3.msra.mxu0 %v19374_v28  ;;  %v19391_v1 = vpop.permute.xlu0 %10525  ;;  %16369 = vmatmul.mubr.msk.f32.gmra.mrb[60].mxu1 %vm99_vm1, %v19110_v22  ;;  %v10524_v7 = vpop.permute.xlu1 %10523 }
 0x45b   :  { %10279 = vmatprep.subr.mxu0 %v19397_v0  ;;  %10078 = vmatprep.mubr.f32.mxu0 %v20876_v4  ;;  %v19453_v9 = vsel %vm10533_vm14, %v10524_v7, %v19391_v1 }
 0x45c   :  { %8545 = vmatprep.mubr.f32.mxu1 %v20876_v4  ;;  %20893 = vst [vmem:[#allocation11_spill] sm:$0xff] %v19453_v9 }
 0x45d   :  { %16421 = vmatmul.mubr.msk.f32.gmra.mrb[8].mxu0 %vm99_vm1, %v19402_v45 }
 0x45e   :  { %v8643_v22 = vpop.permute.xlu0 %8642  ;;  %16374 = vmatmul.mubr.msk.f32.vlgmr.msra.gmra.mrb[58].mxu1 %vm99_vm1, %v19125_v24  ;;  %v10522_v46 = vpop.permute.xlu1 %10521  ;;  %17055 = vmatprep.mubr.msk.f32.mxu0 %vm99_vm1, %v19381_v34 }
 0x45f   :  { %v19415_v49 = vsel %vm1342_vm5, %v19136_v30, %v8643_v22  ;;  %v19419_v59 = vsel %vm1342_vm5, %v8643_v22, %v19155_v39  ;;  %8551 = vmatprep.mubr.f32.mxu1 %v20876_v4  ;;  %v19434_v30 = vsel %vm10262_vm6, %v19376_v15, %v19367_v27  ;;  %v19458_v22 = vld [vmem:[%s20864_s3 + $0x88] sm:$0x3] }
 0x460   :  { %8738 = vmatprep.subr.mxu1 %v19419_v59  ;;  %20892 = vst [vmem:[#allocation10_spill] sm:$0xff] %v19434_v30 }
 0x461   :  { %8739 = vmatpush1.msra.mxu1 %v19415_v49  ;;  %17056 = vmatmul.mubr.msk.f32.vlgmr.msra.gmra.mrb[4].mxu0 %vm99_vm1, %v19402_v45 }
 0x462   :  { %10280 = vmatpush1.msra.mxu0 %v10263_v3  ;;  %v19427_v24 = vpop.permute.xlu0 %10531  ;;  %16375 = vmatmul.mubr.msk.f32.gmra.mrb[60].mxu1 %vm99_vm1, %v19142_v35  ;;  %v19436_v60 = vpop.permute.xlu1 %10529 }
 0x463   :  { %17058 = vmatprep.subr.mxu0 %v19434_v30  ;;  %10343 = vmatprep.mubr.f32.mxu0 %v20876_v4 }
 0x464   :  { %8802 = vmatprep.mubr.f32.mxu1 %v20876_v4 }
 0x465   :  { %16428 = vmatmul.mubr.msk.f32.vlgmr.msra.gmra.mrb[6].mxu0 %vm99_vm1, %v19441_v48 }
 0x466   :  { %17059 = vmatpush3.msra.mxu0 %v19434_v30  ;;  %v9178_v35 = vpop.permute.xlu0 %9177  ;;  %16382 = vmatmul.mubr.msk.f32.vlgmr.msra.gmra.mrb[58].mxu1 %vm99_vm1, %v19175_v54  ;;  %v8910_v11 = vpop.permute.xlu1 %8909  ;;  %v20894_v54 = vmov 0.0  }
 0x467   :  { %10550 = vmatprep.subr.mxu0 %v19453_v9  ;;  %v19463_v3 = vsel %vm8913_vm0, %v19169_v47, %v8910_v11  ;;  %v19467_v4 = vsel %vm8913_vm0, %v8910_v11, %v19181_v50  ;;  %10349 = vmatprep.mubr.f32.mxu0 %v20894_v54  ;;  %v19477_v21 = vsel %vm9181_vm4, %v9178_v35, %v19203_v10 }
 0x468   :  { %9006 = vmatprep.subr.mxu1 %v19467_v4  ;;  %8808 = vmatprep.mubr.f32.mxu1 %v20894_v54  ;;  %v10534_v9 = vsel %vm10533_vm14, %v10522_v46, %v10524_v7  ;;  %v19492_v0 = vsel %vm9181_vm4, %v19196_v57, %v9178_v35  ;;  %v19506_v7 = vld [vmem:[%s20864_s3 + $0x90] sm:$0xff] }
 0x469   :  { %9007 = vmatpush1.msra.mxu1 %v19463_v3  ;;  %16429 = vmatmul.mubr.msk.f32.gmra.mrb[8].mxu0 %vm99_vm1, %v19458_v22 }
 0x46a   :  { %v19479_v47 = vpop.permute.xlu0 %11040  ;;  %16383 = vmatmul.mubr.msk.f32.gmra.mrb[60].mxu1 %vm99_vm1, %v19191_v51  ;;  %9274 = vmatprep.subr.mxu1 %v19477_v21  ;;  %v9447_v11 = vpop.permute.xlu1 %9446  ;;  %v19501_v51 = vsel %vm10533_vm14, %v19436_v60, %v19427_v24 }
 0x46b   :  { %17060 = vmatprep.mubr.msk.f32.mxu0 %vm99_vm1, %v19441_v48  ;;  %9070 = vmatprep.mubr.f32.mxu1 %v20894_v54  ;;  %20895 = vst [vmem:[#allocation12_spill] sm:$0xff] %v19501_v51  ;;  %v19512_v57 = vsel %vm3298_vm11, %v9447_v11, %v19235_v62  ;;  %v19527_v62 = vld [vmem:[%s20864_s3 + $0x98] sm:$0x3]  ;;  %v19536_v35 = vsel %vm3298_vm11, %v19215_v20, %v9447_v11  ;;  %v19584_v11 = vld [vmem:[%s20864_s3 + $0xa8] sm:$0x3] }
 0x46d   :  { %17061 = vmatmul.mubr.msk.f32.vlgmr.msra.gmra.mrb[4].mxu0 %vm99_vm1, %v19458_v22 }
 0x46e   :  { %10551 = vmatpush1.msra.mxu0 %v10534_v9  ;;  %v19494_v30 = vpop.permute.xlu0 %11293  ;;  %16390 = vmatmul.mubr.msk.f32.vlgmr.msra.gmra.mrb[58].mxu1 %vm99_vm1, %v19209_v17  ;;  %v9717_v28 = vpop.permute.xlu1 %9716 }
 0x46f   :  { %9275 = vmatpush1.msra.mxu1 %v19492_v0  ;;  %17063 = vmatprep.subr.mxu0 %v19501_v51 }
 0x470   :  { %9545 = vmatprep.subr.mxu1 %v19512_v57  ;;  %10614 = vmatprep.mubr.f32.mxu0 %v20894_v54 }
 0x471   :  { %9076 = vmatprep.mubr.f32.mxu1 %v20894_v54  ;;  %16436 = vmatmul.mubr.msk.f32.vlgmr.msra.gmra.mrb[6].mxu0 %vm99_vm1, %v19506_v7 }
 0x472   :  { %17064 = vmatpush3.msra.mxu0 %v19501_v51  ;;  %v19520_v17 = vpop.permute.xlu0 %10256  ;;  %16391 = vmatmul.mubr.msk.f32.gmra.mrb[60].mxu1 %vm99_vm1, %v19225_v63  ;;  %v9987_v46 = vpop.permute.xlu1 %9986 }
 0x473   :  { %10798 = vmatprep.subr.mxu0 %v18983_v53  ;;  %10620 = vmatprep.mubr.f32.mxu0 %v20894_v54  ;;  %v19549_v53 = vsel %vm3950_vm13, %v9717_v28, %v19278_v6  ;;  %v19565_v6 = vld [vmem:[%s20864_s3 + $0xa0] sm:$0xff] }
 0x474   :  { %9338 = vmatprep.mubr.f32.mxu1 %v20894_v54 }
 0x475   :  { %16437 = vmatmul.mubr.msk.f32.gmra.mrb[8].mxu0 %vm99_vm1, %v19527_v62 }
 0x476   :  { %v19538_v63 = vpop.permute.xlu0 %10527  ;;  %16398 = vmatmul.mubr.msk.f32.vlgmr.msra.gmra.mrb[58].mxu1 %vm99_vm1, %v19243_v14  ;;  %v19542_v9 = vpop.permute.xlu1 %11546  ;;  %17065 = vmatprep.mubr.msk.f32.mxu0 %vm99_vm1, %v19506_v7 }
 0x477   :  { %9546 = vmatpush1.msra.mxu1 %v19536_v35  ;;  %9344 = vmatprep.mubr.f32.mxu1 %v20894_v54 }
 0x478   :  { %9815 = vmatprep.subr.mxu1 %v19549_v53 }
 0x479   :  { %17066 = vmatmul.mubr.msk.f32.vlgmr.msra.gmra.mrb[4].mxu0 %vm99_vm1, %v19527_v62 }
 0x47a   :  { %10799 = vmatpush1.msra.mxu0 %v18981_v52  ;;  %v19556_v20 = vpop.permute.xlu0 %12053  ;;  %16399 = vmatmul.mubr.msk.f32.gmra.mrb[60].mxu1 %vm99_vm1, %v19259_v32  ;;  %v19560_v14 = vpop.permute.xlu1 %11799  ;;  %v19574_v52 = vsel %vm3950_vm13, %v19253_v29, %v9717_v28  ;;  %v19592_v29 = vsel %vm4602_vm15, %v9987_v46, %v19320_v31 }
 0x47b   :  { %17068 = vmatprep.subr.mxu0 %v19021_v13  ;;  %10862 = vmatprep.mubr.f32.mxu0 %v20894_v54 }
 0x47c   :  { %9609 = vmatprep.mubr.f32.mxu1 %v20894_v54 }
 0x47d   :  { %16444 = vmatmul.mubr.msk.f32.vlgmr.msra.gmra.mrb[6].mxu0 %vm99_vm1, %v19565_v6 }
 0x47e   :  { %17069 = vmatpush3.msra.mxu0 %v19021_v13  ;;  %v19577_v32 = vpop.permute.xlu0 %12557  ;;  %16406 = vmatmul.mubr.msk.f32.vlgmr.msra.gmra.mrb[58].mxu1 %vm99_vm1, %v19284_v38 }
 0x47f   :  { %9816 = vmatpush1.msra.mxu1 %v19574_v52  ;;  %11051 = vmatprep.subr.mxu0 %v19356_v16  ;;  %v19588_v51 = vpop.permute.xlu1 %12305 }
 0x480   :  { %10085 = vmatprep.subr.mxu1 %v19592_v29  ;;  %10868 = vmatprep.mubr.f32.mxu0 %v20894_v54 }
 0x481   :  { %9615 = vmatprep.mubr.f32.mxu1 %v20894_v54  ;;  %16445 = vmatmul.mubr.msk.f32.gmra.mrb[8].mxu0 %vm99_vm1, %v19584_v11 }
 0x482   :  { %v13062_v38 = vpop.permute.xlu0 %13061  ;;  %16407 = vmatmul.mubr.msk.f32.gmra.mrb[60].mxu1 %vm99_vm1, %v19298_v42  ;;  %17070 = vmatprep.mubr.msk.f32.mxu0 %vm99_vm1, %v19565_v6  ;;  %v19616_v42 = vsel %vm4602_vm15, %v19264_v33, %v9987_v46  ;;  %v19644_v33 = vld [vmem:[%s20864_s3 + $0xb8] sm:$0x3] }
 0x483   :  { %v12810_v28 = vpop.permute.xlu1 %12809  ;;  %9879 = vmatprep.mubr.f32.mxu1 %v20894_v54  ;;  %v19606_v31 = vsel %vm10533_vm14, %v19427_v24, %v13062_v38  ;;  %v19624_v24 = vld [vmem:[%s20864_s3 + $0xb0] sm:$0xff] }
 0x484   :  { %v19610_v16 = vsel %vm10262_vm6, %v19367_v27, %v12810_v28  ;;  %v19631_v27 = vsel %vm10262_vm6, %v19520_v17, %v19376_v15  ;;  %v19716_v15 = vld [vmem:[%s20864_s3 + $0xd0] sm:$0xff] }
 0x485   :  { %17071 = vmatmul.mubr.msk.f32.vlgmr.msra.gmra.mrb[4].mxu0 %vm99_vm1, %v19584_v11 }
 0x486   :  { %11052 = vmatpush1.msra.mxu0 %v19307_v61  ;;  %16414 = vmatmul.mubr.msk.f32.vlgmr.msra.gmra.mrb[58].mxu1 %vm99_vm1, %v19326_v40  ;;  %v19654_v61 = vsel %vm10262_vm6, %v19335_v43, %v19520_v17  ;;  %v19664_v40 = vsel %vm10533_vm14, %v19538_v63, %v19436_v60  ;;  %v19676_v43 = vld [vmem:[%s20864_s3 + $0xc0] sm:$0xff]  ;;  %v16482_v60 = vld [vmem:[%s20864_s3 + $0xf0] sm:$0xff]  ;;  %v16515_v17 = vld [vmem:[%s20864_s3 + $0x138] sm:$0x3] }
 0x487   :  { %10086 = vmatpush1.msra.mxu1 %v19616_v42  ;;  %17073 = vmatprep.subr.mxu0 %v19479_v47  ;;  %v13562_v46 = vpop.permute.xlu1 %13561 }
 0x488   :  { %10356 = vmatprep.subr.mxu1 %v19631_v27  ;;  %11115 = vmatprep.mubr.f32.mxu0 %v20894_v54 }
 0x489   :  { %9885 = vmatprep.mubr.f32.mxu1 %v20894_v54  ;;  %16452 = vmatmul.mubr.msk.f32.vlgmr.msra.gmra.mrb[6].mxu0 %vm99_vm1, %v19624_v24 }
 0x48a   :  { %17074 = vmatpush3.msra.mxu0 %v19479_v47  ;;  %16415 = vmatmul.mubr.msk.f32.gmra.mrb[60].mxu1 %vm99_vm1, %v19345_v56  ;;  %v19694_v56 = vld [vmem:[%s20864_s3 + $0xc8] sm:$0x3] }
 0x48b   :  { %11304 = vmatprep.subr.mxu0 %v19415_v49  ;;  %11121 = vmatprep.mubr.f32.mxu0 %v20894_v54 }
 0x48c   :  { %10149 = vmatprep.mubr.f32.mxu1 %v20894_v54 }
 0x48d   :  { %16453 = vmatmul.mubr.msk.f32.gmra.mrb[8].mxu0 %vm99_vm1, %v19644_v33 }
 0x48e   :  { %16422 = vmatmul.mubr.msk.f32.vlgmr.msra.gmra.mrb[58].mxu1 %vm99_vm1, %v19381_v34  ;;  %17075 = vmatprep.mubr.msk.f32.mxu0 %vm99_vm1, %v19624_v24  ;;  %v19723_v34 = vsel %vm690_vm3, %v19105_v23, %v19479_v47  ;;  %v19748_v23 = vsel %vm1342_vm5, %v19155_v39, %v19494_v30  ;;  %v16475_v39 = vld [vmem:[%s20864_s3 + $0xe8] sm:$0x3] }
 0x48f   :  { %10357 = vmatpush1.msra.mxu1 %v19654_v61  ;;  %10155 = vmatprep.mubr.f32.mxu1 %v20894_v54 }
 0x490   :  { %10627 = vmatprep.subr.mxu1 %v19664_v40 }
 0x491   :  { %17076 = vmatmul.mubr.msk.f32.vlgmr.msra.gmra.mrb[4].mxu0 %vm99_vm1, %v19644_v33 }
 0x492   :  { %11305 = vmatpush1.msra.mxu0 %v19146_v37  ;;  %16423 = vmatmul.mubr.msk.f32.gmra.mrb[60].mxu1 %vm99_vm1, %v19402_v45  ;;  %v19686_v37 = vsel %vm10533_vm14, %v19391_v1, %v19538_v63  ;;  %v16474_v1 = vld [vmem:[%s20864_s3 + $0xe0] sm:$0xff] }
 0x493   :  { %17078 = vmatprep.subr.mxu0 %v19494_v30  ;;  %11368 = vmatprep.mubr.f32.mxu0 %v20894_v54  ;;  %v14570_v45 = vld [vmem:[%s20865_s4] sm:$0xff] }
 0x494   :  { %10420 = vmatprep.mubr.f32.mxu1 %v20894_v54  ;;  %14574 = vperm.xlu1 %17839, %v14570_v45  }
 0x495   :  { %16460 = vmatmul.mubr.msk.f32.vlgmr.msra.gmra.mrb[6].mxu0 %vm99_vm1, %v19676_v43 }
 0x496   :  { %17079 = vmatpush3.msra.mxu0 %v19494_v30  ;;  %16430 = vmatmul.mubr.msk.f32.vlgmr.msra.gmra.mrb[58].mxu1 %vm99_vm1, %v19441_v48  ;;  %v19801_v48 = vsel %vm9181_vm4, %v19203_v10, %v19560_v14  ;;  %v12307_v10 = vsel %vm3950_vm13, %v19271_v2, %v19588_v51  ;;  %v12559_v2 = vsel %vm4602_vm15, %v19313_v5, %v19577_v32  ;;  %v16499_v5 = vld [vmem:[%s20864_s3 + $0x118] sm:$0x3]  ;;  %v16507_v51 = vld [vmem:[%s20864_s3 + $0x128] sm:$0x3]  ;;  %vm15130_vm13 = vcmask 1040384  }
 0x497   :  { %10628 = vmatpush1.msra.mxu1 %v19686_v37  ;;  %11557 = vmatprep.subr.mxu0 %v19463_v3  ;;  %vm17933_vm15 = vmmov 1  }
 0x498   :  { %10875 = vmatprep.subr.mxu1 %v18974_v41  ;;  %11374 = vmatprep.mubr.f32.mxu0 %v20894_v54  ;;  %vm20411_vm7 = vmpackc.low %vm15130_vm13, %vm17933_vm15 }
 0x499   :  { %10426 = vmatprep.mubr.f32.mxu1 %v20894_v54  ;;  %16461 = vmatmul.mubr.msk.f32.gmra.mrb[8].mxu0 %vm99_vm1, %v19694_v56 }
 0x49a   :  { %16431 = vmatmul.mubr.msk.f32.gmra.mrb[60].mxu1 %vm99_vm1, %v19458_v22  ;;  %17080 = vmatprep.mubr.msk.f32.mxu0 %vm99_vm1, %v19676_v43  ;;  %v16506_v22 = vld [vmem:[%s20864_s3 + $0x120] sm:$0xff] }
 0x49b   :  { %10691 = vmatprep.mubr.f32.mxu1 %v20894_v54 }
 0x49d   :  { %17081 = vmatmul.mubr.msk.f32.vlgmr.msra.gmra.mrb[4].mxu0 %vm99_vm1, %v19694_v56 }
 0x49e   :  { %11558 = vmatpush1.msra.mxu0 %v19185_v55  ;;  %16438 = vmatmul.mubr.msk.f32.vlgmr.msra.gmra.mrb[58].mxu1 %vm99_vm1, %v19506_v7  ;;  %v16467_v55 = vld [vmem:[%s20864_s3 + $0xd8] sm:$0x3]  ;;  %v20899_v7 = vld [vmem:[#allocation12_spill] sm:$0xff] }
 0x49f   :  { %10876 = vmatpush1.msra.mxu1 %v19056_v18  ;;  %17083 = vmatprep.subr.mxu0 %v19542_v9 }
 0x4a0   :  { %11128 = vmatprep.subr.mxu1 %v19723_v34  ;;  %11621 = vmatprep.mubr.f32.mxu0 %v20894_v54 }
 0x4a1   :  { %10697 = vmatprep.mubr.f32.mxu1 %v20894_v54  ;;  %16468 = vmatmul.mubr.msk.f32.vlgmr.msra.gmra.mrb[6].mxu0 %vm99_vm1, %v19716_v15 }
 0x4a2   :  { %17084 = vmatpush3.msra.mxu0 %v19542_v9  ;;  %16439 = vmatmul.mubr.msk.f32.gmra.mrb[60].mxu1 %vm99_vm1, %v19527_v62  ;;  %v16522_v62 = vld [vmem:[%s20864_s3 + $0x140] sm:$0xff] }
 0x4a3   :  { %11810 = vmatprep.subr.mxu0 %v19492_v0  ;;  %11627 = vmatprep.mubr.f32.mxu0 %v20894_v54 }
 0x4a4   :  { %10939 = vmatprep.mubr.f32.mxu1 %v20894_v54 }
 0x4a5   :  { %16469 = vmatmul.mubr.msk.f32.gmra.mrb[8].mxu0 %vm99_vm1, %v16467_v55 }
 0x4a6   :  { %16446 = vmatmul.mubr.msk.f32.vlgmr.msra.gmra.mrb[58].mxu1 %vm99_vm1, %v19565_v6  ;;  %17085 = vmatprep.mubr.msk.f32.mxu0 %vm99_vm1, %v19716_v15 }
 0x4a7   :  { %11129 = vmatpush1.msra.mxu1 %v19360_v58  ;;  %10945 = vmatprep.mubr.f32.mxu1 %v20894_v54 }
 0x4a8   :  { %11381 = vmatprep.subr.mxu1 %v19748_v23 }
 0x4a9   :  { %17086 = vmatmul.mubr.msk.f32.vlgmr.msra.gmra.mrb[4].mxu0 %vm99_vm1, %v16467_v55 }
 0x4aa   :  { %11811 = vmatpush1.msra.mxu0 %v19219_v25  ;;  %16447 = vmatmul.mubr.msk.f32.gmra.mrb[60].mxu1 %vm99_vm1, %v19584_v11  ;;  %v19774_v25 = vsel %vm8913_vm0, %v19181_v50, %v19542_v9  ;;  %v12055_v50 = vsel %vm3298_vm11, %v19237_v12, %v19556_v20  ;;  %v16483_v12 = vld [vmem:[%s20864_s3 + $0xf8] sm:$0x3]  ;;  %v14068_v20 = vpop.permute.xlu1 %14067  ;;  %v16539_v11 = vld [vmem:[%s20864_s3 + $0x168] sm:$0x3] }
 0x4ab   :  { %17088 = vmatprep.subr.mxu0 %v19560_v14  ;;  %11874 = vmatprep.mubr.f32.mxu0 %v20894_v54  ;;  %v14069_v6 = vsel %vm8913_vm0, %v19542_v9, %v14068_v20  ;;  %v16538_v9 = vld [vmem:[%s20864_s3 + $0x160] sm:$0xff] }
 0x4ac   :  { %11192 = vmatprep.mubr.f32.mxu1 %v20894_v54 }
 0x4ad   :  { %16476 = vmatmul.mubr.msk.f32.vlgmr.msra.gmra.mrb[6].mxu0 %vm99_vm1, %v16474_v1 }
 0x4ae   :  { %17089 = vmatpush3.msra.mxu0 %v19560_v14  ;;  %16454 = vmatmul.mubr.msk.f32.vlgmr.msra.gmra.mrb[58].mxu1 %vm99_vm1, %v19624_v24 }
 0x4af   :  { %11382 = vmatpush1.msra.mxu1 %v19419_v59  ;;  %12063 = vmatprep.subr.mxu0 %v19536_v35  ;;  %v20902_v35 = vld [vmem:[#allocation6_spill] sm:$0xff] }
 0x4b0   :  { %11634 = vmatprep.subr.mxu1 %v19774_v25  ;;  %11880 = vmatprep.mubr.f32.mxu0 %v20894_v54 }
 0x4b1   :  { %11198 = vmatprep.mubr.f32.mxu1 %v20894_v54  ;;  %16477 = vmatmul.mubr.msk.f32.gmra.mrb[8].mxu0 %vm99_vm1, %v16475_v39 }
 0x4b2   :  { %16455 = vmatmul.mubr.msk.f32.gmra.mrb[60].mxu1 %vm99_vm1, %v19644_v33  ;;  %17090 = vmatprep.mubr.msk.f32.mxu0 %vm99_vm1, %v16474_v1 }
 0x4b3   :  { %11445 = vmatprep.mubr.f32.mxu1 %v20894_v54 }
 0x4b5   :  { %17091 = vmatmul.mubr.msk.f32.vlgmr.msra.gmra.mrb[4].mxu0 %vm99_vm1, %v16475_v39 }
 0x4b6   :  { %12064 = vmatpush1.msra.mxu0 %v19251_v26  ;;  %16462 = vmatmul.mubr.msk.f32.vlgmr.msra.gmra.mrb[58].mxu1 %vm99_vm1, %v19676_v43  ;;  %v16490_v26 = vld [vmem:[%s20864_s3 + $0x100] sm:$0xff] }
 0x4b7   :  { %11635 = vmatpush1.msra.mxu1 %v19467_v4  ;;  %17093 = vmatprep.subr.mxu0 %v12055_v50 }
 0x4b8   :  { %11887 = vmatprep.subr.mxu1 %v19801_v48  ;;  %12127 = vmatprep.mubr.f32.mxu0 %v20894_v54 }
 0x4b9   :  { %11451 = vmatprep.mubr.f32.mxu1 %v20894_v54  ;;  %16484 = vmatmul.mubr.msk.f32.vlgmr.msra.gmra.mrb[6].mxu0 %vm99_vm1, %v16482_v60 }
 0x4ba   :  { %17094 = vmatpush3.msra.mxu0 %v12055_v50  ;;  %16463 = vmatmul.mubr.msk.f32.gmra.mrb[60].mxu1 %vm99_vm1, %v19694_v56 }
 0x4bb   :  { %12315 = vmatprep.subr.mxu0 %v19574_v52  ;;  %12133 = vmatprep.mubr.f32.mxu0 %v20894_v54  ;;  %v16531_v52 = vld [vmem:[%s20864_s3 + $0x158] sm:$0x3] }
 0x4bc   :  { %11698 = vmatprep.mubr.f32.mxu1 %v20894_v54 }
 0x4bd   :  { %16485 = vmatmul.mubr.msk.f32.gmra.mrb[8].mxu0 %vm99_vm1, %v16483_v12 }
 0x4be   :  { %16470 = vmatmul.mubr.msk.f32.vlgmr.msra.gmra.mrb[58].mxu1 %vm99_vm1, %v19716_v15  ;;  %17095 = vmatprep.mubr.msk.f32.mxu0 %vm99_vm1, %v16482_v60 }
 0x4bf   :  { %11888 = vmatpush1.msra.mxu1 %v19477_v21  ;;  %11704 = vmatprep.mubr.f32.mxu1 %v20894_v54 }
 0x4c0   :  { %12140 = vmatprep.subr.mxu1 %v19276_v36  ;;  %v16491_v36 = vld [vmem:[%s20864_s3 + $0x108] sm:$0x3] }
 0x4c1   :  { %17096 = vmatmul.mubr.msk.f32.vlgmr.msra.gmra.mrb[4].mxu0 %vm99_vm1, %v16483_v12 }
 0x4c2   :  { %12316 = vmatpush1.msra.mxu0 %v19292_v8  ;;  %16471 = vmatmul.mubr.msk.f32.gmra.mrb[60].mxu1 %vm99_vm1, %v16467_v55  ;;  %v16498_v8 = vld [vmem:[%s20864_s3 + $0x110] sm:$0xff] }
 0x4c3   :  { %17098 = vmatprep.subr.mxu0 %v12307_v10  ;;  %12379 = vmatprep.mubr.f32.mxu0 %v20894_v54 }
 0x4c4   :  { %11951 = vmatprep.mubr.f32.mxu1 %v20894_v54 }
 0x4c5   :  { %16492 = vmatmul.mubr.msk.f32.vlgmr.msra.gmra.mrb[6].mxu0 %vm99_vm1, %v16490_v26 }
 0x4c6   :  { %17099 = vmatpush3.msra.mxu0 %v12307_v10  ;;  %16478 = vmatmul.mubr.msk.f32.vlgmr.msra.gmra.mrb[58].mxu1 %vm99_vm1, %v16474_v1 }
 0x4c7   :  { %12141 = vmatpush1.msra.mxu1 %v19512_v57  ;;  %12567 = vmatprep.subr.mxu0 %v19616_v42  ;;  %v16514_v57 = vld [vmem:[%s20864_s3 + $0x130] sm:$0xff] }
 0x4c8   :  { %12392 = vmatprep.subr.mxu1 %v19318_v19  ;;  %12385 = vmatprep.mubr.f32.mxu0 %v20894_v54  ;;  %v20896_v19 = vld [vmem:[#allocation8_spill] sm:$0xff] }
 0x4c9   :  { %11957 = vmatprep.mubr.f32.mxu1 %v20894_v54  ;;  %16493 = vmatmul.mubr.msk.f32.gmra.mrb[8].mxu0 %vm99_vm1, %v16491_v36 }
 0x4ca   :  { %16479 = vmatmul.mubr.msk.f32.gmra.mrb[60].mxu1 %vm99_vm1, %v16475_v39  ;;  %17100 = vmatprep.mubr.msk.f32.mxu0 %vm99_vm1, %v16490_v26 }
 0x4cb   :  { %12204 = vmatprep.mubr.f32.mxu1 %v20894_v54 }
 0x4cd   :  { %17101 = vmatmul.mubr.msk.f32.vlgmr.msra.gmra.mrb[4].mxu0 %vm99_vm1, %v16491_v36 }
 0x4ce   :  { %12568 = vmatpush1.msra.mxu0 %v19339_v44  ;;  %16486 = vmatmul.mubr.msk.f32.vlgmr.msra.gmra.mrb[58].mxu1 %vm99_vm1, %v16482_v60  ;;  %v20898_v44 = vld [vmem:[#allocation9_spill] sm:$0xff] }
 0x4cf   :  { %12393 = vmatpush1.msra.mxu1 %v19549_v53  ;;  %17103 = vmatprep.subr.mxu0 %v12559_v2  ;;  %v20897_v53 = vld [vmem:[#allocation10_spill] sm:$0xff] }
 0x4d0   :  { %12644 = vmatprep.subr.mxu1 %v20896_v19  ;;  %12631 = vmatprep.mubr.f32.mxu0 %v20894_v54 }
 0x4d1   :  { %12210 = vmatprep.mubr.f32.mxu1 %v20894_v54  ;;  %16500 = vmatmul.mubr.msk.f32.vlgmr.msra.gmra.mrb[6].mxu0 %vm99_vm1, %v16498_v8 }
 0x4d2   :  { %17104 = vmatpush3.msra.mxu0 %v12559_v2  ;;  %16487 = vmatmul.mubr.msk.f32.gmra.mrb[60].mxu1 %vm99_vm1, %v16483_v12 }
 0x4d3   :  { %12819 = vmatprep.subr.mxu0 %v19654_v61  ;;  %12637 = vmatprep.mubr.f32.mxu0 %v20894_v54 }
 0x4d4   :  { %12456 = vmatprep.mubr.f32.mxu1 %v20894_v54 }
 0x4d5   :  { %16501 = vmatmul.mubr.msk.f32.gmra.mrb[8].mxu0 %vm99_vm1, %v16499_v5 }
 0x4d6   :  { %16494 = vmatmul.mubr.msk.f32.vlgmr.msra.gmra.mrb[58].mxu1 %vm99_vm1, %v16490_v26  ;;  %17105 = vmatprep.mubr.msk.f32.mxu0 %vm99_vm1, %v16498_v8 }
 0x4d7   :  { %12645 = vmatpush1.msra.mxu1 %v19592_v29  ;;  %12462 = vmatprep.mubr.f32.mxu1 %v20894_v54  ;;  %v16555_v29 = vld [vmem:[%s20864_s3 + $0x188] sm:$0x3] }
 0x4d8   :  { %12896 = vmatprep.subr.mxu1 %v20897_v53 }
 0x4d9   :  { %17106 = vmatmul.mubr.msk.f32.vlgmr.msra.gmra.mrb[4].mxu0 %vm99_vm1, %v16499_v5 }
 0x4da   :  { %12820 = vmatpush1.msra.mxu0 %v20898_v44  ;;  %16495 = vmatmul.mubr.msk.f32.gmra.mrb[60].mxu1 %vm99_vm1, %v16491_v36 }
 0x4db   :  { %17108 = vmatprep.subr.mxu0 %v19610_v16  ;;  %12883 = vmatprep.mubr.f32.mxu0 %v20894_v54 }
 0x4dc   :  { %12708 = vmatprep.mubr.f32.mxu1 %v20894_v54 }
 0x4dd   :  { %16508 = vmatmul.mubr.msk.f32.vlgmr.msra.gmra.mrb[6].mxu0 %vm99_vm1, %v16506_v22 }
 0x4de   :  { %17109 = vmatpush3.msra.mxu0 %v19610_v16  ;;  %16502 = vmatmul.mubr.msk.f32.vlgmr.msra.gmra.mrb[58].mxu1 %vm99_vm1, %v16498_v8  ;;  %v20900_v16 = vld [vmem:[#allocation11_spill] sm:$0xff] }
 0x4df   :  { %12897 = vmatpush1.msra.mxu1 %v19631_v27  ;;  %13071 = vmatprep.subr.mxu0 %v19686_v37 }
 0x4e0   :  { %13148 = vmatprep.subr.mxu1 %v20899_v7  ;;  %12889 = vmatprep.mubr.f32.mxu0 %v20894_v54 }
 0x4e1   :  { %12714 = vmatprep.mubr.f32.mxu1 %v20894_v54  ;;  %16509 = vmatmul.mubr.msk.f32.gmra.mrb[8].mxu0 %vm99_vm1, %v16507_v51 }
 0x4e2   :  { %16503 = vmatmul.mubr.msk.f32.gmra.mrb[60].mxu1 %vm99_vm1, %v16499_v5  ;;  %17110 = vmatprep.mubr.msk.f32.mxu0 %vm99_vm1, %v16506_v22 }
 0x4e3   :  { %12960 = vmatprep.mubr.f32.mxu1 %v20894_v54 }
 0x4e5   :  { %17111 = vmatmul.mubr.msk.f32.vlgmr.msra.gmra.mrb[4].mxu0 %vm99_vm1, %v16507_v51 }
 0x4e6   :  { %13072 = vmatpush1.msra.mxu0 %v20900_v16  ;;  %16510 = vmatmul.mubr.msk.f32.vlgmr.msra.gmra.mrb[58].mxu1 %vm99_vm1, %v16506_v22 }
 0x4e7   :  { %13149 = vmatpush1.msra.mxu1 %v19664_v40  ;;  %17113 = vmatprep.subr.mxu0 %v19606_v31 }
 0x4e8   :  { %13396 = vmatprep.subr.mxu1 %v19021_v13  ;;  %13135 = vmatprep.mubr.f32.mxu0 %v20894_v54  ;;  %v13563_v13 = vsel %vm690_vm3, %v19479_v47, %v13562_v46  ;;  %v16523_v47 = vld [vmem:[%s20864_s3 + $0x148] sm:$0x3] }
 0x4e9   :  { %12966 = vmatprep.mubr.f32.mxu1 %v20894_v54  ;;  %16516 = vmatmul.mubr.msk.f32.vlgmr.msra.gmra.mrb[6].mxu0 %vm99_vm1, %v16514_v57 }
 0x4ea   :  { %17114 = vmatpush3.msra.mxu0 %v19606_v31  ;;  %16511 = vmatmul.mubr.msk.f32.gmra.mrb[60].mxu1 %vm99_vm1, %v16507_v51 }
 0x4eb   :  { %13319 = vmatprep.subr.mxu0 %v19056_v18  ;;  %13141 = vmatprep.mubr.f32.mxu0 %v20894_v54  ;;  %v20901_v18 = vld [vmem:[#allocation5_spill] sm:$0xff] }
 0x4ec   :  { %13212 = vmatprep.mubr.f32.mxu1 %v20894_v54 }
 0x4ed   :  { %16517 = vmatmul.mubr.msk.f32.gmra.mrb[8].mxu0 %vm99_vm1, %v16515_v17 }
 0x4ee   :  { %16518 = vmatmul.mubr.msk.f32.vlgmr.msra.gmra.mrb[58].mxu1 %vm99_vm1, %v16514_v57  ;;  %17115 = vmatprep.mubr.msk.f32.mxu0 %vm99_vm1, %v16514_v57 }
 0x4ef   :  { %13397 = vmatpush1.msra.mxu1 %v18974_v41  ;;  %13218 = vmatprep.mubr.f32.mxu1 %v20894_v54  ;;  %v13815_v41 = vpop.permute.xlu0 %13814 }
 0x4f0   :  { %13649 = vmatprep.subr.mxu1 %v13563_v13  ;;  %v13816_v63 = vsel %vm1342_vm5, %v19494_v30, %v13815_v41  ;;  %v20903_v30 = vld [vmem:[#allocation7_spill] sm:$0xff]  ;;  %vm15040_vm5 = vcmask 1045504  }
 0x4f1   :  { %17116 = vmatmul.mubr.msk.f32.vlgmr.msra.gmra.mrb[4].mxu0 %vm99_vm1, %v16515_v17 }
 0x4f2   :  { %13320 = vmatpush1.msra.mxu0 %v20901_v18  ;;  %16519 = vmatmul.mubr.msk.f32.gmra.mrb[60].mxu1 %vm99_vm1, %v16515_v17  ;;  %v14734_v18 = vld [vmem:[%s20866_s5 + $0x80] sm:$0xff] }
 0x4f3   :  { %17118 = vmatprep.subr.mxu0 %v20902_v35  ;;  %13383 = vmatprep.mubr.f32.mxu0 %v20894_v54  ;;  %v14321_v32 = vpop.permute.xlu0 %14320 }
 0x4f4   :  { %13460 = vmatprep.mubr.f32.mxu1 %v20894_v54 }
 0x4f5   :  { %16524 = vmatmul.mubr.msk.f32.vlgmr.msra.gmra.mrb[6].mxu0 %vm99_vm1, %v16522_v62 }
 0x4f6   :  { %17119 = vmatpush3.msra.mxu0 %v20902_v35  ;;  %16526 = vmatmul.mubr.msk.f32.vlgmr.msra.gmra.mrb[58].mxu1 %vm99_vm1, %v16522_v62  ;;  %v14718_v35 = vld [vmem:[%s20866_s5] sm:$0xff] }
 0x4f7   :  { %13572 = vmatprep.subr.mxu0 %v19360_v58  ;;  %13650 = vmatpush1.msra.mxu1 %v19723_v34  ;;  %v16530_v58 = vld [vmem:[%s20864_s3 + $0x150] sm:$0xff]  ;;  %v14580_v34 = vpop.permute.xlu0 %14579 }
 0x4f8   :  { %13902 = vmatprep.subr.mxu1 %v13816_v63  ;;  %13389 = vmatprep.mubr.f32.mxu0 %v20894_v54  ;;  %v14736_v63 = vld [vmem:[%s20866_s5 + $0x90] sm:$0xff] }
 0x4f9   :  { %16525 = vmatmul.mubr.msk.f32.gmra.mrb[8].mxu0 %vm99_vm1, %v16523_v47  ;;  %13466 = vmatprep.mubr.f32.mxu1 %v20894_v54 }
 0x4fa   :  { %16527 = vmatmul.mubr.msk.f32.gmra.mrb[60].mxu1 %vm99_vm1, %v16523_v47  ;;  %17120 = vmatprep.mubr.msk.f32.mxu0 %vm99_vm1, %v16522_v62  ;;  %v14735_v62 = vld [vmem:[%s20866_s5 + $0x88] sm:$0xff] }
 0x4fb   :  { %13713 = vmatprep.mubr.f32.mxu1 %v20894_v54 }
 0x4fd   :  { %17121 = vmatmul.mubr.msk.f32.vlgmr.msra.gmra.mrb[4].mxu0 %vm99_vm1, %v16523_v47  ;;  %v14719_v47 = vld [vmem:[%s20866_s5 + $0x8] sm:$0xff] }
 0x4fe   :  { %13573 = vmatpush1.msra.mxu0 %v20903_v30  ;;  %16534 = vmatmul.mubr.msk.f32.vlgmr.msra.gmra.mrb[58].mxu1 %vm99_vm1, %v16530_v58 }
 0x4ff   :  { %17123 = vmatprep.subr.mxu0 %v13562_v46  ;;  %13903 = vmatpush1.msra.mxu1 %v19748_v23 }
 0x500   :  { %14155 = vmatprep.subr.mxu1 %v14069_v6  ;;  %13636 = vmatprep.mubr.f32.mxu0 %v20894_v54  ;;  %v14720_v6 = vld [vmem:[%s20866_s5 + $0x10] sm:$0xff] }
 0x501   :  { %16532 = vmatmul.mubr.msk.f32.vlgmr.msra.gmra.mrb[6].mxu0 %vm99_vm1, %v16530_v58  ;;  %13719 = vmatprep.mubr.f32.mxu1 %v20894_v54 }
 0x502   :  { %17124 = vmatpush3.msra.mxu0 %v13562_v46  ;;  %16535 = vmatmul.mubr.msk.f32.gmra.mrb[60].mxu1 %vm99_vm1, %v16531_v52 }
 0x503   :  { %13825 = vmatprep.subr.mxu0 %v19419_v59  ;;  %13642 = vmatprep.mubr.f32.mxu0 %v20894_v54  ;;  %v14322_v59 = vsel %vm9181_vm4, %v19560_v14, %v14321_v32  ;;  %v16546_v14 = vld [vmem:[%s20864_s3 + $0x170] sm:$0xff] }
 0x504   :  { %13966 = vmatprep.mubr.f32.mxu1 %v20894_v54 }
 0x505   :  { %16533 = vmatmul.mubr.msk.f32.gmra.mrb[8].mxu0 %vm99_vm1, %v16531_v52 }
 0x506   :  { %16542 = vmatmul.mubr.msk.f32.vlgmr.msra.gmra.mrb[58].mxu1 %vm99_vm1, %v16538_v9  ;;  %17125 = vmatprep.mubr.msk.f32.mxu0 %vm99_vm1, %v16530_v58  ;;  %v14737_v58 = vld [vmem:[%s20866_s5 + $0x98] sm:$0xff] }
 0x507   :  { %14156 = vmatpush1.msra.mxu1 %v19774_v25  ;;  %13972 = vmatprep.mubr.f32.mxu1 %v20894_v54  ;;  %v17185_v30 = vpack.c.bf16 %v14737_v58, %v14736_v63  ;;  %v14766_v63 = vld [vmem:[%s20866_s5 + $0x180] sm:$0xff]  ;;  %v14767_v58 = vld [vmem:[%s20866_s5 + $0x188] sm:$0xff] }
 0x508   :  { %14408 = vmatprep.subr.mxu1 %v14322_v59 }
 0x509   :  { %17126 = vmatmul.mubr.msk.f32.vlgmr.msra.gmra.mrb[4].mxu0 %vm99_vm1, %v16531_v52  ;;  %v14721_v52 = vld [vmem:[%s20866_s5 + $0x18] sm:$0xff] }
 0x50a   :  { %13826 = vmatpush1.msra.mxu0 %v19415_v49  ;;  %16543 = vmatmul.mubr.msk.f32.gmra.mrb[60].mxu1 %vm99_vm1, %v16539_v11  ;;  %v16547_v49 = vld [vmem:[%s20864_s3 + $0x178] sm:$0x3]  ;;  %v17187_v59 = vpack.c.bf16 %v14721_v52, %v14720_v6 }
 0x50b   :  { %17128 = vmatprep.subr.mxu0 %v13815_v41  ;;  %13889 = vmatprep.mubr.f32.mxu0 %v20894_v54 }
 0x50c   :  { %14219 = vmatprep.mubr.f32.mxu1 %v20894_v54 }
 0x50d   :  { %16540 = vmatmul.mubr.msk.f32.vlgmr.msra.gmra.mrb[6].mxu0 %vm99_vm1, %v16538_v9 }
 0x50e   :  { %17129 = vmatpush3.msra.mxu0 %v13815_v41  ;;  %16550 = vmatmul.mubr.msk.f32.vlgmr.msra.gmra.mrb[58].mxu1 %vm99_vm1, %v16546_v14  ;;  %v17181_v41 = vpack.c.bf16 %v14735_v62, %v14734_v18  ;;  %v14749_v18 = vld [vmem:[%s20866_s5 + $0xf8] sm:$0xff] }
 0x50f   :  { %14078 = vmatprep.subr.mxu0 %v19467_v4  ;;  %14409 = vmatpush1.msra.mxu1 %v19801_v48  ;;  %v16554_v4 = vld [vmem:[%s20864_s3 + $0x180] sm:$0xff] }
 0x510   :  { %13895 = vmatprep.mubr.f32.mxu0 %v20894_v54  ;;  %14225 = vmatprep.mubr.f32.mxu1 %v20894_v54 }
 0x511   :  { %16541 = vmatmul.mubr.msk.f32.gmra.mrb[8].mxu0 %vm99_vm1, %v16539_v11  ;;  %17182 = vmatprep.subr.bf16.mxu1 %v17181_v41  ;;  %v14733_v41 = vld [vmem:[%s20866_s5 + $0x78] sm:$0xff] }
 0x512   :  { %16551 = vmatmul.mubr.msk.f32.gmra.mrb[60].mxu1 %vm99_vm1, %v16547_v49  ;;  %17130 = vmatprep.mubr.msk.f32.mxu0 %vm99_vm1, %v16538_v9  ;;  %v14738_v9 = vld [vmem:[%s20866_s5 + $0xa0] sm:$0xff] }
 0x513   :  { %14472 = vmatprep.mubr.f32.mxu1 %v20894_v54  ;;  %v14575_v27 = vpop.permute.xlu1 %14574 }
 0x515   :  { %17131 = vmatmul.mubr.msk.f32.vlgmr.msra.gmra.mrb[4].mxu0 %vm99_vm1, %v16539_v11 }
 0x516   :  { %14079 = vmatpush1.msra.mxu0 %v19463_v3  ;;  %16558 = vmatmul.mubr.msk.f32.vlgmr.msra.gmra.mrb[58].mxu1 %vm99_vm1, %v16554_v4 }
 0x517   :  { %17133 = vmatprep.subr.mxu0 %v14068_v20  ;;  %14142 = vmatprep.mubr.f32.mxu0 %v20894_v54 }
 0x518   :  { %14478 = vmatprep.mubr.f32.mxu1 %v20894_v54 }
 0x519   :  { %16548 = vmatmul.mubr.msk.f32.vlgmr.msra.gmra.mrb[6].mxu0 %vm99_vm1, %v16546_v14 }
 0x51a   :  { %17134 = vmatpush3.msra.mxu0 %v14068_v20  ;;  %16559 = vmatmul.mubr.msk.f32.gmra.mrb[60].mxu1 %vm99_vm1, %v16555_v29  ;;  %v17183_v20 = vpack.c.bf16 %v14719_v47, %v14718_v35  ;;  %v14732_v35 = vld [vmem:[%s20866_s5 + $0x70] sm:$0xff] }
 0x51b   :  { %14331 = vmatprep.subr.mxu0 %v19477_v21  ;;  %14148 = vmatprep.mubr.f32.mxu0 %v20894_v54  ;;  %v17211_v47 = vpack.c.bf16 %v14733_v41, %v14732_v35 }
 0x51c   :  { %17184 = vmatpush3.bf16.msra.mxu1 %v17183_v20 }
 0x51d   :  { %16549 = vmatmul.mubr.msk.f32.gmra.mrb[8].mxu0 %vm99_vm1, %v16547_v49  ;;  %17186 = vmatprep.subr.bf16.mxu1 %v17185_v30  ;;  %v17213_v30 = vpack.c.bf16 %v14767_v58, %v14766_v63 }
 0x51e   :  { %17135 = vmatprep.mubr.msk.f32.mxu0 %vm99_vm1, %v16546_v14  ;;  %v8235_v3 = vpop.f32.mrb[54].mxu1  ;;  %v14722_v14 = vld [vmem:[%s20866_s5 + $0x20] sm:$0xff] }
 0x51f   :  { %v8237_v38 = vpop.f32.mrb[55].mxu1 }
 0x520   :  { %17188 = vmatpush3.bf16.msra.mxu1 %v17187_v59 }
 0x521   :  { %17136 = vmatmul.mubr.msk.f32.vlgmr.msra.gmra.mrb[4].mxu0 %vm99_vm1, %v16547_v49  ;;  %v14723_v49 = vld [vmem:[%s20866_s5 + $0x28] sm:$0xff] }
 0x522   :  { %14332 = vmatpush1.msra.mxu0 %v19492_v0  ;;  %14395 = vmatprep.mubr.f32.mxu0 %v20894_v54  ;;  %v8241_v28 = vpop.f32.mrb[56].mxu1 }
 0x523   :  { %17138 = vmatprep.subr.mxu0 %v14321_v32  ;;  %v8243_v31 = vpop.f32.mrb[57].mxu1 }
 0x525   :  { %16556 = vmatmul.mubr.msk.f32.vlgmr.msra.gmra.mrb[6].mxu0 %vm99_vm1, %v16554_v4 }
 0x526   :  { %17139 = vmatpush3.msra.mxu0 %v14321_v32  ;;  %14401 = vmatprep.mubr.f32.mxu0 %v20894_v54  ;;  %v14739_v32 = vld [vmem:[%s20866_s5 + $0xa8] sm:$0xff] }
 0x527   :  { %v17189_v11 = vpack.c.bf16 %v14739_v32, %v14738_v9 }
 0x529   :  { %16557 = vmatmul.mubr.msk.f32.gmra.mrb[8].mxu0 %vm99_vm1, %v16555_v29  ;;  %17190 = vmatprep.subr.bf16.mxu1 %v17189_v11 }
 0x52a   :  { %17140 = vmatprep.mubr.msk.f32.mxu0 %vm99_vm1, %v16554_v4  ;;  %v14740_v4 = vld [vmem:[%s20866_s5 + $0xb0] sm:$0xff] }
 0x52d   :  { %17141 = vmatmul.mubr.msk.f32.vlgmr.msra.gmra.mrb[4].mxu0 %vm99_vm1, %v16555_v29  ;;  %v14741_v29 = vld [vmem:[%s20866_s5 + $0xb8] sm:$0xff]  ;;  %vm14792_vm1 = vcmask 1044480  }
 0x5e9   :  { %v14474_v21 = vpop.f32.mrb[58].mxu1 }
 0x5ea   :  { %v14476_v42 = vpop.f32.mrb[59].mxu1  ;;  %v20030_v56 = vadd.f32 %v14575_v27, %v14474_v21  ;;  %v14742_v21 = vld [vmem:[%s20866_s5 + $0xc0] sm:$0xff] }
 0x5eb   :  { %v20028_v61 = vadd.f32 %v14575_v27, %v14476_v42  ;;  %v14743_v42 = vld [vmem:[%s20866_s5 + $0xc8] sm:$0xff] }
 0x5ec   :  { %v14594_v12 = vmax.f32 %v20030_v56, 0.0 }
 0x5ed   :  { %v14480_v24 = vpop.f32.mrb[60].mxu1  ;;  %v14595_v1 = vmax.f32 %v20028_v61, 0.0 }
 0x5ee   :  { %v14482_v0 = vpop.f32.mrb[61].mxu1  ;;  %v20040_v60 = vadd.f32 %v14580_v34, %v14480_v24 }
 0x5ef   :  { %v20037_v39 = vadd.f32 %v14580_v34, %v14482_v0  ;;  %v17197_v0 = vpack.c.bf16 %v14743_v42, %v14742_v21 }
 0x5f0   :  { %v14599_v22 = vmax.f32 %v20040_v60, 0.0 }
 0x5f1   :  { %v14600_v5 = vmax.f32 %v20037_v39, 0.0 }
 0x5f8   :  { %v14397_v33 = vpop.f32.mrb[6].mxu0 }
 0x5f9   :  { %v17405_v40 = vadd.f32 %v14397_v33, %v8235_v3  ;;  %v14399_v43 = vpop.f32.mrb[7].mxu0  ;;  %v17191_v3 = vpack.c.bf16 %v14723_v49, %v14722_v14  ;;  %v14727_v33 = vld [vmem:[%s20866_s5 + $0x48] sm:$0xff] }
 0x5fa   :  { %v17406_v37 = vadd.f32 %v14399_v43, %v8237_v38  ;;  %v17193_v38 = vpack.c.bf16 %v14741_v29, %v14740_v4  ;;  %v14745_v43 = vld [vmem:[%s20866_s5 + $0xd8] sm:$0xff] }
 0x5fb   :  { %v20032_v15 = vadd.f32 %v17405_v40, %v14575_v27  ;;  %17192 = vmatpush3.bf16.msra.mxu1 %v17191_v3  ;;  %v14744_v40 = vld [vmem:[%s20866_s5 + $0xd0] sm:$0xff] }
 0x5fc   :  { %v20034_v55 = vadd.f32 %v17406_v37, %v14575_v27  ;;  %v14403_v23 = vpop.f32.mrb[8].mxu0  ;;  %17194 = vmatprep.subr.bf16.mxu1 %v17193_v38 }
 0x5fd   :  { %v14592_v25 = vmax.f32 %v20032_v15, 0.0  ;;  %v17407_v45 = vadd.f32 %v14403_v23, %v8241_v28  ;;  %v14405_v50 = vpop.f32.mrb[9].mxu0  ;;  %v14724_v28 = vld [vmem:[%s20866_s5 + $0x30] sm:$0xff] }
 0x5fe   :  { %v14593_v48 = vmax.f32 %v20034_v55, 0.0  ;;  %v17408_v10 = vadd.f32 %v14405_v50, %v8243_v31  ;;  %v14725_v31 = vld [vmem:[%s20866_s5 + $0x38] sm:$0xff]  ;;  %v14728_v23 = vld [vmem:[%s20866_s5 + $0x50] sm:$0xff]  ;;  %v14746_v50 = vld [vmem:[%s20866_s5 + $0xe0] sm:$0xff] }
 0x5ff   :  { %v17845_v26 = vpack.i.bf16 %v14592_v25, %v14595_v1  ;;  %v20048_v36 = vadd.f32 %v17407_v45, %v14580_v34  ;;  %v17195_v24 = vpack.c.bf16 %v14725_v31, %v14724_v28  ;;  %v14729_v45 = vld [vmem:[%s20866_s5 + $0x58] sm:$0xff] }
 0x600   :  { %v17840_v2 = vpack.i.bf16 %v14594_v12, %v14593_v48  ;;  %v20054_v8 = vadd.f32 %v17408_v10, %v14580_v34  ;;  %v17142_v19 = vpop.f32.mrb[4].mxu0  ;;  %v14747_v10 = vld [vmem:[%s20866_s5 + $0xe8] sm:$0xff] }
 0x601   :  { %v14597_v53 = vmax.f32 %v20048_v36, 0.0  ;;  %v14551_v44 = vpop.f32.mrb[5].mxu0  ;;  %17846 = vrot.lane.b32.xlu0 %v17845_v26, %s17909_s30  ;;  %v20066_v16 = vadd.f32 %v17142_v19, %v14580_v34  ;;  %17196 = vmatpush3.bf16.msra.mxu1 %v17195_v24  ;;  %v17201_v34 = vpack.c.bf16 %v14745_v43, %v14744_v40  ;;  %v17203_v26 = vpack.c.bf16 %v14729_v45, %v14728_v23  ;;  %v14730_v19 = vld [vmem:[%s20866_s5 + $0x60] sm:$0xff] }
 0x602   :  { %v14598_v51 = vmax.f32 %v20054_v8, 0.0  ;;  %17841 = vrot.lane.b32.xlu1 %v17840_v2, %s17909_s30  ;;  %v20072_v17 = vadd.f32 %v14575_v27, %v14551_v44  ;;  %v14726_v27 = vld [vmem:[%s20866_s5 + $0x40] sm:$0xff]  ;;  %17198 = vmatprep.subr.bf16.mxu1 %v17197_v0  ;;  %v17205_v2 = vpack.c.bf16 %v14747_v10, %v14746_v50  ;;  %v14731_v44 = vld [vmem:[%s20866_s5 + $0x68] sm:$0xff] }
 0x603   :  { %v17850_v7 = vpack.i.bf16 %v14597_v53, %v14600_v5  ;;  %v14601_v46 = vmax.f32 %v20066_v16, 0.0  ;;  %v17199_v37 = vpack.c.bf16 %v14727_v33, %v14726_v27 }
 0x604   :  { %v17855_v57 = vpack.i.bf16 %v14599_v22, %v14598_v51  ;;  %v14596_v13 = vmax.f32 %v20072_v17, 0.0  ;;  %v14768_v17 = vld [vmem:[%s20866_s5 + $0x190] sm:$0xff] }
 0x605   :  { %17851 = vrot.lane.b32.xlu0 %v17850_v7, %s17909_s30  ;;  %17200 = vmatpush3.bf16.msra.mxu1 %v17199_v37  ;;  %v17207_v7 = vpack.c.bf16 %v14731_v44, %v14730_v19  ;;  %v14752_v44 = vld [vmem:[%s20866_s5 + $0x110] sm:$0xff] }
 0x606   :  { %17856 = vrot.lane.b32.xlu1 %v17855_v57, %s17909_s30  ;;  %17202 = vmatprep.subr.bf16.mxu1 %v17201_v34  ;;  %v14748_v57 = vld [vmem:[%s20866_s5 + $0xf0] sm:$0xff] }
 0x607   :  { %v17209_v62 = vpack.c.bf16 %v14749_v18, %v14748_v57  ;;  %v14770_v18 = vld [vmem:[%s20866_s5 + $0x1a0] sm:$0xff] }
 0x609   :  { %14630 = vrot.lane.b32.xlu0 %v14601_v46, %s17909_s30  ;;  %17204 = vmatpush3.bf16.msra.mxu1 %v17203_v26 }
 0x60a   :  { %14620 = vrot.lane.b32.xlu1 %v14596_v13, %s17909_s30  ;;  %17206 = vmatprep.subr.bf16.mxu1 %v17205_v2 }
 0x60d   :  { %17208 = vmatpush3.bf16.msra.mxu1 %v17207_v7  ;;  %v14753_v7 = vld [vmem:[%s20866_s5 + $0x118] sm:$0xff] }
 0x60e   :  { %17210 = vmatprep.subr.bf16.mxu1 %v17209_v62  ;;  %v14771_v62 = vld [vmem:[%s20866_s5 + $0x1a8] sm:$0xff] }
 0x611   :  { %17212 = vmatpush3.bf16.msra.mxu1 %v17211_v47 }
 0x612   :  { %17214 = vmatprep.subr.bf16.mxu1 %v17213_v30 }
 0x673   :  { %v17847_v20 = vpop.permute.xlu0 %17846 }
 0x674   :  { %v17849_v6 = vunpack.i.h.bf16 %v17847_v20  ;;  %v17848_v52 = vunpack.i.l.bf16 %v17847_v20  ;;  %v17842_v9 = vpop.permute.xlu1 %17841  ;;  %v17219_v20 = vpack.c.bf16 %v14753_v7, %v14752_v44 }
 0x675   :  { %v17844_v32 = vunpack.i.h.bf16 %v17842_v9  ;;  %v17843_v59 = vunpack.i.l.bf16 %v17842_v9  ;;  %v14754_v9 = vld [vmem:[%s20866_s5 + $0x120] sm:$0xff] }
 0x677   :  { %v14634_v11 = vsel %vm690_vm3, %v17844_v32, %v17848_v52  ;;  %v14632_v14 = vsel %vm690_vm3, %v17849_v6, %v17843_v59  ;;  %v14633_v49 = vsel %vm690_vm3, %v17843_v59, %v17844_v32  ;;  %v17852_v4 = vpop.permute.xlu0 %17851  ;;  %v14755_v32 = vld [vmem:[%s20866_s5 + $0x128] sm:$0xff] }
 0x678   :  { %v20191_v29 = vmax.f32 %v14594_v12, %v14634_v11  ;;  %v14650_v3 = vmax.f32 %v14592_v25, %v14632_v14  ;;  %v14651_v38 = vmax.f32 %v14593_v48, %v14633_v49  ;;  %v17854_v28 = vunpack.i.h.bf16 %v17852_v4  ;;  %v17857_v31 = vpop.permute.xlu1 %17856  ;;  %v14772_v14 = vld [vmem:[%s20866_s5 + $0x1b0] sm:$0xff]  ;;  %v14773_v49 = vld [vmem:[%s20866_s5 + $0x1b8] sm:$0xff] }
 0x679   :  { %v17853_v21 = vunpack.i.l.bf16 %v17852_v4  ;;  %v17859_v42 = vunpack.i.h.bf16 %v17857_v31  ;;  %v17858_v24 = vunpack.i.l.bf16 %v17857_v31  ;;  %v17223_v4 = vpack.c.bf16 %v14755_v32, %v14754_v9  ;;  %v14774_v31 = vld [vmem:[%s20866_s5 + $0x1c0] sm:$0xff] }
 0x67a   :  { %14670 = vrot.lane.b32.xlu0 %v14650_v3, %s17918_s29  ;;  %v17860_v0 = vpack.i.bf16 %v20191_v29, %v14651_v38  ;;  %v16055_v9 = vld [vmem:[%s20871_s10 + $0xc0] sm:$0xff] }
 0x67b   :  { %v14638_v27 = vsel %vm690_vm3, %v17859_v42, %v17853_v21  ;;  %v14636_v56 = vsel %vm690_vm3, %v17854_v28, %v17858_v24  ;;  %v14637_v12 = vsel %vm690_vm3, %v17858_v24, %v17859_v42  ;;  %v14631_v33 = vpop.permute.xlu0 %14630  ;;  %v14757_v28 = vld [vmem:[%s20866_s5 + $0x138] sm:$0xff] }
 0x67c   :  { %v20204_v15 = vmax.f32 %v14599_v22, %v14638_v27  ;;  %v14656_v55 = vmax.f32 %v14598_v51, %v14637_v12  ;;  %v14621_v25 = vpop.permute.xlu1 %14620  ;;  %17861 = vrot.lane.b32.xlu1 %v17860_v0, %s17918_s29  ;;  %v14655_v43 = vmax.f32 %v14597_v53, %v14636_v56  ;;  %v14639_v8 = vsel %vm690_vm3, %v17853_v21, %v14631_v33  ;;  %v14751_v51 = vld [vmem:[%s20866_s5 + $0x108] sm:$0xff]  ;;  %v14758_v0 = vld [vmem:[%s20866_s5 + $0x140] sm:$0xff]  ;;  %v14776_v56 = vld [vmem:[%s20866_s5 + $0x1d0] sm:$0xff] }
 0x67d   :  { %v14635_v48 = vsel %vm690_vm3, %v17848_v52, %v14621_v25  ;;  %v20219_v22 = vmax.f32 %v14596_v13, %v14621_v25  ;;  %v20224_v61 = vmax.f32 %v14600_v5, %v14639_v8  ;;  %v14750_v5 = vld [vmem:[%s20866_s5 + $0x100] sm:$0xff]  ;;  %v17221_v52 = vpack.c.bf16 %v14771_v62, %v14770_v18  ;;  %v14775_v21 = vld [vmem:[%s20866_s5 + $0x1c8] sm:$0xff]  ;;  %v14777_v12 = vld [vmem:[%s20866_s5 + $0x1d8] sm:$0xff] }
 0x67e   :  { %v14653_v40 = vmax.f32 %v14595_v1, %v14635_v48  ;;  %v17865_v37 = vpack.i.bf16 %v20204_v15, %v14656_v55  ;;  %v20230_v1 = vmax.f32 %v14601_v46, %v14631_v33  ;;  %v14769_v46 = vld [vmem:[%s20866_s5 + $0x198] sm:$0xff]  ;;  %v17215_v10 = vpack.c.bf16 %v14751_v51, %v14750_v5  ;;  %v14759_v27 = vld [vmem:[%s20866_s5 + $0x148] sm:$0xff]  ;;  %v14760_v48 = vld [vmem:[%s20866_s5 + $0x150] sm:$0xff] }
 0x67f   :  { %v17217_v19 = vpack.c.bf16 %v14769_v46, %v14768_v17  ;;  %v17229_v24 = vpack.c.bf16 %v14775_v21, %v14774_v31  ;;  %v17233_v25 = vpack.c.bf16 %v14777_v12, %v14776_v56  ;;  %v14761_v33 = vld [vmem:[%s20866_s5 + $0x158] sm:$0xff]  ;;  %v14762_v8 = vld [vmem:[%s20866_s5 + $0x160] sm:$0xff]  ;;  %v14780_v5 = vld [vmem:[%s20866_s5 + $0x1f0] sm:$0xff]  ;;  %vm14785_vm3 = vcmask 171008  }
 0x680   :  { %v17870_v60 = vpack.i.bf16 %v14653_v40, %v14655_v43  ;;  %17866 = vrot.lane.b32.xlu1 %v17865_v37, %s17918_s29  ;;  %v17235_v37 = vpack.c.bf16 %v14761_v33, %v14760_v48  ;;  %v14781_v51 = vld [vmem:[%s20866_s5 + $0x1f8] sm:$0xff]  ;;  %v14764_v46 = vld [vmem:[%s20866_s5 + $0x170] sm:$0xff]  ;;  %v16040_v48 = vld [vmem:[%s20871_s10 + $0x48] sm:$0xff] }
 0x681   :  { %v17241_v17 = vpack.c.bf16 %v14781_v51, %v14780_v5  ;;  %v16034_v31 = vld [vmem:[%s20871_s10 + $0x18] sm:$0xff] }
 0x682   :  { %17871 = vrot.lane.b32.xlu0 %v17870_v60, %s17918_s29  ;;  %v16038_v56 = vld [vmem:[%s20871_s10 + $0x38] sm:$0xff] }
 0x684   :  { %14678 = vrot.lane.b32.xlu1 %v20219_v22, %s17918_s29 }
 0x686   :  { %14686 = vrot.lane.b32.xlu0 %v20224_v61, %s17918_s29 }
 0x688   :  { %14688 = vrot.lane.b32.xlu1 %v20230_v1, %s17918_s29 }
 0x6ec   :  { %v14671_v16 = vpop.permute.xlu0 %14670 }
 0x6ee   :  { %v20236_v36 = vpop.permute.xlu1 %17861 }
 0x6ef   :  { %v17864_v53 = vunpack.i.h.bf16 %v20236_v36  ;;  %v17863_v39 = vunpack.i.l.bf16 %v20236_v36 }
 0x6f1   :  { %v14690_v13 = vsel %vm3298_vm11, %v14671_v16, %v17863_v39  ;;  %v14691_v34 = vsel %vm3298_vm11, %v17863_v39, %v17864_v53  ;;  %v14763_v39 = vld [vmem:[%s20866_s5 + $0x168] sm:$0xff] }
 0x6f2   :  { %v14708_v23 = vmax.f32 %v14650_v3, %v14690_v13  ;;  %v20256_v45 = vpop.permute.xlu1 %17866  ;;  %v14709_v50 = vmax.f32 %v14651_v38, %v14691_v34  ;;  %v17225_v3 = vpack.c.bf16 %v14773_v49, %v14772_v14  ;;  %v14756_v38 = vld [vmem:[%s20866_s5 + $0x130] sm:$0xff]  ;;  %v17239_v16 = vpack.c.bf16 %v14763_v39, %v14762_v8  ;;  %v14765_v13 = vld [vmem:[%s20866_s5 + $0x178] sm:$0xff]  ;;  %v14782_v34 = vld [vmem:[%s20866_s5 + $0x200] sm:$0xff] }
 0x6f3   :  { %v17869_v26 = vunpack.i.h.bf16 %v20256_v45  ;;  %v17868_v2 = vunpack.i.l.bf16 %v20256_v45  ;;  %v17227_v42 = vpack.c.bf16 %v14757_v28, %v14756_v38  ;;  %v16031_v49 = vld [vmem:[%s20871_s10] sm:$0xff]  ;;  %v17934_v38 = vmov 0.0|0.0  }
 0x6f4   :  { %14860 = vmatprep.mubr.f32.mxu1 %v14709_v50  ;;  %v20266_v57 = vpop.permute.xlu0 %17871  ;;  %17349 = vmatprep.subr.bf16.mxu0 %v17934_v38 }
 0x6f5   :  { %v17874_v35 = vunpack.i.h.bf16 %v20266_v57  ;;  %v17873_v41 = vunpack.i.l.bf16 %v20266_v57  ;;  %14861 = vmatmul.mubr.f32.vlgmr.msra.gmra.mrb[62].mxu1 %v14708_v23  ;;  %v14695_v47 = vsel %vm3298_vm11, %v17868_v2, %v17869_v26  ;;  %v14783_v23 = vld [vmem:[%s20866_s5 + $0x208] sm:$0xff]  ;;  %v14784_v57 = vld [vmem:[%s20866_s5 + $0x210] sm:$0x1f] }
 0x6f6   :  { %17216 = vmatpush3.bf16.msra.mxu1 %v17215_v10  ;;  %v20279_v63 = vpop.permute.xlu1 %14678  ;;  %v14714_v58 = vmax.f32 %v14656_v55, %v14695_v47  ;;  %v17231_v55 = vpack.c.bf16 %v14759_v27, %v14758_v0  ;;  %v17243_v10 = vpack.c.bf16 %v14765_v13, %v14764_v46  ;;  %v15021_v47 = vld [vmem:[%s20867_s6] sm:$0x1]  ;;  %v16037_v27 = vld [vmem:[%s20871_s10 + $0x30] sm:$0xff] }
 0x6f7   :  { %v14693_v30 = vsel %vm3298_vm11, %v17874_v35, %v20279_v63  ;;  %17218 = vmatprep.subr.bf16.mxu1 %v17217_v19  ;;  %v14694_v6 = vsel %vm3298_vm11, %v17873_v41, %v17868_v2  ;;  %v17245_v2 = vpack.c.bf16 %v14783_v23, %v14782_v34  ;;  %v14692_v19 = vsel %vm3298_vm11, %v17864_v53, %v17874_v35  ;;  %v15023_v53 = vld [vmem:[%s20869_s8 + $0x8] sm:$0x3f]  ;;  %v15120_v35 = vld [vmem:[%s20868_s7 + $0x10] sm:$0xff]  ;;  %v16046_v34 = vld [vmem:[%s20871_s10 + $0x78] sm:$0xff] }
 0x6f8   :  { %v14711_v59 = vmax.f32 %v14653_v40, %v14693_v30  ;;  %14865 = vmatprep.mubr.f32.mxu1 %v14714_v58  ;;  %v14713_v11 = vmax.f32 %v14655_v43, %v14694_v6  ;;  %v14778_v40 = vld [vmem:[%s20866_s5 + $0x1e0] sm:$0xff]  ;;  %v14779_v43 = vld [vmem:[%s20866_s5 + $0x1e8] sm:$0xff]  ;;  %v14687_v44 = vpop.permute.xlu0 %14686  ;;  %v14710_v18 = vmax.f32 %v20191_v29, %v14692_v19  ;;  %v14712_v29 = vmax.f32 %v20219_v22, %v20279_v63  ;;  %v15121_v22 = vld [vmem:[%s20868_s7 + $0x18] sm:$0xff] }
 0x6f9   :  { %v17237_v60 = vpack.c.bf16 %v14779_v43, %v14778_v40  ;;  %v14696_v62 = vsel %vm3298_vm11, %v17869_v26, %v14687_v44  ;;  %v15118_v26 = vld [vmem:[%s20868_s7] sm:$0xff]  ;;  %v15123_v58 = vld [vmem:[%s20868_s7 + $0x28] sm:$0xff]  ;;  %v17359_v12 = vpack.c.bf16 %v16038_v56, %v16037_v27  ;;  %v16045_v13 = vld [vmem:[%s20871_s10 + $0x70] sm:$0xff] }
 0x6fa   :  { %17220 = vmatpush3.bf16.msra.mxu1 %v17219_v20  ;;  %v14689_v50 = vpop.permute.xlu1 %14688  ;;  %v14715_v36 = vmax.f32 %v20204_v15, %v14696_v62  ;;  %v15119_v15 = vld [vmem:[%s20868_s7 + $0x8] sm:$0xff]  ;;  %v17251_v63 = vpack.c.bf16 %v15120_v35, %v15118_v26  ;;  %v15125_v20 = vld [vmem:[%s20868_s7 + $0x38] sm:$0x1]  ;;  %v15122_v6 = vld [vmem:[%s20868_s7 + $0x20] sm:$0xff]  ;;  %v17371_v23 = vpack.c.bf16 %v16046_v34, %v16045_v13 }
 0x6fb   :  { %14866 = vmatmul.mubr.f32.gmra.mrb[64].mxu1 %v14713_v11  ;;  %17222 = vmatprep.subr.bf16.mxu1 %v17221_v52  ;;  %v14697_v7 = vsel %vm3298_vm11, %v14687_v44, %v14689_v50  ;;  %v17249_v45 = vpack.c.bf16 %v15121_v22, %v15119_v15  ;;  %vm15036_vm11 = vcmask 48128   ;;  %v17253_v30 = vpack.c.bf16 %v15125_v20, %v15123_v58  ;;  %v15124_v52 = vld [vmem:[%s20868_s7 + $0x30] sm:$0x1]  ;;  %v16574_v11 = vld [vmem:[%s20868_s7 + $0x58] sm:$0xff]  ;;  %v16052_v62 = vld [vmem:[%s20871_s10 + $0xa8] sm:$0xff] }
 0x6fc   :  { %14935 = vmatprep.mubr.f32.mxu1 %v14711_v59  ;;  %v14716_v41 = vmax.f32 %v20224_v61, %v14697_v7  ;;  %v14717_v61 = vmax.f32 %v20230_v1, %v14689_v50  ;;  %v15022_v1 = vld [vmem:[%s20869_s8] sm:$0x3f]  ;;  %v17256_v32 = vpack.c.bf16 %v15124_v52, %v15122_v6  ;;  %v16572_v59 = vld [vmem:[%s20868_s7 + $0x48] sm:$0xff]  ;;  %v16049_v19 = vld [vmem:[%s20871_s10 + $0x90] sm:$0xff] }
 0x6fd   :  { %v17259_v14 = vpack.c.bf16 %v16574_v11, %v16572_v59  ;;  %v16047_v50 = vld [vmem:[%s20871_s10 + $0x80] sm:$0xff]  ;;  %v16050_v44 = vld [vmem:[%s20871_s10 + $0x98] sm:$0xff]  ;;  %v16576_v26 = vld [vmem:[%s20868_s7 + $0x68] sm:$0xff] }
 0x6fe   :  { %17224 = vmatpush3.bf16.msra.mxu1 %v17223_v4  ;;  %v16032_v4 = vld [vmem:[%s20871_s10 + $0x8] sm:$0xff]  ;;  %v17377_v7 = vpack.c.bf16 %v16050_v44, %v16049_v19  ;;  %v16578_v35 = vld [vmem:[%s20868_s7 + $0x78] sm:$0x1]  ;;  %v16577_v59 = vld [vmem:[%s20868_s7 + $0x70] sm:$0x1] }
 0x6ff   :  { %17226 = vmatprep.subr.bf16.mxu1 %v17225_v3  ;;  %v16033_v3 = vld [vmem:[%s20871_s10 + $0x10] sm:$0xff]  ;;  %v17350_v28 = vpack.c.bf16 %v16032_v4, %v16031_v49  ;;  %v17263_v52 = vpack.c.bf16 %v16578_v35, %v16576_v26  ;;  %v16583_v11 = vld [vmem:[%s20868_s7 + $0x88] sm:$0xff]  ;;  %v16586_v27 = vld [vmem:[%s20868_s7 + $0xa0] sm:$0xff] }
 0x700   :  { %v17353_v21 = vpack.c.bf16 %v16034_v31, %v16033_v3  ;;  %v16582_v3 = vld [vmem:[%s20868_s7 + $0x80] sm:$0xff]  ;;  %v16587_v31 = vld [vmem:[%s20868_s7 + $0xa8] sm:$0xff]  ;;  %v16588_v56 = vld [vmem:[%s20868_s7 + $0xb0] sm:$0x1] }
 0x701   :  { %17351 = vmatpush1.bf16.msra.mxu0 %v17350_v28  ;;  %v16584_v28 = vld [vmem:[%s20868_s7 + $0x90] sm:$0xff]  ;;  %v16604_v34 = vld [vmem:[%s20868_s7 + $0x100] sm:$0xff] }
 0x702   :  { %17228 = vmatpush3.bf16.msra.mxu1 %v17227_v42  ;;  %17352 = vmatprep.subr.bf16.mxu0 %v17934_v38  ;;  %v16035_v42 = vld [vmem:[%s20871_s10 + $0x20] sm:$0xff]  ;;  %v16621_v35 = vld [vmem:[%s20868_s7 + $0x170] sm:$0x1] }
 0x703   :  { %17230 = vmatprep.subr.bf16.mxu1 %v17229_v24  ;;  %v16036_v24 = vld [vmem:[%s20871_s10 + $0x28] sm:$0xff]  ;;  %v16619_v26 = vld [vmem:[%s20868_s7 + $0x160] sm:$0xff] }
 0x704   :  { %v17356_v0 = vpack.c.bf16 %v16036_v24, %v16035_v42  ;;  %v17271_v42 = vpack.c.bf16 %v16584_v28, %v16582_v3  ;;  %v16630_v3 = vld [vmem:[%s20868_s7 + $0x1a0] sm:$0xff]  ;;  %v16632_v28 = vld [vmem:[%s20868_s7 + $0x1b0] sm:$0x1] }
 0x705   :  { %17354 = vmatpush1.bf16.msra.mxu0 %v17353_v21  ;;  %v16589_v21 = vld [vmem:[%s20868_s7 + $0xb8] sm:$0x1] }
 0x706   :  { %17232 = vmatpush3.bf16.msra.mxu1 %v17231_v55  ;;  %17355 = vmatprep.subr.bf16.mxu0 %v17934_v38 }
 0x707   :  { %17234 = vmatprep.subr.bf16.mxu1 %v17233_v25  ;;  %v16039_v25 = vld [vmem:[%s20871_s10 + $0x40] sm:$0xff] }
 0x708   :  { %v17362_v43 = vpack.c.bf16 %v16040_v48, %v16039_v25  ;;  %v17276_v25 = vpack.c.bf16 %v16588_v56, %v16586_v27  ;;  %v16639_v27 = vld [vmem:[%s20868_s7 + $0x1d0] sm:$0xff]  ;;  %v16642_v56 = vld [vmem:[%s20868_s7 + $0x1e8] sm:$0xff] }
 0x709   :  { %17357 = vmatpush1.bf16.msra.mxu0 %v17356_v0  ;;  %v17273_v0 = vpack.c.bf16 %v16589_v21, %v16587_v31  ;;  %v16638_v31 = vld [vmem:[%s20868_s7 + $0x1c8] sm:$0xff]  ;;  %v16640_v21 = vld [vmem:[%s20868_s7 + $0x1d8] sm:$0xff] }
 0x70a   :  { %17236 = vmatpush3.bf16.msra.mxu1 %v17235_v37  ;;  %17358 = vmatprep.subr.bf16.mxu0 %v17934_v38  ;;  %v16041_v37 = vld [vmem:[%s20871_s10 + $0x50] sm:$0xff] }
 0x70b   :  { %17238 = vmatprep.subr.bf16.mxu1 %v17237_v60  ;;  %v16042_v60 = vld [vmem:[%s20871_s10 + $0x58] sm:$0xff] }
 0x70c   :  { %v17365_v5 = vpack.c.bf16 %v16042_v60, %v16041_v37  ;;  %v16600_v37 = vld [vmem:[%s20868_s7 + $0xf8] sm:$0x1] }
 0x70d   :  { %17360 = vmatpush1.bf16.msra.mxu0 %v17359_v12  ;;  %v16594_v12 = vld [vmem:[%s20868_s7 + $0xc8] sm:$0xff] }
 0x70e   :  { %17240 = vmatpush3.bf16.msra.mxu1 %v17239_v16  ;;  %17361 = vmatprep.subr.bf16.mxu0 %v17934_v38  ;;  %v16043_v16 = vld [vmem:[%s20871_s10 + $0x60] sm:$0xff] }
 0x70f   :  { %17242 = vmatprep.subr.bf16.mxu1 %v17241_v17  ;;  %v16044_v17 = vld [vmem:[%s20871_s10 + $0x68] sm:$0xff] }
 0x710   :  { %v17368_v46 = vpack.c.bf16 %v16044_v17, %v16043_v16  ;;  %v16605_v16 = vld [vmem:[%s20868_s7 + $0x108] sm:$0xff]  ;;  %v16607_v17 = vld [vmem:[%s20868_s7 + $0x118] sm:$0xff] }
 0x711   :  { %17363 = vmatpush1.bf16.msra.mxu0 %v17362_v43  ;;  %v16598_v43 = vld [vmem:[%s20868_s7 + $0xe8] sm:$0xff]  ;;  %v17289_v13 = vpack.c.bf16 %v16607_v17, %v16605_v16  ;;  %v16655_v16 = vld [vmem:[%s20868_s7 + $0x238] sm:$0x1] }
 0x712   :  { %17244 = vmatpush3.bf16.msra.mxu1 %v17243_v10  ;;  %17364 = vmatprep.subr.bf16.mxu0 %v17934_v38  ;;  %v16048_v10 = vld [vmem:[%s20871_s10 + $0x88] sm:$0xff] }
 0x713   :  { %17246 = vmatprep.subr.bf16.mxu1 %v17245_v2 }
 0x715   :  { %14936 = vmatmul.mubr.f32.vlgmr.msra.gmra.mrb[66].mxu1 %v14710_v18  ;;  %17366 = vmatpush1.bf16.msra.mxu0 %v17365_v5  ;;  %v16051_v18 = vld [vmem:[%s20871_s10 + $0xa0] sm:$0xff] }
 0x716   :  { %14940 = vmatprep.mubr.f32.mxu1 %v14716_v41  ;;  %17248 = vmatpush3.bf16.msra.mxu1 %v17245_v2  ;;  %v17374_v2 = vpack.c.bf16 %v16048_v10, %v16047_v50  ;;  %v17380_v41 = vpack.c.bf16 %v16052_v62, %v16051_v18  ;;  %v16597_v5 = vld [vmem:[%s20868_s7 + $0xe0] sm:$0xff]  ;;  %v16609_v50 = vld [vmem:[%s20868_s7 + $0x128] sm:$0xff]  ;;  %v16611_v10 = vld [vmem:[%s20868_s7 + $0x138] sm:$0x1] }
 0x717   :  { %17147 = vmatprep.subr.msk.mxu1 %vm14792_vm1, %v14784_v57  ;;  %17367 = vmatprep.subr.bf16.mxu0 %v17934_v38  ;;  %v17293_v44 = vpack.c.bf16 %v16611_v10, %v16609_v50  ;;  %v16610_v18 = vld [vmem:[%s20868_s7 + $0x130] sm:$0x1]  ;;  %v16616_v62 = vld [vmem:[%s20868_s7 + $0x148] sm:$0xff]  ;;  %v16662_v10 = vld [vmem:[%s20868_s7 + $0x258] sm:$0xff] }
 0x718   :  { %v16660_v50 = vld [vmem:[%s20868_s7 + $0x248] sm:$0xff] }
 0x719   :  { %14941 = vmatmul.mubr.f32.gmra.mrb[68].mxu1 %v14715_v36  ;;  %17369 = vmatpush1.bf16.msra.mxu0 %v17368_v46 }
 0x71a   :  { %17149 = vmatprep.mubr.msk.f32.mxu1 %vm14785_vm3, %v14712_v29  ;;  %17148 = vmatpush3.msk.msra.mxu1 %vm14792_vm1, %v14784_v57 }
 0x71b   :  { %16565 = vmatprep.subr.msk.mxu1 %vm15040_vm5, %v15023_v53  ;;  %17370 = vmatprep.subr.bf16.mxu0 %v17934_v38 }
 0x71d   :  { %17150 = vmatmul.mubr.msk.f32.vlgmr.msra.gmra.mrb[70].mxu1 %vm14785_vm3, %v14717_v61  ;;  %17372 = vmatpush1.bf16.msra.mxu0 %v17371_v23  ;;  %v16606_v23 = vld [vmem:[%s20868_s7 + $0x110] sm:$0xff] }
 0x71e   :  { %15111 = vmatprep.mubr.f32.mxu1 %v20894_v54  ;;  %16566 = vmatpush1.msk.msra.mxu1 %vm15040_vm5, %v15022_v1  ;;  %v16571_v1 = vld [vmem:[%s20868_s7 + $0x40] sm:$0xff] }
 0x71f   :  { %17250 = vmatprep.subr.bf16.mxu1 %v17249_v45  ;;  %17373 = vmatprep.subr.bf16.mxu0 %v17934_v38  ;;  %v16573_v45 = vld [vmem:[%s20868_s7 + $0x50] sm:$0xff] }
 0x720   :  { %v17261_v20 = vpack.c.bf16 %v16573_v45, %v16571_v1 }
 0x721   :  { %16567 = vmatmul.mubr.msk.f32.vlgmr.msra.gmra.mrb[72].mxu1 %vm15036_vm11, %v15021_v47  ;;  %17375 = vmatpush1.bf16.msra.mxu0 %v17374_v2  ;;  %v17291_v2 = vpack.c.bf16 %v16606_v23, %v16604_v34  ;;  %v16652_v34 = vld [vmem:[%s20868_s7 + $0x220] sm:$0xff]  ;;  %v16654_v23 = vld [vmem:[%s20868_s7 + $0x230] sm:$0x1] }
 0x722   :  { %17252 = vmatpush1.bf16.msra.mxu1 %v17251_v63  ;;  %15201 = vmatprep.mubr.f32.mxu1 %v20894_v54 }
 0x723   :  { %17255 = vmatprep.subr.msk.bf16.mxu1 %vm20411_vm7, %v17253_v30  ;;  %17376 = vmatprep.subr.bf16.mxu0 %v17934_v38 }
 0x725   :  { %17378 = vmatpush1.bf16.msra.mxu0 %v17377_v7  ;;  %v16608_v7 = vld [vmem:[%s20868_s7 + $0x120] sm:$0xff] }
 0x726   :  { %17258 = vmatpush1.bf16.msk.msra.mxu1 %vm20411_vm7, %v17256_v32  ;;  %17379 = vmatprep.subr.bf16.mxu0 %v17934_v38  ;;  %v16575_v32 = vld [vmem:[%s20868_s7 + $0x60] sm:$0xff] }
 0x727   :  { %17260 = vmatprep.subr.bf16.mxu1 %v17259_v14  ;;  %v16585_v14 = vld [vmem:[%s20868_s7 + $0x98] sm:$0xff]  ;;  %v17266_v49 = vpack.c.bf16 %v16577_v59, %v16575_v32  ;;  %v16628_v32 = vld [vmem:[%s20868_s7 + $0x190] sm:$0xff]  ;;  %v16631_v59 = vld [vmem:[%s20868_s7 + $0x1a8] sm:$0xff] }
 0x728   :  { %v17269_v4 = vpack.c.bf16 %v16585_v14, %v16583_v11  ;;  %v16633_v11 = vld [vmem:[%s20868_s7 + $0x1b8] sm:$0x1] }
 0x729   :  { %17381 = vmatpush1.bf16.msra.mxu0 %v17380_v41  ;;  %v16618_v41 = vld [vmem:[%s20868_s7 + $0x158] sm:$0xff] }
 0x72a   :  { %17382 = vmatprep.subr.bf16.mxu0 %v17934_v38 }
 0x7c8   :  { %v16830_v55 = vpop.f32.mrb[62].mxu1 }
 0x7c9   :  { %v16831_v33 = vpop.f32.mrb[63].mxu1 }
 0x7ca   :  { %v16832_v40 = vadd.f32 %v16831_v33, %v16830_v55  ;;  %v16596_v55 = vld [vmem:[%s20868_s7 + $0xd8] sm:$0xff]  ;;  %v16593_v33 = vld [vmem:[%s20868_s7 + $0xc0] sm:$0xff] }
 0x7cb   :  { %v17279_v48 = vpack.c.bf16 %v16596_v55, %v16594_v12  ;;  %v16644_v12 = vld [vmem:[%s20868_s7 + $0x1f8] sm:$0x1] }
 0x7ce   :  { %v16833_v8 = vpop.f32.mrb[64].mxu1 }
 0x7cf   :  { %v16834_v39 = vpop.f32.mrb[65].mxu1 }
 0x7d0   :  { %v16835_v51 = vadd.f32 %v16834_v39, %v16833_v8  ;;  %v17283_v39 = vpack.c.bf16 %v16600_v37, %v16598_v43  ;;  %v16649_v43 = vld [vmem:[%s20868_s7 + $0x208] sm:$0xff]  ;;  %v16651_v37 = vld [vmem:[%s20868_s7 + $0x218] sm:$0xff] }
 0x7e8   :  { %v16868_v57 = vpop.f32.mrb[66].mxu1 }
 0x7e9   :  { %v16869_v36 = vpop.f32.mrb[67].mxu1 }
 0x7ea   :  { %v16870_v29 = vadd.f32 %v16869_v36, %v16868_v57  ;;  %v17296_v57 = vpack.c.bf16 %v16610_v18, %v16608_v7  ;;  %v17299_v36 = vpack.c.bf16 %v16618_v41, %v16616_v62  ;;  %v16664_v7 = vld [vmem:[%s20868_s7 + $0x268] sm:$0xff]  ;;  %v16666_v18 = vld [vmem:[%s20868_s7 + $0x278] sm:$0x1] }
 0x7eb   :  { %v17343_v41 = vpack.c.bf16 %v16666_v18, %v16664_v7 }
 0x7ec   :  { %v16871_v61 = vpop.f32.mrb[68].mxu1  ;;  %v14938_v53 = vadd.f32 %v16870_v29, %v16832_v40  ;;  %v16595_v40 = vld [vmem:[%s20868_s7 + $0xd0] sm:$0xff]  ;;  %v16615_v29 = vld [vmem:[%s20868_s7 + $0x140] sm:$0xff] }
 0x7ed   :  { %v16872_v15 = vpop.f32.mrb[69].mxu1  ;;  %v17281_v60 = vpack.c.bf16 %v16595_v40, %v16593_v33  ;;  %v16641_v33 = vld [vmem:[%s20868_s7 + $0x1e0] sm:$0xff]  ;;  %v16643_v40 = vld [vmem:[%s20868_s7 + $0x1f0] sm:$0x1] }
 0x7ee   :  { %v16873_v22 = vadd.f32 %v16872_v15, %v16871_v61  ;;  %v16617_v61 = vld [vmem:[%s20868_s7 + $0x150] sm:$0xff]  ;;  %v16622_v15 = vld [vmem:[%s20868_s7 + $0x178] sm:$0x1] }
 0x7f0   :  { %v14943_v47 = vadd.f32 %v16873_v22, %v16835_v51  ;;  %v17151_v63 = vpop.f32.mrb[70].mxu1  ;;  %v16599_v51 = vld [vmem:[%s20868_s7 + $0xf0] sm:$0x1]  ;;  %v17301_v22 = vpack.c.bf16 %v16617_v61, %v16615_v29 }
 0x7f1   :  { %v15012_v58 = vpop.f32.mrb[71].mxu1  ;;  %v17286_v46 = vpack.c.bf16 %v16599_v51, %v16597_v5  ;;  %v16650_v5 = vld [vmem:[%s20868_s7 + $0x210] sm:$0xff]  ;;  %v16653_v51 = vld [vmem:[%s20868_s7 + $0x228] sm:$0xff] }
 0x7f2   :  { %v20515_v30 = vadd.f32 %v17151_v63, %v14943_v47  ;;  %v20517_v6 = vadd.f32 %v15012_v58, %v14938_v53  ;;  %v16620_v53 = vld [vmem:[%s20868_s7 + $0x168] sm:$0xff]  ;;  %v16629_v63 = vld [vmem:[%s20868_s7 + $0x198] sm:$0xff]  ;;  %v17306_v58 = vpack.c.bf16 %v16621_v35, %v16619_v26  ;;  %v15024_v26 = vld [vmem:[%s20870_s9] sm:$0x3]  ;;  %s16232_s9 = sshll.u32 %s17935_s28, 4  ;;  %s16233_s9 = int_to_ptr.vmem [resolvable:$true] %s16232_s9 }
 0x7f3   :  { %v17303_v45 = vpack.c.bf16 %v16622_v15, %v16620_v53  ;;  %v16627_v47 = vld [vmem:[%s20868_s7 + $0x188] sm:$0xff]  ;;  %v16053_v53 = vld [vmem:[%s20871_s10 + $0xb0] sm:$0xff]  ;;  %v16054_v15 = vld [vmem:[%s20871_s10 + $0xb8] sm:$0xff]  ;;  %p17888_p1 = scmp.lt.s32.totalorder %s16233_s9, %s16233_s9 }
 0x7f4   :  { %16570 = vmatmul.mubr.msk.f32.vlgmr.msra.gmra.mrb[72].mxu1 %vm15126_vm8, %v20517_v6  ;;  %v15219_v24 = vrot.slane %v20517_v6, 1  ;;  %v15310_v8 = vrot.slane %v20517_v6, 2  ;;  %v15401_v19 = vrot.slane %v20517_v6, 3  ;;  %v15492_v1 = vrot.slane %v20517_v6, 4 }
 0x7f5   :  { %17262 = vmatpush1.bf16.msra.mxu1 %v17261_v20  ;;  %15292 = vmatprep.mubr.f32.mxu1 %v20894_v54  ;;  %v17309_v20 = vpack.c.bf16 %v16629_v63, %v16627_v47  ;;  %v15947_v61 = vrot.slane %v20515_v30, 1 }
 0x7f6   :  { %17265 = vmatprep.subr.msk.bf16.mxu1 %vm20411_vm7, %v17263_v52  ;;  %v16626_v52 = vld [vmem:[%s20868_s7 + $0x180] sm:$0xff] }
 0x7f7   :  { %v17311_v14 = vpack.c.bf16 %v16628_v32, %v16626_v52  ;;  %v16132_v32 = vld [vmem:[%s20873_s12] sm:$0xff] }
 0x7f9   :  { %17268 = vmatpush1.bf16.msk.msra.mxu1 %vm20411_vm7, %v17266_v49  ;;  %v15583_v49 = vrot.slane %v20517_v6, 5 }
 0x7fa   :  { %17270 = vmatprep.subr.bf16.mxu1 %v17269_v4  ;;  %v17313_v4 = vpack.c.bf16 %v16633_v11, %v16631_v59  ;;  %v16133_v59 = vld [vmem:[%s20873_s12 + $0x8] sm:$0xff] }
 0x7fc   :  { %16581 = vmatmul.mubr.msk.f32.vlgmr.msra.gmra.mrb[72].mxu1 %vm15126_vm8, %v15219_v24  ;;  %v17319_v24 = vpack.c.bf16 %v16640_v21, %v16638_v31  ;;  %v16136_v21 = vld [vmem:[%s20873_s12 + $0x20] sm:$0xff] }
 0x7fd   :  { %17272 = vmatpush1.bf16.msra.mxu1 %v17271_v42  ;;  %15383 = vmatprep.mubr.f32.mxu1 %v20894_v54  ;;  %v17316_v42 = vpack.c.bf16 %v16632_v28, %v16630_v3  ;;  %v16134_v3 = vld [vmem:[%s20873_s12 + $0x10] sm:$0xff]  ;;  %v16135_v28 = vld [vmem:[%s20873_s12 + $0x18] sm:$0xff] }
 0x7fe   :  { %17275 = vmatprep.subr.msk.bf16.mxu1 %vm20411_vm7, %v17273_v0  ;;  %v16637_v0 = vld [vmem:[%s20868_s7 + $0x1c0] sm:$0xff]  ;;  %v17389_v31 = vpack.c.bf16 %v16135_v28, %v16134_v3 }
 0x7ff   :  { %v17321_v55 = vpack.c.bf16 %v16639_v27, %v16637_v0  ;;  %v16138_v0 = vld [vmem:[%s20873_s12 + $0x30] sm:$0xff]  ;;  %v16139_v27 = vld [vmem:[%s20873_s12 + $0x38] sm:$0xff] }
 0x801   :  { %17278 = vmatpush1.bf16.msk.msra.mxu1 %vm20411_vm7, %v17276_v25  ;;  %v15674_v25 = vrot.slane %v20517_v6, 6 }
 0x802   :  { %17280 = vmatprep.subr.bf16.mxu1 %v17279_v48  ;;  %v17323_v48 = vpack.c.bf16 %v16644_v12, %v16642_v56  ;;  %v17395_v56 = vpack.c.bf16 %v16139_v27, %v16138_v0  ;;  %v16140_v12 = vld [vmem:[%s20873_s12 + $0x40] sm:$0xff] }
 0x804   :  { %16592 = vmatmul.mubr.msk.f32.vlgmr.msra.gmra.mrb[72].mxu1 %vm15126_vm8, %v15310_v8  ;;  %v17329_v8 = vpack.c.bf16 %v16651_v37, %v16649_v43  ;;  %v16144_v43 = vld [vmem:[%s20873_s12 + $0x60] sm:$0xf] }
 0x805   :  { %17282 = vmatpush1.bf16.msra.mxu1 %v17281_v60  ;;  %15474 = vmatprep.mubr.f32.mxu1 %v20894_v54  ;;  %v17326_v60 = vpack.c.bf16 %v16643_v40, %v16641_v33  ;;  %v16143_v33 = vld [vmem:[%s20873_s12 + $0x58] sm:$0xff] }
 0x806   :  { %17285 = vmatprep.subr.msk.bf16.mxu1 %vm20411_vm7, %v17283_v39  ;;  %v16648_v39 = vld [vmem:[%s20868_s7 + $0x200] sm:$0xff] }
 0x807   :  { %v17331_v17 = vpack.c.bf16 %v16650_v5, %v16648_v39 }
 0x809   :  { %17288 = vmatpush1.bf16.msk.msra.mxu1 %vm20411_vm7, %v17286_v46  ;;  %v15765_v46 = vrot.slane %v20517_v6, 7  ;;  %v17336_v6 = vpack.c.bf16 %v16654_v23, %v16652_v34 }
 0x80a   :  { %17290 = vmatprep.subr.bf16.mxu1 %v17289_v13  ;;  %v17333_v13 = vpack.c.bf16 %v16655_v16, %v16653_v51 }
 0x80c   :  { %16603 = vmatmul.mubr.msk.f32.vlgmr.msra.gmra.mrb[72].mxu1 %vm15126_vm8, %v15401_v19  ;;  %v16659_v19 = vld [vmem:[%s20868_s7 + $0x240] sm:$0xff] }
 0x80d   :  { %17292 = vmatpush1.bf16.msra.mxu1 %v17291_v2  ;;  %15565 = vmatprep.mubr.f32.mxu1 %v20894_v54  ;;  %v17339_v2 = vpack.c.bf16 %v16662_v10, %v16660_v50 }
 0x80e   :  { %17295 = vmatprep.subr.msk.bf16.mxu1 %vm20411_vm7, %v17293_v44  ;;  %v16661_v44 = vld [vmem:[%s20868_s7 + $0x250] sm:$0xff] }
 0x80f   :  { %v17341_v62 = vpack.c.bf16 %v16661_v44, %v16659_v19 }
 0x811   :  { %17298 = vmatpush1.bf16.msk.msra.mxu1 %vm20411_vm7, %v17296_v57  ;;  %v16663_v57 = vld [vmem:[%s20868_s7 + $0x260] sm:$0xff] }
 0x812   :  { %17300 = vmatprep.subr.bf16.mxu1 %v17299_v36  ;;  %v16665_v36 = vld [vmem:[%s20868_s7 + $0x270] sm:$0x1] }
 0x813   :  { %v17346_v29 = vpack.c.bf16 %v16665_v36, %v16663_v57 }
 0x814   :  { %16614 = vmatmul.mubr.msk.f32.vlgmr.msra.gmra.mrb[72].mxu1 %vm15126_vm8, %v15492_v1 }
 0x815   :  { %17302 = vmatpush1.bf16.msra.mxu1 %v17301_v22  ;;  %15656 = vmatprep.mubr.f32.mxu1 %v20894_v54  ;;  %v17383_v22 = vpack.c.bf16 %v16054_v15, %v16053_v53 }
 0x816   :  { %17305 = vmatprep.subr.msk.bf16.mxu1 %vm20411_vm7, %v17303_v45 }
 0x817   :  { %17384 = vmatpush1.bf16.msra.mxu0 %v17383_v22 }
 0x818   :  { %16109 = vmatprep.subr.mxu0 %v20894_v54 }
 0x819   :  { %17308 = vmatpush1.bf16.msk.msra.mxu1 %vm20411_vm7, %v17306_v58 }
 0x81a   :  { %17310 = vmatprep.subr.bf16.mxu1 %v17309_v20 }
 0x81b   :  { %16110 = vmatpush1.msra.mxu0 %v16055_v9 }
 0x81c   :  { %16625 = vmatmul.mubr.msk.f32.vlgmr.msra.gmra.mrb[72].mxu1 %vm15126_vm8, %v15583_v49  ;;  %17385 = vmatprep.subr.bf16.mxu0 %v17934_v38  ;;  %v17386_v49 = vpack.c.bf16 %v16133_v59, %v16132_v32 }
 0x81d   :  { %17312 = vmatpush1.bf16.msra.mxu1 %v17311_v14  ;;  %15747 = vmatprep.mubr.f32.mxu1 %v20894_v54 }
 0x81e   :  { %17315 = vmatprep.subr.msk.bf16.mxu1 %vm20411_vm7, %v17313_v4 }
 0x821   :  { %17318 = vmatpush1.bf16.msk.msra.mxu1 %vm20411_vm7, %v17316_v42  ;;  %v16137_v42 = vld [vmem:[%s20873_s12 + $0x28] sm:$0xff] }
 0x822   :  { %17320 = vmatprep.subr.bf16.mxu1 %v17319_v24  ;;  %v17392_v24 = vpack.c.bf16 %v16137_v42, %v16136_v21 }
 0x824   :  { %16636 = vmatmul.mubr.msk.f32.vlgmr.msra.gmra.mrb[72].mxu1 %vm15126_vm8, %v15674_v25 }
 0x825   :  { %17322 = vmatpush1.bf16.msra.mxu1 %v17321_v55  ;;  %15838 = vmatprep.mubr.f32.mxu1 %v20894_v54  ;;  %v16141_v55 = vld [vmem:[%s20873_s12 + $0x48] sm:$0xff] }
 0x826   :  { %17325 = vmatprep.subr.msk.bf16.mxu1 %vm20411_vm7, %v17323_v48  ;;  %v17398_v25 = vpack.c.bf16 %v16141_v55, %v16140_v12  ;;  %v16142_v48 = vld [vmem:[%s20873_s12 + $0x50] sm:$0xff]  ;;  %s17883_s12 = scalar_lea.vmem %s16233_s9, 16 }
 0x827   :  { %v17401_v40 = vpack.c.bf16 %v16143_v33, %v16142_v48  ;;  %p17884_p0 = scmp.ne.s32.totalorder %s16233_s9, %s17883_s12 }
 0x829   :  { %17328 = vmatpush1.bf16.msk.msra.mxu1 %vm20411_vm7, %v17326_v60 }
 0x82a   :  { %17330 = vmatprep.subr.bf16.mxu1 %v17329_v8 }
 0x82c   :  { %16647 = vmatmul.mubr.msk.f32.vlgmr.msra.gmra.mrb[72].mxu1 %vm15126_vm8, %v15765_v46 }
 0x82d   :  { %17332 = vmatpush1.bf16.msra.mxu1 %v17331_v17  ;;  %15929 = vmatprep.mubr.f32.mxu1 %v20894_v54 }
 0x82e   :  { %17335 = vmatprep.subr.msk.bf16.mxu1 %vm20411_vm7, %v17333_v13 }
 0x831   :  { %17338 = vmatpush1.bf16.msk.msra.mxu1 %vm20411_vm7, %v17336_v6 }
 0x832   :  { %17340 = vmatprep.subr.bf16.mxu1 %v17339_v2 }
 0x834   :  { %16658 = vmatmul.mubr.msk.f32.vlgmr.msra.gmra.mrb[72].mxu1 %vm15126_vm8, %v20515_v30  ;;  %v15026_v30 = vlaneseq }
 0x835   :  { %17342 = vmatpush1.bf16.msra.mxu1 %v17341_v62  ;;  %16020 = vmatprep.mubr.f32.mxu1 %v20894_v54 }
 0x836   :  { %17345 = vmatprep.subr.msk.bf16.mxu1 %vm20411_vm7, %v17343_v41  ;;  %v15027_v1 = vshrl.u32 %v15026_v30, 7 }
 0x838   :  { %v15028_v45 = vsub.s32 0, %v15027_v1  ;;  %v15032_v35 = vsub.s32 1, %v15027_v1 }
 0x839   :  { %17348 = vmatpush1.bf16.msk.msra.mxu1 %vm20411_vm7, %v17346_v29 }
 0x83a   :  { %v15029_v47 = vrot.slane %v15024_v26, %v15028_v45  ;;  %v15033_v63 = vrot.slane %v15024_v26, %v15032_v35 }
 0x83c   :  { %16669 = vmatmul.mubr.msk.f32.vlgmr.msra.gmra.mrb[72].mxu1 %vm15126_vm8, %v15947_v61 }
 0x90f   :  { %v16022_v58 = vpop.f32.mrb[72].mxu1 }
 0x910   :  { %v17409_v20 = vadd.f32 %v16022_v58, %v15029_v47  ;;  %v16024_v52 = vpop.f32.mrb[73].mxu1 }
 0x911   :  { %v17410_v11 = vadd.f32 %v16024_v52, %v15033_v63 }
 0x912   :  { %v16029_v4 = vmax.f32 %v17409_v20, 0.0 }
 0x913   :  { %v16030_v14 = vmax.f32 %v17410_v11, 0.0 }
 0x915   :  { %16670 = vmatprep.mubr.msk.f32.mxu0 %vm16057_vm9, %v16030_v14 }
 0x916   :  { %16126 = vmatmul.mubr.f32.vlgmr.msra.gmra.mrb[10].mxu0 %v16029_v4 }
 0x917   :  { %17387 = vmatpush3.bf16.msra.mxu0 %v17386_v49  ;;  %17178 = vmatprep.mubr.msk.f32.mxu0 %vm17916_vm2, %v20894_v54  ;;  %vm16150_vm2 = vcmask 1043456  }
 0x918   :  { %17388 = vmatprep.subr.bf16.mxu0 %v17934_v38 }
 0x91b   :  { %17390 = vmatpush3.bf16.msra.mxu0 %v17389_v31 }
 0x91c   :  { %17391 = vmatprep.subr.bf16.mxu0 %v17934_v38 }
 0x91f   :  { %17393 = vmatpush3.bf16.msra.mxu0 %v17392_v24 }
 0x920   :  { %17394 = vmatprep.subr.bf16.mxu0 %v17934_v38 }
 0x923   :  { %17396 = vmatpush3.bf16.msra.mxu0 %v17395_v56 }
 0x924   :  { %17397 = vmatprep.subr.bf16.mxu0 %v17934_v38 }
 0x927   :  { %17399 = vmatpush3.bf16.msra.mxu0 %v17398_v25 }
 0x928   :  { %17400 = vmatprep.subr.bf16.mxu0 %v17934_v38  ;;  %v16056_v38 = vld [vmem:[%s20872_s11] sm:$0x1]  ;;  %s17887_s11 = scalar_lea.vmem %s16233_s9, 32 }
 0x929   :  { %p17889_p2 = scmp.lt.s32.totalorder %s17887_s11, %s17883_s12 }
 0x92b   :  { %17402 = vmatpush3.bf16.msra.mxu0 %v17401_v40  ;;  %p17890_p3 = por %p17889_p2, %p17888_p1 }
 0x92c   :  { %17176 = vmatprep.subr.mxu0 %v20894_v54  ;;  %v16145_v54 = vld [vmem:[%s20874_s13] sm:$0x1] }
 0x92d   :  { %p17891_p4 = pnand %p17890_p3, %p17884_p0 }
 0x92f   :  { %17177 = vmatpush3.msk.msra.mxu0 %vm16150_vm2, %v16144_v43 }
 0x9e9   :  { %v16127_v37 = vpop.f32.mrb[10].mxu0 }
 0x9ea   :  { %v16128_v60 = vadd.f32 %v16127_v37, %v16056_v38  ;;  %v16129_v8 = vpop.f32.mrb[11].mxu0 }
 0x9ec   :  { %v16131_v39 = vmax.f32 %v16128_v60, 0.0 }
 0x9ee   :  { %17179 = vmatmul.mubr.msk.f32.vlgmr.msra.gmra.mrb[12].mxu0 %vm16146_vm10, %v16131_v39 }
 0xac1   :  { %v16220_v5 = vpop.f32.mrb[12].mxu0 }
 0xac2   :  { %v16221_v51 = vadd.f32 %v16220_v5, %v16145_v54  ;;  %v17180_v16 = vpop.f32.mrb[13].mxu0 }
 0xac4   :  { %16225 = vst.msk [vmem:[#allocation2] sm:$0x1] %vm16224_vm12, %v16221_v51 }
 0xac5   :  { %17894 = shalt.err (!%p17891_p4)
}
 0xac6   :  { %s17895_s13 = scalar_lea.hbm %s20875_s14, 16 }
 0xac7   :  { %p17896_p5 = scmp.ne.s32.totalorder %s20875_s14, %s17895_s13  ;;  %p17899_p6 = scmp.lt.u32.totalorder %s17895_s13, %s20875_s14 }
 0xac9   :  { %p17901_p7 = pnand %p17899_p6, %p17896_p5 }
 0xacb   :  { %17904 = shalt.err (!%p17901_p7)
}
 0xacc   :  { %16235 = dma.vmem_to_hbm [thread:$0]  %s16233_s9, 16, %s20875_s14, [#allocation3]  }
 0xacd   :  { %17905 = dma.done.wait [#allocation3], 16  }
 0xace   :  { %17906 = vsyncadd [#allocation3], 4294967280 }
 0xacf   :  { %16239 = vsyncpa [#allocation3], 1 }

</bundles_post_ra>
